<compile_context>
chip_gen: v7x
topology: tpu7x:2x2x1
jax: 0.10.0
libtpu: 0.0.40
codegen_flags: <defaults>
</compile_context>

<pallas_src>
from functools import partial

import jax
import jax.numpy as jnp
from jax.experimental import pallas as pl
from jax.experimental.pallas import tpu as pltpu


def _pick_tile(n, max_tile):
    """Largest tile <= max_tile that divides n and is a multiple of 8, else n."""
    if n <= max_tile:
        return n
    for t in range(max_tile, 0, -8):
        if t % 8 == 0 and n % t == 0:
            return t
    return n


# ---------------------------------------------------------------------------
# Kernel 1: negative squared pairwise distance of L2-normalized node features.
#   dist = 2 * <xn_i, xn_j> - |xn_i|^2 - |xn_j|^2
# (identical formula to gcn_lib's pairwise_distance on F.normalize(x, dim=1)).
# Grid = (B, N // TNd): one query-row tile per step, full key set resident.
# ---------------------------------------------------------------------------
def _knn_dist_kernel(xrow_ref, xall_ref, sqall_ref, d_ref):
    xr = xrow_ref[...]                                        # (TNd, C) f32
    xa = xall_ref[...]                                        # (N,  C) f32
    inner = jax.lax.dot_general(
        xr, xa, (((1,), (1,)), ((), ())),
        preferred_element_type=jnp.float32)                   # (TNd, N) on MXU
    sq_r = jnp.sum(xr * xr, axis=-1, keepdims=True)           # (TNd, 1) VPU/XLU
    d_ref[...] = 2.0 * inner - sq_r - sqall_ref[...]          # sqall: (1, N)


# ---------------------------------------------------------------------------
# Kernel 2: EdgeConv hot path, one grid step per (batch, N-tile).
#   base = x_i @ W1 + bias                       (f32, once per tile)
#   out  = max_k relu(base + (x_j - x_i)_k @ W2) (k unrolled, running max)
# diff_ref streams in compute_dtype (bf16 by default); accumulation stays f32.
# ---------------------------------------------------------------------------
def _edge_conv_kernel(xi_ref, diff_ref, w1_ref, w2_ref, b_ref, o_ref):
    base = jnp.dot(xi_ref[...], w1_ref[...],
                   preferred_element_type=jnp.float32) + b_ref[...]  # (TN, Cp)
    w2 = w2_ref[...]
    k = diff_ref.shape[0]
    acc = None
    for kk in range(k):                                       # static unroll
        val = base + jnp.dot(diff_ref[kk], w2,
                             preferred_element_type=jnp.float32)
        val = jnp.maximum(val, 0.0)                           # ReLU
        acc = val if acc is None else jnp.maximum(acc, val)   # running max over k
    o_ref[...] = acc


@partial(jax.jit, static_argnames=("k", "compute_dtype"))
def dy_graph_conv2d(x_nchw, weight, bias, k=9, compute_dtype=jnp.bfloat16):
    """Forward of DyGraphConv2d(conv='edge', act='relu', norm=None, r=1, d=1).

    x_nchw: (B, C, H, W) float32
    weight: (Cout, 2C) float32  (1x1 Conv2d weight squeezed)
    bias:   (Cout,)    float32
    returns (B, Cout, H, W) float32
    """
    B, C, H, W = x_nchw.shape
    N = H * W
    Cout = weight.shape[0]
    Cout_pad = max(128, ((Cout + 127) // 128) * 128)          # lane-dense output

    # NCHW -> (B, N, C) node features (same ordering as x.reshape(B, C, -1, 1)).
    x_flat = jnp.transpose(x_nchw.reshape(B, C, N), (0, 2, 1)).astype(jnp.float32)

    # --- kNN graph -----------------------------------------------------------
    # F.normalize(x, p=2, dim=1) in node layout (eps = 1e-12), done in glue.
    nrm = jnp.sqrt(jnp.sum(x_flat * x_flat, axis=-1, keepdims=True))
    xn = x_flat / jnp.maximum(nrm, 1e-12)
    sq_all = jnp.sum(xn * xn, axis=-1)[:, None, :]            # (B, 1, N)

    TNd = _pick_tile(N, 256)
    dist = pl.pallas_call(
        _knn_dist_kernel,
        out_shape=jax.ShapeDtypeStruct((B, N, N), jnp.float32),
        grid=(B, N // TNd),
        in_specs=[
            pl.BlockSpec((None, TNd, C), lambda b, i: (b, i, 0)),   # query rows
            pl.BlockSpec((None, N, C), lambda b, i: (b, 0, 0)),     # all keys
            pl.BlockSpec((None, 1, N), lambda b, i: (b, 0, 0)),     # |xn_j|^2
        ],
        out_specs=pl.BlockSpec((None, TNd, N), lambda b, i: (b, i, 0)),
        compiler_params=pltpu.CompilerParams(
            dimension_semantics=("parallel", "parallel"),
            vmem_limit_bytes=32 * 1024 * 1024),
    )(xn, xn, sq_all)

    # TODO(synk): torch.topk (k-NN selection) and batched_index_select (data-
    # dependent gather) stay in JAX glue; a fused per-row-tile running top-k
    # inside the distance kernel (avoiding the (B,N,N) HBM round trip) is the
    # remaining v7x optimization not implemented here.
    nn_idx = jax.lax.top_k(dist, k)[1]                        # (B, N, k) == edge_index[0]
    idx_t = jnp.transpose(nn_idx, (0, 2, 1))                  # transpose indices, not data
    x_j = jax.vmap(lambda xf_b, idx_b: xf_b[idx_b])(x_flat, idx_t)   # (B, k, N, C)
    diff = (x_j - x_flat[:, None, :, :]).astype(compute_dtype)       # (B, k, N, C)

    # Split / pad the 1x1-conv weight: W = [W1 | W2] over the 2C input channels.
    w = weight.astype(jnp.float32)
    w1 = jnp.zeros((C, Cout_pad), jnp.float32).at[:, :Cout].set(w[:, :C].T)
    w2 = jnp.zeros((C, Cout_pad), compute_dtype).at[:, :Cout].set(
        w[:, C:].T.astype(compute_dtype))
    b_pad = jnp.zeros((1, Cout_pad), jnp.float32).at[0, :Cout].set(
        bias.astype(jnp.float32))

    TN = _pick_tile(N, 128)
    out = pl.pallas_call(
        _edge_conv_kernel,
        out_shape=jax.ShapeDtypeStruct((B, N, Cout_pad), jnp.float32),
        grid=(B, N // TN),
        in_specs=[
            pl.BlockSpec((None, TN, C), lambda b, i: (b, i, 0)),        # x_i tile (f32)
            pl.BlockSpec((None, k, TN, C), lambda b, i: (b, 0, i, 0)),  # diff tile (bf16)
            pl.BlockSpec((C, Cout_pad), lambda b, i: (0, 0)),           # W1
            pl.BlockSpec((C, Cout_pad), lambda b, i: (0, 0)),           # W2
            pl.BlockSpec((1, Cout_pad), lambda b, i: (0, 0)),           # bias
        ],
        out_specs=pl.BlockSpec((None, TN, Cout_pad), lambda b, i: (b, i, 0)),
        compiler_params=pltpu.CompilerParams(
            dimension_semantics=("parallel", "parallel"),
            vmem_limit_bytes=32 * 1024 * 1024),
    )(x_flat, diff, w1, w2, b_pad)

    out = out[:, :, :Cout]                                    # drop channel padding
    return jnp.transpose(out, (0, 2, 1)).reshape(B, Cout, H, W)


def _reference(x_nchw, weight, bias, k=9):
    """Pure-JAX f32 reference matching the PyTorch forward semantics."""
    B, C, H, W = x_nchw.shape
    N = H * W
    xf = jnp.transpose(x_nchw.reshape(B, C, N), (0, 2, 1))
    xn = xf / jnp.maximum(jnp.linalg.norm(xf, axis=-1, keepdims=True), 1e-12)
    dist = -jnp.sum((xn[:, :, None, :] - xn[:, None, :, :]) ** 2, axis=-1)
    nn_idx = jax.lax.top_k(dist, k)[1]
    x_j = jax.vmap(lambda a, i: a[i, :])(xf, nn_idx)          # (B, N, k, C)
    x_i = jnp.broadcast_to(xf[:, :, None, :], x_j.shape)
    feat = jnp.concatenate([x_i, x_j - x_i], axis=-1)         # (B, N, k, 2C)
    val = jnp.einsum('bnkc,oc->bnko', feat, weight) + bias
    val = jnp.maximum(val, 0.0)
    out = jnp.max(val, axis=2)                                # (B, N, Cout)
    return jnp.transpose(out, (0, 2, 1)).reshape(B, weight.shape[0], H, W)


if __name__ == "__main__":
    # DyGraphConv2d(in_channels=4, out_channels=8, kernel_size=9, conv='edge',
    #               act='relu', norm=None, bias=True, dilation=1, r=1)
    B, C, H, W = 2, 4, 16, 16
    Cout, K = 8, 9

    key = jax.random.PRNGKey(0)
    kx, kw, kb = jax.random.split(key, 3)
    x = jax.random.normal(kx, (B, C, H, W), dtype=jnp.float32)
    weight = 0.1 * jax.random.normal(kw, (Cout, 2 * C), dtype=jnp.float32)
    bias = 0.1 * jax.random.normal(kb, (Cout,), dtype=jnp.float32)

    ref = jax.block_until_ready(_reference(x, weight, bias, k=K))

    # Full-precision compute path: tight structural check.
    out_f32 = jax.block_until_ready(
        dy_graph_conv2d(x, weight, bias, k=K, compute_dtype=jnp.float32))
    assert out_f32.shape == (B, Cout, H, W), out_f32.shape
    assert jnp.allclose(out_f32, ref, atol=2e-3, rtol=2e-3), float(
        jnp.max(jnp.abs(out_f32 - ref)))

    # Default (perf) path: bf16-streamed neighbor differences, f32 accumulate.
    out_bf16 = jax.block_until_ready(
        dy_graph_conv2d(x, weight, bias, k=K, compute_dtype=jnp.bfloat16))
    assert out_bf16.shape == (B, Cout, H, W), out_bf16.shape
    assert jnp.allclose(out_bf16, ref, atol=5e-2, rtol=5e-2), float(
        jnp.max(jnp.abs(out_bf16 - ref)))

    print("KERNEL_OK")
</pallas_src>

<mosaic_0001>
module attributes {stable_mosaic.version = 11 : i64} {
  func.func @_knn_dist_kernel(%arg0: i32, %arg1: i32, %arg2: memref<1x256x4xf32, #tpu.memory_space<vmem>>, %arg3: memref<1x256x4xf32, #tpu.memory_space<vmem>>, %arg4: memref<1x1x256xf32, #tpu.memory_space<vmem>>, %arg5: memref<1x256x256xf32, #tpu.memory_space<vmem>>) attributes {dimension_semantics = [#tpu.dimension_semantics<parallel>, #tpu.dimension_semantics<parallel>], iteration_bounds = array<i64: 2, 1>, scalar_prefetch = 0 : i64, scratch_operands = 0 : i64, tpu.core_type = #tpu.core_type<tc>, window_params = [{transform_indices = @transform_0, window_bounds = array<i64: 1, 256, 4>}, {transform_indices = @transform_1, window_bounds = array<i64: 1, 256, 4>}, {transform_indices = @transform_2, window_bounds = array<i64: 1, 1, 256>}, {transform_indices = @transform_3, window_bounds = array<i64: 1, 256, 256>}]} {
    %c0 = arith.constant 0 : index
    %c0_0 = arith.constant 0 : index
    %c0_1 = arith.constant 0 : index
    %0 = vector.load %arg2[%c0, %c0_0, %c0_1] : memref<1x256x4xf32, #tpu.memory_space<vmem>>, vector<1x256x4xf32>
    %1 = vector.shape_cast %0 : vector<1x256x4xf32> to vector<256x4xf32>
    %c0_2 = arith.constant 0 : index
    %c0_3 = arith.constant 0 : index
    %c0_4 = arith.constant 0 : index
    %2 = vector.load %arg3[%c0_2, %c0_3, %c0_4] : memref<1x256x4xf32, #tpu.memory_space<vmem>>, vector<1x256x4xf32>
    %3 = vector.shape_cast %2 : vector<1x256x4xf32> to vector<256x4xf32>
    %cst = arith.constant dense<0.000000e+00> : vector<256x256xf32>
    %4 = tpu.matmul %1, %3, %cst {dimension_numbers = #tpu.dot_dimension_numbers<[1], [1], [0], [0], [0, 0, 1, 0], [], []>} : vector<256x4xf32>, vector<256x4xf32>, vector<256x256xf32> -> vector<256x256xf32>
    %5 = arith.mulf %1, %1 : vector<256x4xf32>
    %cst_5 = arith.constant dense<0.000000e+00> : vector<256xf32>
    %6 = vector.multi_reduction <add>, %5, %cst_5 [1] : vector<256x4xf32> to vector<256xf32>
    %7 = vector.shape_cast %6 : vector<256xf32> to vector<256x1xf32>
    %cst_6 = arith.constant 2.000000e+00 : f32
    %8 = vector.broadcast %cst_6 : f32 to vector<256x256xf32>
    %9 = arith.mulf %8, %4 : vector<256x256xf32>
    %10 = vector.broadcast %7 : vector<256x1xf32> to vector<256x256xf32>
    %11 = arith.subf %9, %10 : vector<256x256xf32>
    %c0_7 = arith.constant 0 : index
    %c0_8 = arith.constant 0 : index
    %c0_9 = arith.constant 0 : index
    %12 = vector.load %arg4[%c0_7, %c0_8, %c0_9] : memref<1x1x256xf32, #tpu.memory_space<vmem>>, vector<1x1x256xf32>
    %13 = vector.shape_cast %12 : vector<1x1x256xf32> to vector<1x256xf32>
    %14 = vector.broadcast %13 : vector<1x256xf32> to vector<256x256xf32>
    %15 = arith.subf %11, %14 : vector<256x256xf32>
    %c0_10 = arith.constant 0 : index
    %c0_11 = arith.constant 0 : index
    %c0_12 = arith.constant 0 : index
    %16 = vector.load %arg5[%c0_10, %c0_11, %c0_12] : memref<1x256x256xf32, #tpu.memory_space<vmem>>, vector<1x256x256xf32>
    %17 = vector.shape_cast %16 : vector<1x256x256xf32> to vector<256x256xf32>
    %18 = vector.shape_cast %15 : vector<256x256xf32> to vector<1x256x256xf32>
    tpu.vector_store %arg5[%c0_10, %c0_11, %c0_12], %18 {strides = array<i32>} : memref<1x256x256xf32, #tpu.memory_space<vmem>>, vector<1x256x256xf32>,
    return
  }
  func.func @transform_0(%arg0: i32, %arg1: i32) -> (i32, i32, i32) {
    %c0_i32 = arith.constant 0 : i32
    %c0_i32_0 = arith.constant 0 : i32
    return %arg0, %arg1, %c0_i32 : i32, i32, i32
  }
  func.func @transform_1(%arg0: i32, %arg1: i32) -> (i32, i32, i32) {
    %c0_i32 = arith.constant 0 : i32
    %c0_i32_0 = arith.constant 0 : i32
    %c0_i32_1 = arith.constant 0 : i32
    return %arg0, %c0_i32, %c0_i32_0 : i32, i32, i32
  }
  func.func @transform_2(%arg0: i32, %arg1: i32) -> (i32, i32, i32) {
    %c0_i32 = arith.constant 0 : i32
    %c0_i32_0 = arith.constant 0 : i32
    %c0_i32_1 = arith.constant 0 : i32
    return %arg0, %c0_i32, %c0_i32_0 : i32, i32, i32
  }
  func.func @transform_3(%arg0: i32, %arg1: i32) -> (i32, i32, i32) {
    %c0_i32 = arith.constant 0 : i32
    %c0_i32_0 = arith.constant 0 : i32
    return %arg0, %arg1, %c0_i32 : i32, i32, i32
  }
}

module attributes {stable_mosaic.version = 11 : i64} {
  func.func @_edge_conv_kernel(%arg0: i32, %arg1: i32, %arg2: memref<1x128x4xf32, #tpu.memory_space<vmem>>, %arg3: memref<1x9x128x4xf32, #tpu.memory_space<vmem>>, %arg4: memref<4x128xf32, #tpu.memory_space<vmem>>, %arg5: memref<4x128xf32, #tpu.memory_space<vmem>>, %arg6: memref<1x128xf32, #tpu.memory_space<vmem>>, %arg7: memref<1x128x128xf32, #tpu.memory_space<vmem>>) attributes {dimension_semantics = [#tpu.dimension_semantics<parallel>, #tpu.dimension_semantics<parallel>], iteration_bounds = array<i64: 2, 2>, scalar_prefetch = 0 : i64, scratch_operands = 0 : i64, tpu.core_type = #tpu.core_type<tc>, window_params = [{transform_indices = @transform_0, window_bounds = array<i64: 1, 128, 4>}, {transform_indices = @transform_1, window_bounds = array<i64: 1, 9, 128, 4>}, {pipeline_mode = #tpu.pipeline_mode<synchronous>, transform_indices = @transform_2, window_bounds = array<i64: 4, 128>}, {pipeline_mode = #tpu.pipeline_mode<synchronous>, transform_indices = @transform_3, window_bounds = array<i64: 4, 128>}, {pipeline_mode = #tpu.pipeline_mode<synchronous>, transform_indices = @transform_4, window_bounds = array<i64: 1, 128>}, {transform_indices = @transform_5, window_bounds = array<i64: 1, 128, 128>}]} {
    %c0 = arith.constant 0 : index
    %c0_0 = arith.constant 0 : index
    %c0_1 = arith.constant 0 : index
    %0 = vector.load %arg2[%c0, %c0_0, %c0_1] : memref<1x128x4xf32, #tpu.memory_space<vmem>>, vector<1x128x4xf32>
    %1 = vector.shape_cast %0 : vector<1x128x4xf32> to vector<128x4xf32>
    %c0_2 = arith.constant 0 : index
    %c0_3 = arith.constant 0 : index
    %2 = vector.load %arg4[%c0_2, %c0_3] : memref<4x128xf32, #tpu.memory_space<vmem>>, vector<4x128xf32>
    %cst = arith.constant dense<0.000000e+00> : vector<128x128xf32>
    %3 = tpu.matmul %1, %2, %cst {dimension_numbers = #tpu.dot_dimension_numbers<[1], [0], [0], [1], [0, 0, 1, 1], [], []>} : vector<128x4xf32>, vector<4x128xf32>, vector<128x128xf32> -> vector<128x128xf32>
    %c0_4 = arith.constant 0 : index
    %c0_5 = arith.constant 0 : index
    %4 = vector.load %arg6[%c0_4, %c0_5] : memref<1x128xf32, #tpu.memory_space<vmem>>, vector<1x128xf32>
    %5 = vector.broadcast %4 : vector<1x128xf32> to vector<128x128xf32>
    %6 = arith.addf %3, %5 : vector<128x128xf32>
    %c0_6 = arith.constant 0 : index
    %c0_7 = arith.constant 0 : index
    %7 = vector.load %arg5[%c0_6, %c0_7] : memref<4x128xf32, #tpu.memory_space<vmem>>, vector<4x128xf32>
    %c0_8 = arith.constant 0 : index
    %c0_9 = arith.constant 0 : index
    %c0_10 = arith.constant 0 : index
    %c0_11 = arith.constant 0 : index
    %8 = vector.load %arg3[%c0_8, %c0_9, %c0_10, %c0_11] : memref<1x9x128x4xf32, #tpu.memory_space<vmem>>, vector<1x1x128x4xf32>
    %9 = vector.shape_cast %8 : vector<1x1x128x4xf32> to vector<128x4xf32>
    %cst_12 = arith.constant dense<0.000000e+00> : vector<128x128xf32>
    %10 = tpu.matmul %9, %7, %cst_12 {dimension_numbers = #tpu.dot_dimension_numbers<[1], [0], [0], [1], [0, 0, 1, 1], [], []>} : vector<128x4xf32>, vector<4x128xf32>, vector<128x128xf32> -> vector<128x128xf32>
    %11 = arith.addf %6, %10 : vector<128x128xf32>
    %cst_13 = arith.constant 0.000000e+00 : f32
    %12 = vector.broadcast %cst_13 : f32 to vector<128x128xf32>
    %13 = arith.maximumf %11, %12 : vector<128x128xf32>
    %c0_14 = arith.constant 0 : index
    %c1 = arith.constant 1 : index
    %c0_15 = arith.constant 0 : index
    %c0_16 = arith.constant 0 : index
    %14 = vector.load %arg3[%c0_14, %c1, %c0_15, %c0_16] : memref<1x9x128x4xf32, #tpu.memory_space<vmem>>, vector<1x1x128x4xf32>
    %15 = vector.shape_cast %14 : vector<1x1x128x4xf32> to vector<128x4xf32>
    %cst_17 = arith.constant dense<0.000000e+00> : vector<128x128xf32>
    %16 = tpu.matmul %15, %7, %cst_17 {dimension_numbers = #tpu.dot_dimension_numbers<[1], [0], [0], [1], [0, 0, 1, 1], [], []>} : vector<128x4xf32>, vector<4x128xf32>, vector<128x128xf32> -> vector<128x128xf32>
    %17 = arith.addf %6, %16 : vector<128x128xf32>
    %cst_18 = arith.constant 0.000000e+00 : f32
    %18 = vector.broadcast %cst_18 : f32 to vector<128x128xf32>
    %19 = arith.maximumf %17, %18 : vector<128x128xf32>
    %20 = arith.maximumf %13, %19 : vector<128x128xf32>
    %c0_19 = arith.constant 0 : index
    %c2 = arith.constant 2 : index
    %c0_20 = arith.constant 0 : index
    %c0_21 = arith.constant 0 : index
    %21 = vector.load %arg3[%c0_19, %c2, %c0_20, %c0_21] : memref<1x9x128x4xf32, #tpu.memory_space<vmem>>, vector<1x1x128x4xf32>
    %22 = vector.shape_cast %21 : vector<1x1x128x4xf32> to vector<128x4xf32>
    %cst_22 = arith.constant dense<0.000000e+00> : vector<128x128xf32>
    %23 = tpu.matmul %22, %7, %cst_22 {dimension_numbers = #tpu.dot_dimension_numbers<[1], [0], [0], [1], [0, 0, 1, 1], [], []>} : vector<128x4xf32>, vector<4x128xf32>, vector<128x128xf32> -> vector<128x128xf32>
    %24 = arith.addf %6, %23 : vector<128x128xf32>
    %cst_23 = arith.constant 0.000000e+00 : f32
    %25 = vector.broadcast %cst_23 : f32 to vector<128x128xf32>
    %26 = arith.maximumf %24, %25 : vector<128x128xf32>
    %27 = arith.maximumf %20, %26 : vector<128x128xf32>
    %c0_24 = arith.constant 0 : index
    %c3 = arith.constant 3 : index
    %c0_25 = arith.constant 0 : index
    %c0_26 = arith.constant 0 : index
    %28 = vector.load %arg3[%c0_24, %c3, %c0_25, %c0_26] : memref<1x9x128x4xf32, #tpu.memory_space<vmem>>, vector<1x1x128x4xf32>
    %29 = vector.shape_cast %28 : vector<1x1x128x4xf32> to vector<128x4xf32>
    %cst_27 = arith.constant dense<0.000000e+00> : vector<128x128xf32>
    %30 = tpu.matmul %29, %7, %cst_27 {dimension_numbers = #tpu.dot_dimension_numbers<[1], [0], [0], [1], [0, 0, 1, 1], [], []>} : vector<128x4xf32>, vector<4x128xf32>, vector<128x128xf32> -> vector<128x128xf32>
    %31 = arith.addf %6, %30 : vector<128x128xf32>
    %cst_28 = arith.constant 0.000000e+00 : f32
    %32 = vector.broadcast %cst_28 : f32 to vector<128x128xf32>
    %33 = arith.maximumf %31, %32 : vector<128x128xf32>
    %34 = arith.maximumf %27, %33 : vector<128x128xf32>
    %c0_29 = arith.constant 0 : index
    %c4 = arith.constant 4 : index
    %c0_30 = arith.constant 0 : index
    %c0_31 = arith.constant 0 : index
    %35 = vector.load %arg3[%c0_29, %c4, %c0_30, %c0_31] : memref<1x9x128x4xf32, #tpu.memory_space<vmem>>, vector<1x1x128x4xf32>
    %36 = vector.shape_cast %35 : vector<1x1x128x4xf32> to vector<128x4xf32>
    %cst_32 = arith.constant dense<0.000000e+00> : vector<128x128xf32>
    %37 = tpu.matmul %36, %7, %cst_32 {dimension_numbers = #tpu.dot_dimension_numbers<[1], [0], [0], [1], [0, 0, 1, 1], [], []>} : vector<128x4xf32>, vector<4x128xf32>, vector<128x128xf32> -> vector<128x128xf32>
    %38 = arith.addf %6, %37 : vector<128x128xf32>
    %cst_33 = arith.constant 0.000000e+00 : f32
    %39 = vector.broadcast %cst_33 : f32 to vector<128x128xf32>
    %40 = arith.maximumf %38, %39 : vector<128x128xf32>
    %41 = arith.maximumf %34, %40 : vector<128x128xf32>
    %c0_34 = arith.constant 0 : index
    %c5 = arith.constant 5 : index
    %c0_35 = arith.constant 0 : index
    %c0_36 = arith.constant 0 : index
    %42 = vector.load %arg3[%c0_34, %c5, %c0_35, %c0_36] : memref<1x9x128x4xf32, #tpu.memory_space<vmem>>, vector<1x1x128x4xf32>
    %43 = vector.shape_cast %42 : vector<1x1x128x4xf32> to vector<128x4xf32>
    %cst_37 = arith.constant dense<0.000000e+00> : vector<128x128xf32>
    %44 = tpu.matmul %43, %7, %cst_37 {dimension_numbers = #tpu.dot_dimension_numbers<[1], [0], [0], [1], [0, 0, 1, 1], [], []>} : vector<128x4xf32>, vector<4x128xf32>, vector<128x128xf32> -> vector<128x128xf32>
    %45 = arith.addf %6, %44 : vector<128x128xf32>
    %cst_38 = arith.constant 0.000000e+00 : f32
    %46 = vector.broadcast %cst_38 : f32 to vector<128x128xf32>
    %47 = arith.maximumf %45, %46 : vector<128x128xf32>
    %48 = arith.maximumf %41, %47 : vector<128x128xf32>
    %c0_39 = arith.constant 0 : index
    %c6 = arith.constant 6 : index
    %c0_40 = arith.constant 0 : index
    %c0_41 = arith.constant 0 : index
    %49 = vector.load %arg3[%c0_39, %c6, %c0_40, %c0_41] : memref<1x9x128x4xf32, #tpu.memory_space<vmem>>, vector<1x1x128x4xf32>
    %50 = vector.shape_cast %49 : vector<1x1x128x4xf32> to vector<128x4xf32>
    %cst_42 = arith.constant dense<0.000000e+00> : vector<128x128xf32>
    %51 = tpu.matmul %50, %7, %cst_42 {dimension_numbers = #tpu.dot_dimension_numbers<[1], [0], [0], [1], [0, 0, 1, 1], [], []>} : vector<128x4xf32>, vector<4x128xf32>, vector<128x128xf32> -> vector<128x128xf32>
    %52 = arith.addf %6, %51 : vector<128x128xf32>
    %cst_43 = arith.constant 0.000000e+00 : f32
    %53 = vector.broadcast %cst_43 : f32 to vector<128x128xf32>
    %54 = arith.maximumf %52, %53 : vector<128x128xf32>
    %55 = arith.maximumf %48, %54 : vector<128x128xf32>
    %c0_44 = arith.constant 0 : index
    %c7 = arith.constant 7 : index
    %c0_45 = arith.constant 0 : index
    %c0_46 = arith.constant 0 : index
    %56 = vector.load %arg3[%c0_44, %c7, %c0_45, %c0_46] : memref<1x9x128x4xf32, #tpu.memory_space<vmem>>, vector<1x1x128x4xf32>
    %57 = vector.shape_cast %56 : vector<1x1x128x4xf32> to vector<128x4xf32>
    %cst_47 = arith.constant dense<0.000000e+00> : vector<128x128xf32>
    %58 = tpu.matmul %57, %7, %cst_47 {dimension_numbers = #tpu.dot_dimension_numbers<[1], [0], [0], [1], [0, 0, 1, 1], [], []>} : vector<128x4xf32>, vector<4x128xf32>, vector<128x128xf32> -> vector<128x128xf32>
    %59 = arith.addf %6, %58 : vector<128x128xf32>
    %cst_48 = arith.constant 0.000000e+00 : f32
    %60 = vector.broadcast %cst_48 : f32 to vector<128x128xf32>
    %61 = arith.maximumf %59, %60 : vector<128x128xf32>
    %62 = arith.maximumf %55, %61 : vector<128x128xf32>
    %c0_49 = arith.constant 0 : index
    %c8 = arith.constant 8 : index
    %c0_50 = arith.constant 0 : index
    %c0_51 = arith.constant 0 : index
    %63 = vector.load %arg3[%c0_49, %c8, %c0_50, %c0_51] : memref<1x9x128x4xf32, #tpu.memory_space<vmem>>, vector<1x1x128x4xf32>
    %64 = vector.shape_cast %63 : vector<1x1x128x4xf32> to vector<128x4xf32>
    %cst_52 = arith.constant dense<0.000000e+00> : vector<128x128xf32>
    %65 = tpu.matmul %64, %7, %cst_52 {dimension_numbers = #tpu.dot_dimension_numbers<[1], [0], [0], [1], [0, 0, 1, 1], [], []>} : vector<128x4xf32>, vector<4x128xf32>, vector<128x128xf32> -> vector<128x128xf32>
    %66 = arith.addf %6, %65 : vector<128x128xf32>
    %cst_53 = arith.constant 0.000000e+00 : f32
    %67 = vector.broadcast %cst_53 : f32 to vector<128x128xf32>
    %68 = arith.maximumf %66, %67 : vector<128x128xf32>
    %69 = arith.maximumf %62, %68 : vector<128x128xf32>
    %c0_54 = arith.constant 0 : index
    %c0_55 = arith.constant 0 : index
    %c0_56 = arith.constant 0 : index
    %70 = vector.load %arg7[%c0_54, %c0_55, %c0_56] : memref<1x128x128xf32, #tpu.memory_space<vmem>>, vector<1x128x128xf32>
    %71 = vector.shape_cast %70 : vector<1x128x128xf32> to vector<128x128xf32>
    %72 = vector.shape_cast %69 : vector<128x128xf32> to vector<1x128x128xf32>
    tpu.vector_store %arg7[%c0_54, %c0_55, %c0_56], %72 {strides = array<i32>} : memref<1x128x128xf32, #tpu.memory_space<vmem>>, vector<1x128x128xf32>,
    return
  }
  func.func @transform_0(%arg0: i32, %arg1: i32) -> (i32, i32, i32) {
    %c0_i32 = arith.constant 0 : i32
    %c0_i32_0 = arith.constant 0 : i32
    return %arg0, %arg1, %c0_i32 : i32, i32, i32
  }
  func.func @transform_1(%arg0: i32, %arg1: i32) -> (i32, i32, i32, i32) {
    %c0_i32 = arith.constant 0 : i32
    %c0_i32_0 = arith.constant 0 : i32
    %c0_i32_1 = arith.constant 0 : i32
    return %arg0, %c0_i32, %arg1, %c0_i32_0 : i32, i32, i32, i32
  }
  func.func @transform_2(%arg0: i32, %arg1: i32) -> (i32, i32) {
    %c0_i32 = arith.constant 0 : i32
    %c0_i32_0 = arith.constant 0 : i32
    %c0_i32_1 = arith.constant 0 : i32
    return %c0_i32, %c0_i32_0 : i32, i32
  }
  func.func @transform_3(%arg0: i32, %arg1: i32) -> (i32, i32) {
    %c0_i32 = arith.constant 0 : i32
    %c0_i32_0 = arith.constant 0 : i32
    %c0_i32_1 = arith.constant 0 : i32
    return %c0_i32, %c0_i32_0 : i32, i32
  }
  func.func @transform_4(%arg0: i32, %arg1: i32) -> (i32, i32) {
    %c0_i32 = arith.constant 0 : i32
    %c0_i32_0 = arith.constant 0 : i32
    %c0_i32_1 = arith.constant 0 : i32
    return %c0_i32, %c0_i32_0 : i32, i32
  }
  func.func @transform_5(%arg0: i32, %arg1: i32) -> (i32, i32, i32) {
    %c0_i32 = arith.constant 0 : i32
    %c0_i32_0 = arith.constant 0 : i32
    return %arg0, %arg1, %c0_i32 : i32, i32, i32
  }
}

</mosaic_0001>

<bundles_post_ra>
// kernel: dy_graph_conv2d.2
= control target key start
LH: loop header
LB: loop body
LE: loop exit
PB: predicated region body
PF: predicated region fallthrough
CT: control target
= control target key end

     0   :  { %s1585_s12 = smov 0   ;;  %s1587_s13 = smov 0   ;;  %s2249_s0 = inlined_call_operand.vmem [shape: f32[2,256,4], index: 0, kind: input, shape index: {}, may-alias: {0,1}]   ;;  %s2250_s1 = inlined_call_operand.vmem [shape: f32[2,256,4], index: 1, kind: input, shape index: {}, may-alias: {0,1}]   ;;  %s2251_s2 = inlined_call_operand.vmem [shape: f32[2,1,256], index: 2, kind: input, shape index: {}]   ;;  %s2252_s3 = inlined_call_operand.vmem [shape: f32[2,256,256], index: 3, kind: output, shape index: {}]  }
   0x1   :  { %s1589_s14 = smov 0  }
   0x2 LB: > { %s25_s15 = sadd.s32 1, %s1559_s13  ;;  %p1280_p0 = scmp.ge.s32.totalorder %s1563_s14, 1  ;;  %s1563_s14 = sphi %s1589_s14, %s13_s14   ;;  %s1559_s13 = sphi %s1587_s13, %s2256_s13   ;;  %s1555_s12 = sphi %s1585_s12, %s2255_s12  }
   0x3   : > { %p27_p1 = scmp.ge.s32.totalorder %s25_s15, 2  ;;  %p177_p2 = scmp.lt.s32.totalorder %s1563_s14, 3 }
   0x5   : > { %s2258_s15 = smov (%p27_p1, %s25_s15), 0  ;;  %p178_p3 = pnand %p1280_p0, %p177_p2 }
   0x6   : > { %p220_p4 = scmp.lt.s32.totalorder (!%p178_p3), %s1555_s12, 1  ;;  %vm313_vm0 = vcmask (!%p178_p3), 31744  }
   0x7   : > { %181 = sbr.rel (%p178_p3) target bundleno = 364 (0x16c), region = 32  ;;  %vm1613_vm1 = vmpackc.low (!%p178_p3), %vm313_vm0, %vm313_vm0 }
   0xe   : > { %s2260_s12 = smov (!%p220_p4, %s1555_s12), 1 }
   0xf   : > { %s1354_s16 = sshll.u32 %s2260_s12, 8  ;;  %s1285_s23 = sshll.u32 %s2260_s12, 1 }
  0x10   : > { %s1609_s19 = scalar_lea.vmem %s2250_s1, %s1354_s16  ;;  %s1642_s22 = scalar_lea.vmem %s2249_s0, %s1354_s16 }
  0x11   : > { %v297_v1 = vld [vmem:[%s1609_s19 + $0x80] sm:$0xff]  ;;  %v298_v2 = vld [vmem:[%s1609_s19 + $0x88] sm:$0xff]  ;;  %v299_v6 = vld [vmem:[%s1609_s19 + $0x90] sm:$0xff]  ;;  %s237_s26 = scalar_lea.vmem %s2251_s2, %s1285_s23  ;;  %s1356_s27 = sshll.u32 %s2260_s12, 9 }
  0x12   : > { %v281_v3 = vld [vmem:[%s1609_s19] sm:$0xff]  ;;  %v1453_v4 = vpack.c.bf16 %v298_v2, %v297_v1  ;;  %v282_v5 = vld [vmem:[%s1609_s19 + $0x8] sm:$0xff]  ;;  %v300_v7 = vld [vmem:[%s1609_s19 + $0x98] sm:$0xff]  ;;  %s2080_s30 = scalar_lea.vmem %s2252_s3, %s1356_s27 }
  0x13   : > { %v1456_v8 = vpack.c.bf16 %v282_v5, %v281_v3  ;;  %v1459_v9 = vpack.c.bf16 %v300_v7, %v299_v6  ;;  %v283_v10 = vld [vmem:[%s1609_s19 + $0x10] sm:$0xff]  ;;  %v284_v11 = vld [vmem:[%s1609_s19 + $0x18] sm:$0xff]  ;;  %v301_v12 = vld [vmem:[%s1609_s19 + $0xa0] sm:$0xff] }
  0x14   : > { %1455 = vmatprep.subr.msk.bf16.mxu0 %vm1613_vm1, %v1453_v4  ;;  %1501 = vmatprep.subr.msk.bf16.mxu1 %vm1613_vm1, %v1453_v4  ;;  %v302_v13 = vld [vmem:[%s1609_s19 + $0xa8] sm:$0xff]  ;;  %v1462_v14 = vpack.c.bf16 %v284_v11, %v283_v10  ;;  %v1645_v16 = vld [vmem:[%s1642_s22] sm:$0xff]  ;;  %v1662_v20 = vld [vmem:[%s1642_s22 + $0x10] sm:$0xff] }
  0x15   : > { %1458 = vmatpush3.bf16.xpose.msk.msra.mxu0 %vm1613_vm1, %v1456_v8  ;;  %1509 = vmatpush3.bf16.xpose.msk.msra.mxu1 %vm1613_vm1, %v1456_v8  ;;  %v1465_v15 = vpack.c.bf16 %v302_v13, %v301_v12  ;;  %v1650_v17 = vld [vmem:[%s1642_s22 + $0x80] sm:$0xff]  ;;  %v1653_v18 = vld [vmem:[%s1642_s22 + $0x8] sm:$0xff]  ;;  %v763_v19 = vmul.f32 %v1645_v16, %v1645_v16  ;;  %v303_v24 = vld [vmem:[%s1609_s19 + $0xb0] sm:$0xff]  ;;  %v765_v26 = vmul.f32 %v1662_v20, %v1662_v20 }
  0x16   : > { %1461 = vmatprep.subr.msk.bf16.mxu0 %vm1613_vm1, %v1459_v9  ;;  %1502 = vmatprep.subr.msk.bf16.mxu1 %vm1613_vm1, %v1459_v9  ;;  %v764_v21 = vmul.f32 %v1653_v18, %v1653_v18  ;;  %v285_v22 = vld [vmem:[%s1609_s19 + $0x20] sm:$0xff]  ;;  %v286_v23 = vld [vmem:[%s1609_s19 + $0x28] sm:$0xff]  ;;  %v304_v27 = vld [vmem:[%s1609_s19 + $0xb8] sm:$0xff] }
  0x17   : > { %1389 = vmatprep.mubr.msk.f32.mxu0 %vm313_vm0, %v1645_v16  ;;  %v795_v25 = vsel %vm313_vm0, %v763_v19, 0.0  ;;  %1421 = vmatprep.mubr.msk.f32.mxu1 %vm313_vm0, %v1650_v17  ;;  %v1680_v28 = vld [vmem:[%s1642_s22 + $0x18] sm:$0xff]  ;;  %v1683_v29 = vld [vmem:[%s1642_s22 + $0x20] sm:$0xff]  ;;  %v801_v30 = vsel %vm313_vm0, %v765_v26, 0.0  ;;  %v1468_v34 = vpack.c.bf16 %v286_v23, %v285_v22  ;;  %v1471_v35 = vpack.c.bf16 %v304_v27, %v303_v24  ;;  %v1692_v36 = vld [vmem:[%s1642_s22 + $0x28] sm:$0xff] }
  0x18   : > { %796 = vadd.xlane.f32.xlu0 %v795_v25  ;;  %v798_v31 = vsel %vm313_vm0, %v764_v21, 0.0  ;;  %v766_v32 = vmul.f32 %v1680_v28, %v1680_v28  ;;  %v767_v33 = vmul.f32 %v1683_v29, %v1683_v29  ;;  %802 = vadd.xlane.f32.xlu1 %v801_v30  ;;  %v1695_v37 = vld [vmem:[%s1642_s22 + $0x30] sm:$0xff]  ;;  %v768_v40 = vmul.f32 %v1692_v36, %v1692_v36  ;;  %v288_v43 = vld [vmem:[%s1609_s19 + $0x38] sm:$0xff]  ;;  %v305_v44 = vld [vmem:[%s1609_s19 + $0xc0] sm:$0xff] }
  0x19   : > { %v769_v41 = vmul.f32 %v1695_v37, %v1695_v37  ;;  %v287_v42 = vld [vmem:[%s1609_s19 + $0x30] sm:$0xff]  ;;  %v306_v45 = vld [vmem:[%s1609_s19 + $0xc8] sm:$0xff]  ;;  %v1716_v46 = vld [vmem:[%s1642_s22 + $0x38] sm:$0xff]  ;;  %v779_v27 = vmul.f32 %v1650_v17, %v1650_v17 }
  0x1a   : > { %v804_v38 = vsel %vm313_vm0, %v766_v32, 0.0  ;;  %v807_v39 = vsel %vm313_vm0, %v767_v33, 0.0  ;;  %v1719_v47 = vld [vmem:[%s1642_s22 + $0x40] sm:$0xff]  ;;  %v810_v48 = vsel %vm313_vm0, %v768_v40, 0.0  ;;  %v770_v50 = vmul.f32 %v1716_v46, %v1716_v46  ;;  %v1728_v54 = vld [vmem:[%s1642_s22 + $0x48] sm:$0xff]  ;;  %v1731_v55 = vld [vmem:[%s1642_s22 + $0x50] sm:$0xff] }
  0x1b   : > { %v813_v49 = vsel %vm313_vm0, %v769_v41, 0.0  ;;  %v771_v51 = vmul.f32 %v1719_v47, %v1719_v47  ;;  %v1474_v52 = vpack.c.bf16 %v288_v43, %v287_v42  ;;  %v1477_v53 = vpack.c.bf16 %v306_v45, %v305_v44  ;;  %v289_v60 = vld [vmem:[%s1609_s19 + $0x40] sm:$0xff]  ;;  %v290_v61 = vld [vmem:[%s1609_s19 + $0x48] sm:$0xff]  ;;  %v307_v62 = vld [vmem:[%s1609_s19 + $0xd0] sm:$0xff] }
  0x1c   : > { %799 = vadd.xlane.f32.xlu0 %v798_v31  ;;  %805 = vadd.xlane.f32.xlu1 %v804_v38  ;;  %v816_v56 = vsel %vm313_vm0, %v770_v50, 0.0  ;;  %v772_v58 = vmul.f32 %v1728_v54, %v1728_v54  ;;  %v773_v59 = vmul.f32 %v1731_v55, %v1731_v55  ;;  %v308_v63 = vld [vmem:[%s1609_s19 + $0xd8] sm:$0xff]  ;;  %v1755_v2 = vld [vmem:[%s1642_s22 + $0x60] sm:$0xff]  ;;  %v1480_v7 = vpack.c.bf16 %v290_v61, %v289_v60  ;;  %v1764_v9 = vld [vmem:[%s1642_s22 + $0x68] sm:$0xff] }
  0x1d   : > { %1464 = vmatpush3.bf16.xpose.msk.msra.mxu0 %vm1613_vm1, %v1462_v14  ;;  %1510 = vmatpush3.bf16.xpose.msk.msra.mxu1 %vm1613_vm1, %v1462_v14  ;;  %v819_v57 = vsel %vm313_vm0, %v771_v51, 0.0  ;;  %v1752_v1 = vld [vmem:[%s1642_s22 + $0x58] sm:$0xff]  ;;  %v775_v6 = vmul.f32 %v1755_v2, %v1755_v2  ;;  %v1483_v8 = vpack.c.bf16 %v308_v63, %v307_v62  ;;  %v1767_v10 = vld [vmem:[%s1642_s22 + $0x70] sm:$0xff]  ;;  %v776_v13 = vmul.f32 %v1764_v9, %v1764_v9  ;;  %v309_v21 = vld [vmem:[%s1609_s19 + $0xe0] sm:$0xff] }
  0x1e   : > { %1467 = vmatprep.subr.msk.bf16.mxu0 %vm1613_vm1, %v1465_v15  ;;  %1503 = vmatprep.subr.msk.bf16.mxu1 %vm1613_vm1, %v1465_v15  ;;  %v822_v3 = vsel %vm313_vm0, %v772_v58, 0.0  ;;  %v825_v4 = vsel %vm313_vm0, %v773_v59, 0.0  ;;  %v774_v5 = vmul.f32 %v1752_v1, %v1752_v1  ;;  %v777_v14 = vmul.f32 %v1767_v10, %v1767_v10  ;;  %v291_v15 = vld [vmem:[%s1609_s19 + $0x50] sm:$0xff]  ;;  %v292_v19 = vld [vmem:[%s1609_s19 + $0x58] sm:$0xff]  ;;  %v310_v22 = vld [vmem:[%s1609_s19 + $0xe8] sm:$0xff] }
  0x1f   : > { %v831_v12 = vsel %vm313_vm0, %v775_v6, 0.0  ;;  %v1788_v23 = vld [vmem:[%s1642_s22 + $0x78] sm:$0xff]  ;;  %v834_v24 = vsel %vm313_vm0, %v776_v13, 0.0  ;;  %v1486_v30 = vpack.c.bf16 %v292_v19, %v291_v15  ;;  %v1489_v31 = vpack.c.bf16 %v310_v22, %v309_v21  ;;  %v1797_v32 = vld [vmem:[%s1642_s22 + $0x88] sm:$0xff]  ;;  %v1800_v33 = vld [vmem:[%s1642_s22 + $0x90] sm:$0xff] }
  0x20   : > { %808 = vadd.xlane.f32.xlu0 %v807_v39  ;;  %811 = vadd.xlane.f32.xlu1 %v810_v48  ;;  %v828_v11 = vsel %vm313_vm0, %v774_v5, 0.0  ;;  %v837_v25 = vsel %vm313_vm0, %v777_v14, 0.0  ;;  %v778_v26 = vmul.f32 %v1788_v23, %v1788_v23  ;;  %v780_v38 = vmul.f32 %v1797_v32, %v1797_v32  ;;  %v293_v40 = vld [vmem:[%s1609_s19 + $0x60] sm:$0xff]  ;;  %v294_v41 = vld [vmem:[%s1609_s19 + $0x68] sm:$0xff]  ;;  %v311_v42 = vld [vmem:[%s1609_s19 + $0xf0] sm:$0xff] }
  0x21   : > { %v781_v39 = vmul.f32 %v1800_v33, %v1800_v33  ;;  %v312_v43 = vld [vmem:[%s1609_s19 + $0xf8] sm:$0xff]  ;;  %v1824_v45 = vld [vmem:[%s1642_s22 + $0xa0] sm:$0xff]  ;;  %v295_v62 = vld [vmem:[%s1609_s19 + $0x70] sm:$0xff] }
  0x22   : > { %v1821_v44 = vld [vmem:[%s1642_s22 + $0x98] sm:$0xff]  ;;  %v846_v48 = vsel %vm313_vm0, %v780_v38, 0.0  ;;  %v783_v51 = vmul.f32 %v1824_v45, %v1824_v45  ;;  %v1870_v13 = vld [vmem:[%s1642_s22 + $0xd0] sm:$0xff] }
  0x23   : > { %v782_v50 = vmul.f32 %v1821_v44, %v1821_v44  ;;  %v296_v63 = vld [vmem:[%s1609_s19 + $0x78] sm:$0xff]  ;;  %v789_v21 = vmul.f32 %v1870_v13, %v1870_v13  ;;  %v1898_v0 = vld [vmem:[%s1642_s22 + $0xf0] sm:$0xff] }
  0x24   : > { %814 = vadd.xlane.f32.xlu0 %v813_v49  ;;  %817 = vadd.xlane.f32.xlu1 %v816_v56  ;;  %v849_v49 = vsel %vm313_vm0, %v781_v39, 0.0  ;;  %v1833_v56 = vld [vmem:[%s1642_s22 + $0xa8] sm:$0xff]  ;;  %v855_v59 = vsel %vm313_vm0, %v783_v51, 0.0  ;;  %v1883_v22 = vld [vmem:[%s1642_s22 + $0xd8] sm:$0xff]  ;;  %v793_v39 = vmul.f32 %v1898_v0, %v1898_v0 }
  0x25   : > { %1470 = vmatpush3.bf16.xpose.msk.msra.mxu0 %vm1613_vm1, %v1468_v34  ;;  %1511 = vmatpush3.bf16.xpose.msk.msra.mxu1 %vm1613_vm1, %v1468_v34  ;;  %v840_v34 = vsel %vm313_vm0, %v778_v26, 0.0  ;;  %v852_v58 = vsel %vm313_vm0, %v782_v50, 0.0  ;;  %v784_v60 = vmul.f32 %v1833_v56, %v1833_v56  ;;  %v873_v26 = vsel %vm313_vm0, %v789_v21, 0.0 }
  0x26   : > { %1473 = vmatprep.subr.msk.bf16.mxu0 %vm1613_vm1, %v1471_v35  ;;  %1504 = vmatprep.subr.msk.bf16.mxu1 %vm1613_vm1, %v1471_v35  ;;  %v843_v35 = vsel %vm313_vm0, %v779_v27, 0.0  ;;  %v790_v27 = vmul.f32 %v1883_v22, %v1883_v22 }
  0x27   : > { %v858_v5 = vsel %vm313_vm0, %v784_v60, 0.0 }
  0x28   : > { %820 = vadd.xlane.f32.xlu0 %v819_v57  ;;  %823 = vadd.xlane.f32.xlu1 %v822_v3  ;;  %v1836_v57 = vld [vmem:[%s1642_s22 + $0xb0] sm:$0xff]  ;;  %v1855_v3 = vld [vmem:[%s1642_s22 + $0xb8] sm:$0xff] }
  0x29   : > { %v785_v61 = vmul.f32 %v1836_v57, %v1836_v57 }
  0x2b   : > { %v861_v6 = vsel %vm313_vm0, %v785_v61, 0.0 }
  0x2c   : > { %826 = vadd.xlane.f32.xlu0 %v825_v4  ;;  %829 = vadd.xlane.f32.xlu1 %v828_v11  ;;  %v1858_v4 = vld [vmem:[%s1642_s22 + $0xc0] sm:$0xff]  ;;  %v1498_v11 = vpack.c.bf16 %v296_v63, %v295_v62 }
  0x2d   : > { %1476 = vmatpush3.bf16.xpose.msk.msra.mxu0 %vm1613_vm1, %v1474_v52  ;;  %1512 = vmatpush3.bf16.xpose.msk.msra.mxu1 %vm1613_vm1, %v1474_v52  ;;  %v1492_v52 = vpack.c.bf16 %v294_v41, %v293_v40  ;;  %v885_v40 = vsel %vm313_vm0, %v793_v39, 0.0 }
  0x2e   : > { %1479 = vmatprep.subr.msk.bf16.mxu0 %vm1613_vm1, %v1477_v53  ;;  %1505 = vmatprep.subr.msk.bf16.mxu1 %vm1613_vm1, %v1477_v53  ;;  %v1495_v53 = vpack.c.bf16 %v312_v43, %v311_v42 }
  0x30   : > { %832 = vadd.xlane.f32.xlu0 %v831_v12  ;;  %835 = vadd.xlane.f32.xlu1 %v834_v24  ;;  %v1867_v12 = vld [vmem:[%s1642_s22 + $0xc8] sm:$0xff]  ;;  %v1886_v24 = vld [vmem:[%s1642_s22 + $0xe0] sm:$0xff] }
  0x31   : > { %v788_v19 = vmul.f32 %v1867_v12, %v1867_v12 }
  0x34   : > { %838 = vadd.xlane.f32.xlu0 %v837_v25  ;;  %841 = vadd.xlane.f32.xlu1 %v840_v34  ;;  %v870_v25 = vsel %vm313_vm0, %v788_v19, 0.0  ;;  %v876_v34 = vsel %vm313_vm0, %v790_v27, 0.0 }
  0x35   : > { %1482 = vmatpush3.bf16.xpose.msk.msra.mxu0 %vm1613_vm1, %v1480_v7  ;;  %1513 = vmatpush3.bf16.xpose.msk.msra.mxu1 %vm1613_vm1, %v1480_v7  ;;  %v786_v7 = vmul.f32 %v1855_v3, %v1855_v3 }
  0x36   : > { %1485 = vmatprep.subr.msk.bf16.mxu0 %vm1613_vm1, %v1483_v8  ;;  %1506 = vmatprep.subr.msk.bf16.mxu1 %vm1613_vm1, %v1483_v8  ;;  %v787_v8 = vmul.f32 %v1858_v4, %v1858_v4 }
  0x37   : > { %v864_v14 = vsel %vm313_vm0, %v786_v7, 0.0 }
  0x38   : > { %844 = vadd.xlane.f32.xlu0 %v843_v35  ;;  %847 = vadd.xlane.f32.xlu1 %v846_v48  ;;  %v867_v15 = vsel %vm313_vm0, %v787_v8, 0.0 }
  0x3c   : > { %850 = vadd.xlane.f32.xlu0 %v849_v49  ;;  %853 = vadd.xlane.f32.xlu1 %v852_v58 }
  0x3d   : > { %1488 = vmatpush3.bf16.xpose.msk.msra.mxu0 %vm1613_vm1, %v1486_v30  ;;  %1514 = vmatpush3.bf16.xpose.msk.msra.mxu1 %vm1613_vm1, %v1486_v30  ;;  %v791_v30 = vmul.f32 %v1886_v24, %v1886_v24 }
  0x3e   : > { %1491 = vmatprep.subr.msk.bf16.mxu0 %vm1613_vm1, %v1489_v31  ;;  %1507 = vmatprep.subr.msk.bf16.mxu1 %vm1613_vm1, %v1489_v31  ;;  %v1895_v31 = vld [vmem:[%s1642_s22 + $0xe8] sm:$0xff] }
  0x3f   : > { %v879_v35 = vsel %vm313_vm0, %v791_v30, 0.0  ;;  %v792_v38 = vmul.f32 %v1895_v31, %v1895_v31 }
  0x40   : > { %856 = vadd.xlane.f32.xlu0 %v855_v59  ;;  %859 = vadd.xlane.f32.xlu1 %v858_v5 }
  0x44   : > { %862 = vadd.xlane.f32.xlu0 %v861_v6  ;;  %865 = vadd.xlane.f32.xlu1 %v864_v14 }
  0x45   : > { %1494 = vmatpush3.bf16.xpose.msk.msra.mxu0 %vm1613_vm1, %v1492_v52  ;;  %1515 = vmatpush3.bf16.xpose.msk.msra.mxu1 %vm1613_vm1, %v1492_v52 }
  0x46   : > { %1497 = vmatprep.subr.msk.bf16.mxu0 %vm1613_vm1, %v1495_v53  ;;  %1508 = vmatprep.subr.msk.bf16.mxu1 %vm1613_vm1, %v1495_v53 }
  0x48   : > { %868 = vadd.xlane.f32.xlu0 %v867_v15  ;;  %871 = vadd.xlane.f32.xlu1 %v870_v25 }
  0x4c   : > { %874 = vadd.xlane.f32.xlu0 %v873_v26  ;;  %877 = vadd.xlane.f32.xlu1 %v876_v34 }
  0x4d   : > { %1500 = vmatpush3.bf16.xpose.msk.msra.mxu0 %vm1613_vm1, %v1498_v11  ;;  %1516 = vmatpush3.bf16.xpose.msk.msra.mxu1 %vm1613_vm1, %v1498_v11 }
  0x50   : > { %880 = vadd.xlane.f32.xlu0 %v879_v35 }
  0x54   : > { %1390 = vmatmul.mubr.msk.f32.vlgmr.msra.gmra.mrb[0].mxu0 %vm313_vm0, %v1645_v16  ;;  %1422 = vmatmul.mubr.msk.f32.vlgmr.msra.gmra.mrb[0].mxu1 %vm313_vm0, %v1650_v17  ;;  %v1915_v16 = vld [vmem:[%s1642_s22 + $0xf8] sm:$0xff]  ;;  %v882_v17 = vsel %vm313_vm0, %v792_v38, 0.0 }
  0x55   : > { %1391 = vmatprep.mubr.msk.f32.mxu0 %vm313_vm0, %v1653_v18  ;;  %1423 = vmatprep.mubr.msk.f32.mxu1 %vm313_vm0, %v1797_v32  ;;  %v794_v41 = vmul.f32 %v1915_v16, %v1915_v16 }
  0x56   : > { %883 = vadd.xlane.f32.xlu1 %v882_v17  ;;  %886 = vadd.xlane.f32.xlu0 %v885_v40 }
  0x58   : > { %1392 = vmatmul.mubr.msk.f32.gmra.mrb[2].mxu0 %vm313_vm0, %v1653_v18  ;;  %1424 = vmatmul.mubr.msk.f32.gmra.mrb[2].mxu1 %vm313_vm0, %v1797_v32  ;;  %v888_v18 = vsel %vm313_vm0, %v794_v41, 0.0 }
  0x59   : > { %1393 = vmatprep.mubr.msk.f32.mxu0 %vm313_vm0, %v1662_v20  ;;  %1425 = vmatprep.mubr.msk.f32.mxu1 %vm313_vm0, %v1800_v33 }
  0x5a   : > { %889 = vadd.xlane.f32.xlu1 %v888_v18 }
  0x5c   : > { %1394 = vmatmul.mubr.msk.f32.gmra.mrb[4].mxu0 %vm313_vm0, %v1662_v20  ;;  %1426 = vmatmul.mubr.msk.f32.gmra.mrb[4].mxu1 %vm313_vm0, %v1800_v33 }
  0x5d   : > { %1395 = vmatprep.mubr.msk.f32.mxu0 %vm313_vm0, %v1680_v28  ;;  %1427 = vmatprep.mubr.msk.f32.mxu1 %vm313_vm0, %v1821_v44 }
  0x60   : > { %1396 = vmatmul.mubr.msk.f32.gmra.mrb[6].mxu0 %vm313_vm0, %v1680_v28  ;;  %1428 = vmatmul.mubr.msk.f32.gmra.mrb[6].mxu1 %vm313_vm0, %v1821_v44 }
  0x61   : > { %1397 = vmatprep.mubr.msk.f32.mxu0 %vm313_vm0, %v1683_v29  ;;  %1429 = vmatprep.mubr.msk.f32.mxu1 %vm313_vm0, %v1824_v45 }
  0x64   : > { %1398 = vmatmul.mubr.msk.f32.gmra.mrb[8].mxu0 %vm313_vm0, %v1683_v29  ;;  %1430 = vmatmul.mubr.msk.f32.gmra.mrb[8].mxu1 %vm313_vm0, %v1824_v45  ;;  %v1019_v45 = vld [vmem:[%s237_s26] sm:$0x3] }
  0x65   : > { %1399 = vmatprep.mubr.msk.f32.mxu0 %vm313_vm0, %v1692_v36  ;;  %1431 = vmatprep.mubr.msk.f32.mxu1 %vm313_vm0, %v1833_v56 }
  0x68   : > { %1400 = vmatmul.mubr.msk.f32.gmra.mrb[10].mxu0 %vm313_vm0, %v1692_v36  ;;  %1432 = vmatmul.mubr.msk.f32.gmra.mrb[10].mxu1 %vm313_vm0, %v1833_v56 }
  0x69   : > { %1401 = vmatprep.mubr.msk.f32.mxu0 %vm313_vm0, %v1695_v37  ;;  %1433 = vmatprep.mubr.msk.f32.mxu1 %vm313_vm0, %v1836_v57 }
  0x6c   : > { %1402 = vmatmul.mubr.msk.f32.gmra.mrb[12].mxu0 %vm313_vm0, %v1695_v37  ;;  %1434 = vmatmul.mubr.msk.f32.gmra.mrb[12].mxu1 %vm313_vm0, %v1836_v57 }
  0x6d   : > { %1403 = vmatprep.mubr.msk.f32.mxu0 %vm313_vm0, %v1716_v46  ;;  %1435 = vmatprep.mubr.msk.f32.mxu1 %vm313_vm0, %v1855_v3 }
  0x70   : > { %1404 = vmatmul.mubr.msk.f32.gmra.mrb[14].mxu0 %vm313_vm0, %v1716_v46  ;;  %1436 = vmatmul.mubr.msk.f32.gmra.mrb[14].mxu1 %vm313_vm0, %v1855_v3 }
  0x71   : > { %1405 = vmatprep.mubr.msk.f32.mxu0 %vm313_vm0, %v1719_v47  ;;  %1437 = vmatprep.mubr.msk.f32.mxu1 %vm313_vm0, %v1858_v4 }
  0x74   : > { %1406 = vmatmul.mubr.msk.f32.gmra.mrb[16].mxu0 %vm313_vm0, %v1719_v47  ;;  %1438 = vmatmul.mubr.msk.f32.gmra.mrb[16].mxu1 %vm313_vm0, %v1858_v4 }
  0x75   : > { %1407 = vmatprep.mubr.msk.f32.mxu0 %vm313_vm0, %v1728_v54  ;;  %1439 = vmatprep.mubr.msk.f32.mxu1 %vm313_vm0, %v1867_v12 }
  0x78   : > { %1408 = vmatmul.mubr.msk.f32.gmra.mrb[18].mxu0 %vm313_vm0, %v1728_v54  ;;  %1440 = vmatmul.mubr.msk.f32.gmra.mrb[18].mxu1 %vm313_vm0, %v1867_v12 }
  0x79   : > { %1409 = vmatprep.mubr.msk.f32.mxu0 %vm313_vm0, %v1731_v55  ;;  %1441 = vmatprep.mubr.msk.f32.mxu1 %vm313_vm0, %v1870_v13 }
  0x7c   : > { %1442 = vmatmul.mubr.msk.f32.gmra.mrb[20].mxu1 %vm313_vm0, %v1870_v13  ;;  %1410 = vmatmul.mubr.msk.f32.gmra.mrb[20].mxu0 %vm313_vm0, %v1731_v55 }
  0x7d   : > { %1411 = vmatprep.mubr.msk.f32.mxu0 %vm313_vm0, %v1752_v1  ;;  %1443 = vmatprep.mubr.msk.f32.mxu1 %vm313_vm0, %v1883_v22 }
  0x80   : > { %1444 = vmatmul.mubr.msk.f32.gmra.mrb[22].mxu1 %vm313_vm0, %v1883_v22  ;;  %1412 = vmatmul.mubr.msk.f32.gmra.mrb[22].mxu0 %vm313_vm0, %v1752_v1 }
  0x81   : > { %1413 = vmatprep.mubr.msk.f32.mxu0 %vm313_vm0, %v1755_v2  ;;  %1445 = vmatprep.mubr.msk.f32.mxu1 %vm313_vm0, %v1886_v24 }
  0x84   : > { %1446 = vmatmul.mubr.msk.f32.gmra.mrb[24].mxu1 %vm313_vm0, %v1886_v24  ;;  %1414 = vmatmul.mubr.msk.f32.gmra.mrb[24].mxu0 %vm313_vm0, %v1755_v2 }
  0x85   : > { %1415 = vmatprep.mubr.msk.f32.mxu0 %vm313_vm0, %v1764_v9  ;;  %1447 = vmatprep.mubr.msk.f32.mxu1 %vm313_vm0, %v1895_v31 }
  0x88   : > { %1448 = vmatmul.mubr.msk.f32.gmra.mrb[26].mxu1 %vm313_vm0, %v1895_v31  ;;  %1416 = vmatmul.mubr.msk.f32.gmra.mrb[26].mxu0 %vm313_vm0, %v1764_v9 }
  0x89   : > { %1417 = vmatprep.mubr.msk.f32.mxu0 %vm313_vm0, %v1767_v10  ;;  %1449 = vmatprep.mubr.msk.f32.mxu1 %vm313_vm0, %v1898_v0 }
  0x8c   : > { %1450 = vmatmul.mubr.msk.f32.gmra.mrb[28].mxu1 %vm313_vm0, %v1898_v0  ;;  %1418 = vmatmul.mubr.msk.f32.gmra.mrb[28].mxu0 %vm313_vm0, %v1767_v10 }
  0x8d   : > { %1419 = vmatprep.mubr.msk.f32.mxu0 %vm313_vm0, %v1788_v23  ;;  %1451 = vmatprep.mubr.msk.f32.mxu1 %vm313_vm0, %v1915_v16 }
  0x90   : > { %1452 = vmatmul.mubr.msk.f32.gmra.mrb[30].mxu1 %vm313_vm0, %v1915_v16  ;;  %1420 = vmatmul.mubr.msk.f32.gmra.mrb[30].mxu0 %vm313_vm0, %v1788_v23  ;;  %v1021_v23 = vlaneseq }
  0x92   : > { %v1022_v42 = vshrl.u32 %v1021_v23, 7 }
  0x94   : > { %v1023_v43 = vsub.s32 0, %v1022_v42  ;;  %v1027_v48 = vsub.s32 1, %v1022_v42 }
  0x96   : > { %v2073_v53 = vrot.slane %v1019_v45, %v1023_v43  ;;  %v2075_v60 = vrot.slane %v1019_v45, %v1027_v48 }
  0xa5   : > { %v797_v20 = vpop.xlane.xlu0 %796  ;;  %v2038_v28 = vpop.xlane.xlu1 %802 }
  0xa9   : > { %v2040_v29 = vpop.xlane.xlu0 %799  ;;  %v2042_v36 = vpop.xlane.xlu1 %805 }
  0xad   : > { %v2044_v37 = vpop.xlane.xlu0 %808  ;;  %v2046_v46 = vpop.xlane.xlu1 %811 }
  0xb1   : > { %v2048_v47 = vpop.xlane.xlu0 %814  ;;  %v2050_v54 = vpop.xlane.xlu1 %817 }
  0xb5   : > { %v2052_v55 = vpop.xlane.xlu0 %820  ;;  %v2054_v1 = vpop.xlane.xlu1 %823 }
  0xb9   : > { %v2056_v2 = vpop.xlane.xlu0 %826  ;;  %v2058_v9 = vpop.xlane.xlu1 %829 }
  0xbd   : > { %v2060_v10 = vpop.xlane.xlu0 %832  ;;  %v2062_v32 = vpop.xlane.xlu1 %835 }
  0xc1   : > { %v2065_v33 = vpop.xlane.xlu0 %838  ;;  %v2070_v44 = vpop.xlane.xlu1 %841 }
  0xc5   : > { %v845_v49 = vpop.xlane.xlu0 %844  ;;  %v848_v3 = vpop.xlane.xlu1 %847 }
  0xc9   : > { %v851_v27 = vpop.xlane.xlu0 %850  ;;  %v854_v43 = vpop.xlane.xlu1 %853 }
 0x127   : > { %v572_v50 = vpop.f32.mrb[0].mxu0  ;;  %v668_v51 = vpop.f32.mrb[0].mxu1 }
 0x128   : > { %v891_v52 = vmul.f32 2.0, %v572_v50  ;;  %v923_v56 = vmul.f32 2.0, %v668_v51  ;;  %v574_v57 = vpop.f32.mrb[1].mxu0  ;;  %v670_v58 = vpop.f32.mrb[1].mxu1 }
 0x129   : > { %v892_v59 = vmul.f32 2.0, %v574_v57  ;;  %v924_v61 = vmul.f32 2.0, %v670_v58 }
 0x12a   : > { %v955_v62 = vsub.f32 %v891_v52, %v797_v20  ;;  %v987_v63 = vsub.f32 %v923_v56, %v845_v49 }
 0x12b   : > { %v956_v4 = vsub.f32 %v892_v59, %v797_v20  ;;  %v988_v5 = vsub.f32 %v924_v61, %v845_v49  ;;  %v578_v6 = vpop.f32.mrb[2].mxu0  ;;  %v674_v7 = vpop.f32.mrb[2].mxu1 }
 0x12c   : > { %v1031_v8 = vsub.f32 %v955_v62, %v2073_v53  ;;  %v1063_v11 = vsub.f32 %v987_v63, %v2073_v53  ;;  %v893_v12 = vmul.f32 2.0, %v578_v6  ;;  %v925_v13 = vmul.f32 2.0, %v674_v7  ;;  %v580_v14 = vpop.f32.mrb[3].mxu0  ;;  %v676_v15 = vpop.f32.mrb[3].mxu1 }
 0x12d   : > { %v1032_v19 = vsub.f32 %v956_v4, %v2075_v60  ;;  %v1064_v21 = vsub.f32 %v988_v5, %v2075_v60  ;;  %v894_v22 = vmul.f32 2.0, %v580_v14  ;;  %v926_v24 = vmul.f32 2.0, %v676_v15  ;;  %v857_v5 = vpop.xlane.xlu0 %856 }
 0x12e   : > { %1095 = vst [vmem:[%s2080_s30] sm:$0xff] %v1031_v8  ;;  %1127 = vst [vmem:[%s2080_s30 + $0x100] sm:$0xff] %v1063_v11  ;;  %v957_v25 = vsub.f32 %v893_v12, %v2040_v29  ;;  %v989_v26 = vsub.f32 %v925_v13, %v848_v3 }
 0x12f   : > { %1096 = vst [vmem:[%s2080_s30 + $0x8] sm:$0xff] %v1032_v19  ;;  %1128 = vst [vmem:[%s2080_s30 + $0x108] sm:$0xff] %v1064_v21  ;;  %v958_v30 = vsub.f32 %v894_v22, %v2040_v29  ;;  %v990_v31 = vsub.f32 %v926_v24, %v848_v3  ;;  %v584_v0 = vpop.f32.mrb[4].mxu0  ;;  %v680_v34 = vpop.f32.mrb[4].mxu1 }
 0x130   : > { %v1033_v35 = vsub.f32 %v957_v25, %v2073_v53  ;;  %v1065_v38 = vsub.f32 %v989_v26, %v2073_v53  ;;  %v895_v39 = vmul.f32 2.0, %v584_v0  ;;  %v927_v16 = vmul.f32 2.0, %v680_v34  ;;  %v586_v17 = vpop.f32.mrb[5].mxu0  ;;  %v682_v40 = vpop.f32.mrb[5].mxu1 }
 0x131   : > { %v1034_v41 = vsub.f32 %v958_v30, %v2075_v60  ;;  %v1066_v18 = vsub.f32 %v990_v31, %v2075_v60  ;;  %v896_v20 = vmul.f32 2.0, %v586_v17  ;;  %v928_v23 = vmul.f32 2.0, %v682_v40  ;;  %v860_v30 = vpop.xlane.xlu1 %859 }
 0x132   : > { %1097 = vst [vmem:[%s2080_s30 + $0x10] sm:$0xff] %v1033_v35  ;;  %1129 = vst [vmem:[%s2080_s30 + $0x110] sm:$0xff] %v1065_v38  ;;  %v959_v29 = vsub.f32 %v895_v39, %v2038_v28  ;;  %v991_v42 = vsub.f32 %v927_v16, %v851_v27 }
 0x133   : > { %1098 = vst [vmem:[%s2080_s30 + $0x18] sm:$0xff] %v1034_v41  ;;  %1130 = vst [vmem:[%s2080_s30 + $0x118] sm:$0xff] %v1066_v18  ;;  %v960_v45 = vsub.f32 %v896_v20, %v2038_v28  ;;  %v992_v48 = vsub.f32 %v928_v23, %v851_v27  ;;  %v590_v49 = vpop.f32.mrb[6].mxu0  ;;  %v686_v50 = vpop.f32.mrb[6].mxu1 }
 0x134   : > { %v1035_v51 = vsub.f32 %v959_v29, %v2073_v53  ;;  %v1067_v52 = vsub.f32 %v991_v42, %v2073_v53  ;;  %v897_v56 = vmul.f32 2.0, %v590_v49  ;;  %v929_v57 = vmul.f32 2.0, %v686_v50  ;;  %v592_v58 = vpop.f32.mrb[7].mxu0  ;;  %v688_v59 = vpop.f32.mrb[7].mxu1 }
 0x135   : > { %v1036_v61 = vsub.f32 %v960_v45, %v2075_v60  ;;  %v1068_v62 = vsub.f32 %v992_v48, %v2075_v60  ;;  %v898_v63 = vmul.f32 2.0, %v592_v58  ;;  %v930_v3 = vmul.f32 2.0, %v688_v59 }
 0x136   : > { %1099 = vst [vmem:[%s2080_s30 + $0x20] sm:$0xff] %v1035_v51  ;;  %1131 = vst [vmem:[%s2080_s30 + $0x120] sm:$0xff] %v1067_v52  ;;  %v961_v28 = vsub.f32 %v897_v56, %v2042_v36  ;;  %v993_v4 = vsub.f32 %v929_v57, %v854_v43 }
 0x137   : > { %1100 = vst [vmem:[%s2080_s30 + $0x28] sm:$0xff] %v1036_v61  ;;  %1132 = vst [vmem:[%s2080_s30 + $0x128] sm:$0xff] %v1068_v62  ;;  %v962_v6 = vsub.f32 %v898_v63, %v2042_v36  ;;  %v994_v7 = vsub.f32 %v930_v3, %v854_v43  ;;  %v596_v8 = vpop.f32.mrb[8].mxu0  ;;  %v692_v11 = vpop.f32.mrb[8].mxu1 }
 0x138   : > { %v1037_v12 = vsub.f32 %v961_v28, %v2073_v53  ;;  %v1069_v13 = vsub.f32 %v993_v4, %v2073_v53  ;;  %v899_v14 = vmul.f32 2.0, %v596_v8  ;;  %v931_v15 = vmul.f32 2.0, %v692_v11  ;;  %v598_v19 = vpop.f32.mrb[9].mxu0  ;;  %v694_v21 = vpop.f32.mrb[9].mxu1 }
 0x139   : > { %v1038_v22 = vsub.f32 %v962_v6, %v2075_v60  ;;  %v1070_v24 = vsub.f32 %v994_v7, %v2075_v60  ;;  %v900_v25 = vmul.f32 2.0, %v598_v19  ;;  %v932_v26 = vmul.f32 2.0, %v694_v21  ;;  %v863_v43 = vpop.xlane.xlu0 %862  ;;  %v866_v4 = vpop.xlane.xlu1 %865 }
 0x13a   : > { %1101 = vst [vmem:[%s2080_s30 + $0x30] sm:$0xff] %v1037_v12  ;;  %1133 = vst [vmem:[%s2080_s30 + $0x130] sm:$0xff] %v1069_v13  ;;  %v963_v36 = vsub.f32 %v899_v14, %v2044_v37  ;;  %v995_v27 = vsub.f32 %v931_v15, %v857_v5 }
 0x13b   : > { %1102 = vst [vmem:[%s2080_s30 + $0x38] sm:$0xff] %v1038_v22  ;;  %1134 = vst [vmem:[%s2080_s30 + $0x138] sm:$0xff] %v1070_v24  ;;  %v964_v31 = vsub.f32 %v900_v25, %v2044_v37  ;;  %v996_v0 = vsub.f32 %v932_v26, %v857_v5  ;;  %v602_v34 = vpop.f32.mrb[10].mxu0  ;;  %v698_v35 = vpop.f32.mrb[10].mxu1 }
 0x13c   : > { %v1039_v38 = vsub.f32 %v963_v36, %v2073_v53  ;;  %v1071_v39 = vsub.f32 %v995_v27, %v2073_v53  ;;  %v901_v16 = vmul.f32 2.0, %v602_v34  ;;  %v933_v17 = vmul.f32 2.0, %v698_v35  ;;  %v604_v40 = vpop.f32.mrb[11].mxu0  ;;  %v700_v41 = vpop.f32.mrb[11].mxu1 }
 0x13d   : > { %v1040_v18 = vsub.f32 %v964_v31, %v2075_v60  ;;  %v1072_v20 = vsub.f32 %v996_v0, %v2075_v60  ;;  %v902_v23 = vmul.f32 2.0, %v604_v40  ;;  %v934_v29 = vmul.f32 2.0, %v700_v41  ;;  %v869_v36 = vpop.xlane.xlu0 %868 }
 0x13e   : > { %1103 = vst [vmem:[%s2080_s30 + $0x40] sm:$0xff] %v1039_v38  ;;  %1135 = vst [vmem:[%s2080_s30 + $0x140] sm:$0xff] %v1071_v39  ;;  %v965_v37 = vsub.f32 %v901_v16, %v2046_v46  ;;  %v997_v42 = vsub.f32 %v933_v17, %v860_v30 }
 0x13f   : > { %1104 = vst [vmem:[%s2080_s30 + $0x48] sm:$0xff] %v1040_v18  ;;  %1136 = vst [vmem:[%s2080_s30 + $0x148] sm:$0xff] %v1072_v20  ;;  %v966_v45 = vsub.f32 %v902_v23, %v2046_v46  ;;  %v998_v48 = vsub.f32 %v934_v29, %v860_v30  ;;  %v608_v49 = vpop.f32.mrb[12].mxu0  ;;  %v704_v50 = vpop.f32.mrb[12].mxu1 }
 0x140   : > { %v1041_v51 = vsub.f32 %v965_v37, %v2073_v53  ;;  %v1073_v52 = vsub.f32 %v997_v42, %v2073_v53  ;;  %v903_v56 = vmul.f32 2.0, %v608_v49  ;;  %v935_v57 = vmul.f32 2.0, %v704_v50  ;;  %v610_v58 = vpop.f32.mrb[13].mxu0  ;;  %v706_v59 = vpop.f32.mrb[13].mxu1 }
 0x141   : > { %v1042_v61 = vsub.f32 %v966_v45, %v2075_v60  ;;  %v1074_v62 = vsub.f32 %v998_v48, %v2075_v60  ;;  %v904_v63 = vmul.f32 2.0, %v610_v58  ;;  %v936_v3 = vmul.f32 2.0, %v706_v59  ;;  %v872_v29 = vpop.xlane.xlu1 %871 }
 0x142   : > { %1105 = vst [vmem:[%s2080_s30 + $0x50] sm:$0xff] %v1041_v51  ;;  %1137 = vst [vmem:[%s2080_s30 + $0x150] sm:$0xff] %v1073_v52  ;;  %v967_v46 = vsub.f32 %v903_v56, %v2048_v47  ;;  %v999_v28 = vsub.f32 %v935_v57, %v863_v43 }
 0x143   : > { %1106 = vst [vmem:[%s2080_s30 + $0x58] sm:$0xff] %v1042_v61  ;;  %1138 = vst [vmem:[%s2080_s30 + $0x158] sm:$0xff] %v1074_v62  ;;  %v968_v5 = vsub.f32 %v904_v63, %v2048_v47  ;;  %v1000_v6 = vsub.f32 %v936_v3, %v863_v43  ;;  %v614_v7 = vpop.f32.mrb[14].mxu0  ;;  %v710_v8 = vpop.f32.mrb[14].mxu1 }
 0x144   : > { %v1043_v11 = vsub.f32 %v967_v46, %v2073_v53  ;;  %v1075_v12 = vsub.f32 %v999_v28, %v2073_v53  ;;  %v905_v13 = vmul.f32 2.0, %v614_v7  ;;  %v937_v14 = vmul.f32 2.0, %v710_v8  ;;  %v616_v15 = vpop.f32.mrb[15].mxu0  ;;  %v712_v19 = vpop.f32.mrb[15].mxu1 }
 0x145   : > { %v1044_v21 = vsub.f32 %v968_v5, %v2075_v60  ;;  %v1076_v22 = vsub.f32 %v1000_v6, %v2075_v60  ;;  %v906_v24 = vmul.f32 2.0, %v616_v15  ;;  %v938_v25 = vmul.f32 2.0, %v712_v19  ;;  %v875_v63 = vpop.xlane.xlu0 %874 }
 0x146   : > { %1107 = vst [vmem:[%s2080_s30 + $0x60] sm:$0xff] %v1043_v11  ;;  %1139 = vst [vmem:[%s2080_s30 + $0x160] sm:$0xff] %v1075_v12  ;;  %v969_v47 = vsub.f32 %v905_v13, %v2050_v54  ;;  %v1001_v26 = vsub.f32 %v937_v14, %v866_v4 }
 0x147   : > { %1108 = vst [vmem:[%s2080_s30 + $0x68] sm:$0xff] %v1044_v21  ;;  %1140 = vst [vmem:[%s2080_s30 + $0x168] sm:$0xff] %v1076_v22  ;;  %v970_v27 = vsub.f32 %v906_v24, %v2050_v54  ;;  %v1002_v30 = vsub.f32 %v938_v25, %v866_v4  ;;  %v620_v31 = vpop.f32.mrb[16].mxu0  ;;  %v716_v0 = vpop.f32.mrb[16].mxu1 }
 0x148   : > { %v1045_v34 = vsub.f32 %v969_v47, %v2073_v53  ;;  %v1077_v35 = vsub.f32 %v1001_v26, %v2073_v53  ;;  %v907_v38 = vmul.f32 2.0, %v620_v31  ;;  %v939_v39 = vmul.f32 2.0, %v716_v0  ;;  %v622_v16 = vpop.f32.mrb[17].mxu0  ;;  %v718_v17 = vpop.f32.mrb[17].mxu1 }
 0x149   : > { %v1046_v40 = vsub.f32 %v970_v27, %v2075_v60  ;;  %v1078_v41 = vsub.f32 %v1002_v30, %v2075_v60  ;;  %v908_v18 = vmul.f32 2.0, %v622_v16  ;;  %v940_v20 = vmul.f32 2.0, %v718_v17  ;;  %v878_v22 = vpop.xlane.xlu1 %877 }
 0x14a   : > { %1109 = vst [vmem:[%s2080_s30 + $0x70] sm:$0xff] %v1045_v34  ;;  %1141 = vst [vmem:[%s2080_s30 + $0x170] sm:$0xff] %v1077_v35  ;;  %v971_v54 = vsub.f32 %v907_v38, %v2052_v55  ;;  %v1003_v23 = vsub.f32 %v939_v39, %v869_v36 }
 0x14b   : > { %1110 = vst [vmem:[%s2080_s30 + $0x78] sm:$0xff] %v1046_v40  ;;  %1142 = vst [vmem:[%s2080_s30 + $0x178] sm:$0xff] %v1078_v41  ;;  %v972_v37 = vsub.f32 %v908_v18, %v2052_v55  ;;  %v1004_v42 = vsub.f32 %v940_v20, %v869_v36  ;;  %v626_v43 = vpop.f32.mrb[18].mxu0  ;;  %v722_v45 = vpop.f32.mrb[18].mxu1 }
 0x14c   : > { %v1047_v48 = vsub.f32 %v971_v54, %v2073_v53  ;;  %v1079_v49 = vsub.f32 %v1003_v23, %v2073_v53  ;;  %v909_v50 = vmul.f32 2.0, %v626_v43  ;;  %v941_v51 = vmul.f32 2.0, %v722_v45  ;;  %v628_v52 = vpop.f32.mrb[19].mxu0  ;;  %v724_v56 = vpop.f32.mrb[19].mxu1 }
 0x14d   : > { %v1048_v57 = vsub.f32 %v972_v37, %v2075_v60  ;;  %v1080_v58 = vsub.f32 %v1004_v42, %v2075_v60  ;;  %v910_v59 = vmul.f32 2.0, %v628_v52  ;;  %v942_v61 = vmul.f32 2.0, %v724_v56  ;;  %v881_v40 = vpop.xlane.xlu0 %880  ;;  %v884_v56 = vpop.xlane.xlu1 %883 }
 0x14e   : > { %1111 = vst [vmem:[%s2080_s30 + $0x80] sm:$0xff] %v1047_v48  ;;  %1143 = vst [vmem:[%s2080_s30 + $0x180] sm:$0xff] %v1079_v49  ;;  %v973_v55 = vsub.f32 %v909_v50, %v2054_v1  ;;  %v1005_v62 = vsub.f32 %v941_v51, %v872_v29 }
 0x14f   : > { %1112 = vst [vmem:[%s2080_s30 + $0x88] sm:$0xff] %v1048_v57  ;;  %1144 = vst [vmem:[%s2080_s30 + $0x188] sm:$0xff] %v1080_v58  ;;  %v974_v3 = vsub.f32 %v910_v59, %v2054_v1  ;;  %v1006_v46 = vsub.f32 %v942_v61, %v872_v29  ;;  %v632_v28 = vpop.f32.mrb[20].mxu0  ;;  %v728_v4 = vpop.f32.mrb[20].mxu1 }
 0x150   : > { %v1049_v5 = vsub.f32 %v973_v55, %v2073_v53  ;;  %v1081_v6 = vsub.f32 %v1005_v62, %v2073_v53  ;;  %v911_v7 = vmul.f32 2.0, %v632_v28  ;;  %v943_v8 = vmul.f32 2.0, %v728_v4  ;;  %v634_v11 = vpop.f32.mrb[21].mxu0  ;;  %v730_v12 = vpop.f32.mrb[21].mxu1 }
 0x151   : > { %v1050_v13 = vsub.f32 %v974_v3, %v2075_v60  ;;  %v1082_v14 = vsub.f32 %v1006_v46, %v2075_v60  ;;  %v912_v15 = vmul.f32 2.0, %v634_v11  ;;  %v944_v19 = vmul.f32 2.0, %v730_v12  ;;  %v887_v11 = vpop.xlane.xlu0 %886 }
 0x152   : > { %1113 = vst [vmem:[%s2080_s30 + $0x90] sm:$0xff] %v1049_v5  ;;  %1145 = vst [vmem:[%s2080_s30 + $0x190] sm:$0xff] %v1081_v6  ;;  %v975_v1 = vsub.f32 %v911_v7, %v2056_v2  ;;  %v1007_v21 = vsub.f32 %v943_v8, %v875_v63 }
 0x153   : > { %1114 = vst [vmem:[%s2080_s30 + $0x98] sm:$0xff] %v1050_v13  ;;  %1146 = vst [vmem:[%s2080_s30 + $0x198] sm:$0xff] %v1082_v14  ;;  %v976_v24 = vsub.f32 %v912_v15, %v2056_v2  ;;  %v1008_v25 = vsub.f32 %v944_v19, %v875_v63  ;;  %v638_v47 = vpop.f32.mrb[22].mxu0  ;;  %v734_v26 = vpop.f32.mrb[22].mxu1 }
 0x154   : > { %v1051_v36 = vsub.f32 %v975_v1, %v2073_v53  ;;  %v1083_v27 = vsub.f32 %v1007_v21, %v2073_v53  ;;  %v913_v30 = vmul.f32 2.0, %v638_v47  ;;  %v945_v31 = vmul.f32 2.0, %v734_v26  ;;  %v640_v0 = vpop.f32.mrb[23].mxu0  ;;  %v736_v34 = vpop.f32.mrb[23].mxu1 }
 0x155   : > { %v1052_v35 = vsub.f32 %v976_v24, %v2075_v60  ;;  %v1084_v38 = vsub.f32 %v1008_v25, %v2075_v60  ;;  %v914_v39 = vmul.f32 2.0, %v640_v0  ;;  %v946_v16 = vmul.f32 2.0, %v736_v34 }
 0x156   : > { %1115 = vst [vmem:[%s2080_s30 + $0xa0] sm:$0xff] %v1051_v36  ;;  %1147 = vst [vmem:[%s2080_s30 + $0x1a0] sm:$0xff] %v1083_v27  ;;  %v977_v2 = vsub.f32 %v913_v30, %v2058_v9  ;;  %v1009_v17 = vsub.f32 %v945_v31, %v878_v22  ;;  %v890_v31 = vpop.xlane.xlu1 %889 }
 0x157   : > { %1116 = vst [vmem:[%s2080_s30 + $0xa8] sm:$0xff] %v1052_v35  ;;  %1148 = vst [vmem:[%s2080_s30 + $0x1a8] sm:$0xff] %v1084_v38  ;;  %v978_v41 = vsub.f32 %v914_v39, %v2058_v9  ;;  %v1010_v18 = vsub.f32 %v946_v16, %v878_v22  ;;  %v644_v20 = vpop.f32.mrb[24].mxu0  ;;  %v740_v54 = vpop.f32.mrb[24].mxu1 }
 0x158   : > { %v1053_v23 = vsub.f32 %v977_v2, %v2073_v53  ;;  %v1085_v29 = vsub.f32 %v1009_v17, %v2073_v53  ;;  %v915_v37 = vmul.f32 2.0, %v644_v20  ;;  %v947_v42 = vmul.f32 2.0, %v740_v54  ;;  %v646_v43 = vpop.f32.mrb[25].mxu0  ;;  %v742_v45 = vpop.f32.mrb[25].mxu1 }
 0x159   : > { %v1054_v48 = vsub.f32 %v978_v41, %v2075_v60  ;;  %v1086_v49 = vsub.f32 %v1010_v18, %v2075_v60  ;;  %v916_v50 = vmul.f32 2.0, %v646_v43  ;;  %v948_v51 = vmul.f32 2.0, %v742_v45 }
 0x15a   : > { %1117 = vst [vmem:[%s2080_s30 + $0xb0] sm:$0xff] %v1053_v23  ;;  %1149 = vst [vmem:[%s2080_s30 + $0x1b0] sm:$0xff] %v1085_v29  ;;  %v979_v9 = vsub.f32 %v915_v37, %v2060_v10  ;;  %v1011_v52 = vsub.f32 %v947_v42, %v881_v40 }
 0x15b   : > { %1118 = vst [vmem:[%s2080_s30 + $0xb8] sm:$0xff] %v1054_v48  ;;  %1150 = vst [vmem:[%s2080_s30 + $0x1b8] sm:$0xff] %v1086_v49  ;;  %v980_v57 = vsub.f32 %v916_v50, %v2060_v10  ;;  %v1012_v58 = vsub.f32 %v948_v51, %v881_v40  ;;  %v650_v59 = vpop.f32.mrb[26].mxu0  ;;  %v746_v61 = vpop.f32.mrb[26].mxu1 }
 0x15c   : > { %v1055_v55 = vsub.f32 %v979_v9, %v2073_v53  ;;  %v1087_v62 = vsub.f32 %v1011_v52, %v2073_v53  ;;  %v917_v63 = vmul.f32 2.0, %v650_v59  ;;  %v949_v3 = vmul.f32 2.0, %v746_v61  ;;  %v652_v46 = vpop.f32.mrb[27].mxu0  ;;  %v748_v28 = vpop.f32.mrb[27].mxu1 }
 0x15d   : > { %v1056_v4 = vsub.f32 %v980_v57, %v2075_v60  ;;  %v1088_v5 = vsub.f32 %v1012_v58, %v2075_v60  ;;  %v918_v6 = vmul.f32 2.0, %v652_v46  ;;  %v950_v7 = vmul.f32 2.0, %v748_v28 }
 0x15e   : > { %1119 = vst [vmem:[%s2080_s30 + $0xc0] sm:$0xff] %v1055_v55  ;;  %1151 = vst [vmem:[%s2080_s30 + $0x1c0] sm:$0xff] %v1087_v62  ;;  %v981_v10 = vsub.f32 %v917_v63, %v2062_v32  ;;  %v1013_v8 = vsub.f32 %v949_v3, %v884_v56 }
 0x15f   : > { %1120 = vst [vmem:[%s2080_s30 + $0xc8] sm:$0xff] %v1056_v4  ;;  %1152 = vst [vmem:[%s2080_s30 + $0x1c8] sm:$0xff] %v1088_v5  ;;  %v982_v12 = vsub.f32 %v918_v6, %v2062_v32  ;;  %v1014_v13 = vsub.f32 %v950_v7, %v884_v56  ;;  %v656_v14 = vpop.f32.mrb[28].mxu0  ;;  %v752_v15 = vpop.f32.mrb[28].mxu1 }
 0x160   : > { %v1057_v19 = vsub.f32 %v981_v10, %v2073_v53  ;;  %v1089_v1 = vsub.f32 %v1013_v8, %v2073_v53  ;;  %v919_v21 = vmul.f32 2.0, %v656_v14  ;;  %v951_v22 = vmul.f32 2.0, %v752_v15  ;;  %v658_v24 = vpop.f32.mrb[29].mxu0  ;;  %v754_v25 = vpop.f32.mrb[29].mxu1 }
 0x161   : > { %v1058_v47 = vsub.f32 %v982_v12, %v2075_v60  ;;  %v1090_v26 = vsub.f32 %v1014_v13, %v2075_v60  ;;  %v920_v36 = vmul.f32 2.0, %v658_v24  ;;  %v952_v27 = vmul.f32 2.0, %v754_v25 }
 0x162   : > { %1121 = vst [vmem:[%s2080_s30 + $0xd0] sm:$0xff] %v1057_v19  ;;  %1153 = vst [vmem:[%s2080_s30 + $0x1d0] sm:$0xff] %v1089_v1  ;;  %v983_v32 = vsub.f32 %v919_v21, %v2065_v33  ;;  %v1015_v30 = vsub.f32 %v951_v22, %v887_v11 }
 0x163   : > { %1122 = vst [vmem:[%s2080_s30 + $0xd8] sm:$0xff] %v1058_v47  ;;  %1154 = vst [vmem:[%s2080_s30 + $0x1d8] sm:$0xff] %v1090_v26  ;;  %v984_v0 = vsub.f32 %v920_v36, %v2065_v33  ;;  %v1016_v34 = vsub.f32 %v952_v27, %v887_v11  ;;  %v662_v35 = vpop.f32.mrb[30].mxu0  ;;  %v758_v38 = vpop.f32.mrb[30].mxu1 }
 0x164   : > { %v1059_v39 = vsub.f32 %v983_v32, %v2073_v53  ;;  %v1091_v16 = vsub.f32 %v1015_v30, %v2073_v53  ;;  %v921_v2 = vmul.f32 2.0, %v662_v35  ;;  %v953_v17 = vmul.f32 2.0, %v758_v38  ;;  %v664_v40 = vpop.f32.mrb[31].mxu0  ;;  %v760_v41 = vpop.f32.mrb[31].mxu1 }
 0x165   : > { %v1060_v18 = vsub.f32 %v984_v0, %v2075_v60  ;;  %v1092_v20 = vsub.f32 %v1016_v34, %v2075_v60  ;;  %v922_v33 = vmul.f32 2.0, %v664_v40  ;;  %v954_v54 = vmul.f32 2.0, %v760_v41 }
 0x166   : > { %1123 = vst [vmem:[%s2080_s30 + $0xe0] sm:$0xff] %v1059_v39  ;;  %1155 = vst [vmem:[%s2080_s30 + $0x1e0] sm:$0xff] %v1091_v16  ;;  %v985_v23 = vsub.f32 %v921_v2, %v2070_v44  ;;  %v1017_v29 = vsub.f32 %v953_v17, %v890_v31 }
 0x167   : > { %1124 = vst [vmem:[%s2080_s30 + $0xe8] sm:$0xff] %v1060_v18  ;;  %1156 = vst [vmem:[%s2080_s30 + $0x1e8] sm:$0xff] %v1092_v20  ;;  %v986_v37 = vsub.f32 %v922_v33, %v2070_v44  ;;  %v1018_v42 = vsub.f32 %v954_v54, %v890_v31 }
 0x168   : > { %v1061_v43 = vsub.f32 %v985_v23, %v2073_v53  ;;  %v1093_v45 = vsub.f32 %v1017_v29, %v2073_v53 }
 0x169   : > { %v1062_v48 = vsub.f32 %v986_v37, %v2075_v60  ;;  %v1094_v49 = vsub.f32 %v1018_v42, %v2075_v60 }
 0x16a   : > { %1125 = vst [vmem:[%s2080_s30 + $0xf0] sm:$0xff] %v1061_v43  ;;  %1157 = vst [vmem:[%s2080_s30 + $0x1f0] sm:$0xff] %v1093_v45 }
 0x16b   : > { %1126 = vst [vmem:[%s2080_s30 + $0xf8] sm:$0xff] %v1062_v48  ;;  %1158 = vst [vmem:[%s2080_s30 + $0x1f8] sm:$0xff] %v1094_v49 }
 0x16c PF: > { %s13_s14 = sadd.s32 1, %s1563_s14   ;;  %s2255_s12 = smov %s1559_s13 }
 0x16d   : > { %p10_p5 = scmp.ge.s32.totalorder %s13_s14, 4   ;;  %s2256_s13 = smov %s2258_s15 }
 0x16f   :  { %12 = sbr.rel (!%p10_p5) target bundleno = 2 (0x2), region = 68 }

// kernel: dy_graph_conv2d.3
= control target key start
LH: loop header
LB: loop body
LE: loop exit
PB: predicated region body
PF: predicated region fallthrough
CT: control target
= control target key end

     0   :  { %s4443_s18 = smov 0   ;;  %s4445_s19 = smov 0   ;;  %s5612_s0 = inlined_call_operand.vmem [shape: f32[2,256,4], index: 0, kind: input, shape index: {}]   ;;  %s5613_s1 = inlined_call_operand.vmem [shape: f32[2,9,256,4], index: 1, kind: input, shape index: {}]   ;;  %s5614_s2 = inlined_call_operand.vmem [shape: f32[4,128], index: 2, kind: input, shape index: {}]   ;;  %s5615_s3 = inlined_call_operand.vmem [shape: f32[4,128], index: 3, kind: input, shape index: {}]   ;;  %s5616_s4 = inlined_call_operand.vmem [shape: f32[1,128], index: 4, kind: input, shape index: {}]   ;;  %s5617_s5 = inlined_call_operand.vmem [shape: f32[2,256,128], index: 5, kind: output, shape index: {}]  }
   0x1   :  { %s4447_s20 = smov 0   ;;  %s4449_s21 = smov 0  }
   0x2   :  { %s4451_s22 = smov 0   ;;  %s4453_s23 = smov 0  }
   0x3   :  { %s4455_s24 = smov 0  }
   0x4 LB: > { %s24_s25 = sadd.s32 1, %s4403_s22  ;;  %s27_s26 = sadd.s32 1, %s4407_s23  ;;  %s4411_s24 = sphi %s4455_s24, %s15_s24   ;;  %s4407_s23 = sphi %s4453_s23, %s5623_s23   ;;  %s4403_s22 = sphi %s4451_s22, %s5622_s22   ;;  %s4399_s21 = sphi %s4449_s21, %s5621_s21   ;;  %s4395_s20 = sphi %s4447_s20, %s5620_s20   ;;  %s4391_s19 = sphi %s4445_s19, %s5619_s19   ;;  %s4387_s18 = sphi %s4443_s18, %s5618_s18  }
   0x5   : > { %p25_p0 = scmp.ge.s32.totalorder %s24_s25, 2  ;;  %p71_p1 = scmp.ne.s32.totalorder %s4391_s19, %s4387_s18 }
   0x6   : > { %p72_p2 = scmp.eq.s32.totalorder %s4411_s24, 0  ;;  %s64_s30 = sadd.s32 1, %s4391_s19 }
   0x7   : > { %s5625_s25 = smov (%p25_p0, %s24_s25), 0  ;;  %s5627_s26 = smov (!%p25_p0, %s27_s26), %s4407_s23 }
   0x8   : > { %p73_p3 = por %p72_p2, %p71_p1  ;;  %p29_p4 = scmp.ge.s32.totalorder %s5627_s26, 2 }
   0x9   : > { %s60_s27 = ssub.s32 %s4403_s22, %s5625_s25  ;;  %p3557_p6 = scmp.ge.s32.totalorder %s4411_s24, 4 }
   0xa   : > { %s5629_s26 = smov (%p29_p4, %s5627_s26), 0 }
   0xb   : > { %s59_s28 = ssub.s32 %s4407_s23, %s5629_s26  ;;  %197 = sbr.rel (%p3557_p6) target bundleno = 98 (0x62), region = 28 }
   0xc   : > { %s61_s29 = sor.u32 %s60_s27, %s59_s28 }
   0xd   : > { %p62_p5 = scmp.eq.s32.totalorder %s61_s29, 0 }
   0xf   : > { %s4494_s6 = scalar_select %p62_p5, %s4391_s19, %s64_s30  }
  0x12   : > { %213 = sbr.rel (!%p73_p3) target bundleno = 98 (0x62), region = 36  ;;  %s215_s7 = sand.u32 (%p73_p3), 1, %s4391_s19  }
  0x13   : > { %s4298_s8 = smul.u32 (%p73_p3), 1152, %s215_s7  ;;  %s3558_s9 = sshll.u32 (%p73_p3), %s4403_s22, 4 }
  0x14   : > { %s4299_s10 = smul.u32 (%p73_p3), 288, %s4407_s23 }
  0x15   : > { %s4508_s16 = scalar_lea.vmem (%p73_p3), [#allocation2], %s4298_s8 }
  0x16   : > { %s220_s11 = sadd.s32 (%p73_p3), %s4299_s10, %s3558_s9 }
  0x17   : > { %s3559_s12 = sshll.u32 (%p73_p3), %s220_s11, 3 }
  0x18   : > { %s4503_s15 = scalar_lea.vmem (%p73_p3), %s5613_s1, %s3559_s12 }
  0x19   : > { %v536_v0 = vld [vmem:[%s4503_s15] sm:$0xff]  ;;  %v538_v1 = vld [vmem:[%s4503_s15 + $0x8] sm:$0xff]  ;;  %v540_v2 = vld [vmem:[%s4503_s15 + $0x10] sm:$0xff] }
  0x1a   : > { %537 = vst [vmem:[%s4508_s16] sm:$0xff] %v536_v0  ;;  %539 = vst [vmem:[%s4508_s16 + $0x8] sm:$0xff] %v538_v1  ;;  %v542_v3 = vld [vmem:[%s4503_s15 + $0x18] sm:$0xff]  ;;  %v544_v4 = vld [vmem:[%s4503_s15 + $0x20] sm:$0xff] }
  0x1b   : > { %541 = vst [vmem:[%s4508_s16 + $0x10] sm:$0xff] %v540_v2  ;;  %v546_v5 = vld [vmem:[%s4503_s15 + $0x28] sm:$0xff]  ;;  %543 = vst [vmem:[%s4508_s16 + $0x18] sm:$0xff] %v542_v3  ;;  %v548_v6 = vld [vmem:[%s4503_s15 + $0x30] sm:$0xff] }
  0x1c   : > { %545 = vst [vmem:[%s4508_s16 + $0x20] sm:$0xff] %v544_v4  ;;  %547 = vst [vmem:[%s4508_s16 + $0x28] sm:$0xff] %v546_v5  ;;  %v550_v7 = vld [vmem:[%s4503_s15 + $0x38] sm:$0xff]  ;;  %v552_v8 = vld [vmem:[%s4503_s15 + $0x40] sm:$0xff] }
  0x1d   : > { %549 = vst [vmem:[%s4508_s16 + $0x30] sm:$0xff] %v548_v6  ;;  %551 = vst [vmem:[%s4508_s16 + $0x38] sm:$0xff] %v550_v7  ;;  %v554_v9 = vld [vmem:[%s4503_s15 + $0x48] sm:$0xff]  ;;  %v556_v10 = vld [vmem:[%s4503_s15 + $0x50] sm:$0xff] }
  0x1e   : > { %553 = vst [vmem:[%s4508_s16 + $0x40] sm:$0xff] %v552_v8  ;;  %v558_v11 = vld [vmem:[%s4503_s15 + $0x58] sm:$0xff]  ;;  %555 = vst [vmem:[%s4508_s16 + $0x48] sm:$0xff] %v554_v9  ;;  %v560_v12 = vld [vmem:[%s4503_s15 + $0x60] sm:$0xff] }
  0x1f   : > { %557 = vst [vmem:[%s4508_s16 + $0x50] sm:$0xff] %v556_v10  ;;  %559 = vst [vmem:[%s4508_s16 + $0x58] sm:$0xff] %v558_v11  ;;  %v562_v13 = vld [vmem:[%s4503_s15 + $0x68] sm:$0xff]  ;;  %v564_v14 = vld [vmem:[%s4503_s15 + $0x70] sm:$0xff] }
  0x20   : > { %561 = vst [vmem:[%s4508_s16 + $0x60] sm:$0xff] %v560_v12  ;;  %563 = vst [vmem:[%s4508_s16 + $0x68] sm:$0xff] %v562_v13  ;;  %v566_v15 = vld [vmem:[%s4503_s15 + $0x78] sm:$0xff]  ;;  %v568_v16 = vld [vmem:[%s4503_s15 + $0x100] sm:$0xff] }
  0x21   : > { %565 = vst [vmem:[%s4508_s16 + $0x70] sm:$0xff] %v564_v14  ;;  %v570_v17 = vld [vmem:[%s4503_s15 + $0x108] sm:$0xff]  ;;  %567 = vst [vmem:[%s4508_s16 + $0x78] sm:$0xff] %v566_v15  ;;  %v572_v18 = vld [vmem:[%s4503_s15 + $0x110] sm:$0xff] }
  0x22   : > { %569 = vst [vmem:[%s4508_s16 + $0x80] sm:$0xff] %v568_v16  ;;  %571 = vst [vmem:[%s4508_s16 + $0x88] sm:$0xff] %v570_v17  ;;  %v574_v19 = vld [vmem:[%s4503_s15 + $0x118] sm:$0xff]  ;;  %v576_v20 = vld [vmem:[%s4503_s15 + $0x120] sm:$0xff] }
  0x23   : > { %573 = vst [vmem:[%s4508_s16 + $0x90] sm:$0xff] %v572_v18  ;;  %575 = vst [vmem:[%s4508_s16 + $0x98] sm:$0xff] %v574_v19  ;;  %v578_v21 = vld [vmem:[%s4503_s15 + $0x128] sm:$0xff]  ;;  %v580_v22 = vld [vmem:[%s4503_s15 + $0x130] sm:$0xff] }
  0x24   : > { %577 = vst [vmem:[%s4508_s16 + $0xa0] sm:$0xff] %v576_v20  ;;  %v582_v23 = vld [vmem:[%s4503_s15 + $0x138] sm:$0xff]  ;;  %579 = vst [vmem:[%s4508_s16 + $0xa8] sm:$0xff] %v578_v21  ;;  %v584_v24 = vld [vmem:[%s4503_s15 + $0x140] sm:$0xff] }
  0x25   : > { %581 = vst [vmem:[%s4508_s16 + $0xb0] sm:$0xff] %v580_v22  ;;  %583 = vst [vmem:[%s4508_s16 + $0xb8] sm:$0xff] %v582_v23  ;;  %v586_v25 = vld [vmem:[%s4503_s15 + $0x148] sm:$0xff]  ;;  %v588_v26 = vld [vmem:[%s4503_s15 + $0x150] sm:$0xff] }
  0x26   : > { %585 = vst [vmem:[%s4508_s16 + $0xc0] sm:$0xff] %v584_v24  ;;  %587 = vst [vmem:[%s4508_s16 + $0xc8] sm:$0xff] %v586_v25  ;;  %v590_v27 = vld [vmem:[%s4503_s15 + $0x158] sm:$0xff]  ;;  %v592_v28 = vld [vmem:[%s4503_s15 + $0x160] sm:$0xff] }
  0x27   : > { %589 = vst [vmem:[%s4508_s16 + $0xd0] sm:$0xff] %v588_v26  ;;  %v594_v29 = vld [vmem:[%s4503_s15 + $0x168] sm:$0xff]  ;;  %591 = vst [vmem:[%s4508_s16 + $0xd8] sm:$0xff] %v590_v27  ;;  %v596_v30 = vld [vmem:[%s4503_s15 + $0x170] sm:$0xff] }
  0x28   : > { %593 = vst [vmem:[%s4508_s16 + $0xe0] sm:$0xff] %v592_v28  ;;  %595 = vst [vmem:[%s4508_s16 + $0xe8] sm:$0xff] %v594_v29  ;;  %v598_v31 = vld [vmem:[%s4503_s15 + $0x178] sm:$0xff]  ;;  %v600_v32 = vld [vmem:[%s4503_s15 + $0x200] sm:$0xff] }
  0x29   : > { %597 = vst [vmem:[%s4508_s16 + $0xf0] sm:$0xff] %v596_v30  ;;  %599 = vst [vmem:[%s4508_s16 + $0xf8] sm:$0xff] %v598_v31  ;;  %v602_v33 = vld [vmem:[%s4503_s15 + $0x208] sm:$0xff]  ;;  %v604_v34 = vld [vmem:[%s4503_s15 + $0x210] sm:$0xff] }
  0x2a   : > { %601 = vst [vmem:[%s4508_s16 + $0x100] sm:$0xff] %v600_v32  ;;  %v606_v35 = vld [vmem:[%s4503_s15 + $0x218] sm:$0xff]  ;;  %603 = vst [vmem:[%s4508_s16 + $0x108] sm:$0xff] %v602_v33  ;;  %v608_v36 = vld [vmem:[%s4503_s15 + $0x220] sm:$0xff] }
  0x2b   : > { %605 = vst [vmem:[%s4508_s16 + $0x110] sm:$0xff] %v604_v34  ;;  %607 = vst [vmem:[%s4508_s16 + $0x118] sm:$0xff] %v606_v35  ;;  %v610_v37 = vld [vmem:[%s4503_s15 + $0x228] sm:$0xff]  ;;  %v612_v38 = vld [vmem:[%s4503_s15 + $0x230] sm:$0xff] }
  0x2c   : > { %609 = vst [vmem:[%s4508_s16 + $0x120] sm:$0xff] %v608_v36  ;;  %611 = vst [vmem:[%s4508_s16 + $0x128] sm:$0xff] %v610_v37  ;;  %v614_v39 = vld [vmem:[%s4503_s15 + $0x238] sm:$0xff]  ;;  %v616_v40 = vld [vmem:[%s4503_s15 + $0x240] sm:$0xff] }
  0x2d   : > { %613 = vst [vmem:[%s4508_s16 + $0x130] sm:$0xff] %v612_v38  ;;  %v618_v41 = vld [vmem:[%s4503_s15 + $0x248] sm:$0xff]  ;;  %615 = vst [vmem:[%s4508_s16 + $0x138] sm:$0xff] %v614_v39  ;;  %v620_v42 = vld [vmem:[%s4503_s15 + $0x250] sm:$0xff] }
  0x2e   : > { %617 = vst [vmem:[%s4508_s16 + $0x140] sm:$0xff] %v616_v40  ;;  %619 = vst [vmem:[%s4508_s16 + $0x148] sm:$0xff] %v618_v41  ;;  %v622_v43 = vld [vmem:[%s4503_s15 + $0x258] sm:$0xff]  ;;  %v624_v44 = vld [vmem:[%s4503_s15 + $0x260] sm:$0xff] }
  0x2f   : > { %621 = vst [vmem:[%s4508_s16 + $0x150] sm:$0xff] %v620_v42  ;;  %623 = vst [vmem:[%s4508_s16 + $0x158] sm:$0xff] %v622_v43  ;;  %v626_v45 = vld [vmem:[%s4503_s15 + $0x268] sm:$0xff]  ;;  %v628_v46 = vld [vmem:[%s4503_s15 + $0x270] sm:$0xff] }
  0x30   : > { %625 = vst [vmem:[%s4508_s16 + $0x160] sm:$0xff] %v624_v44  ;;  %v630_v47 = vld [vmem:[%s4503_s15 + $0x278] sm:$0xff]  ;;  %627 = vst [vmem:[%s4508_s16 + $0x168] sm:$0xff] %v626_v45  ;;  %v632_v48 = vld [vmem:[%s4503_s15 + $0x300] sm:$0xff] }
  0x31   : > { %629 = vst [vmem:[%s4508_s16 + $0x170] sm:$0xff] %v628_v46  ;;  %631 = vst [vmem:[%s4508_s16 + $0x178] sm:$0xff] %v630_v47  ;;  %v634_v49 = vld [vmem:[%s4503_s15 + $0x308] sm:$0xff]  ;;  %v636_v50 = vld [vmem:[%s4503_s15 + $0x310] sm:$0xff] }
  0x32   : > { %633 = vst [vmem:[%s4508_s16 + $0x180] sm:$0xff] %v632_v48  ;;  %635 = vst [vmem:[%s4508_s16 + $0x188] sm:$0xff] %v634_v49  ;;  %v638_v51 = vld [vmem:[%s4503_s15 + $0x318] sm:$0xff]  ;;  %v640_v52 = vld [vmem:[%s4503_s15 + $0x320] sm:$0xff] }
  0x33   : > { %637 = vst [vmem:[%s4508_s16 + $0x190] sm:$0xff] %v636_v50  ;;  %v642_v53 = vld [vmem:[%s4503_s15 + $0x328] sm:$0xff]  ;;  %639 = vst [vmem:[%s4508_s16 + $0x198] sm:$0xff] %v638_v51  ;;  %v644_v54 = vld [vmem:[%s4503_s15 + $0x330] sm:$0xff] }
  0x34   : > { %641 = vst [vmem:[%s4508_s16 + $0x1a0] sm:$0xff] %v640_v52  ;;  %643 = vst [vmem:[%s4508_s16 + $0x1a8] sm:$0xff] %v642_v53  ;;  %v646_v55 = vld [vmem:[%s4503_s15 + $0x338] sm:$0xff]  ;;  %v648_v56 = vld [vmem:[%s4503_s15 + $0x340] sm:$0xff] }
  0x35   : > { %645 = vst [vmem:[%s4508_s16 + $0x1b0] sm:$0xff] %v644_v54  ;;  %647 = vst [vmem:[%s4508_s16 + $0x1b8] sm:$0xff] %v646_v55  ;;  %v650_v57 = vld [vmem:[%s4503_s15 + $0x348] sm:$0xff]  ;;  %v652_v58 = vld [vmem:[%s4503_s15 + $0x350] sm:$0xff] }
  0x36   : > { %649 = vst [vmem:[%s4508_s16 + $0x1c0] sm:$0xff] %v648_v56  ;;  %v654_v59 = vld [vmem:[%s4503_s15 + $0x358] sm:$0xff]  ;;  %651 = vst [vmem:[%s4508_s16 + $0x1c8] sm:$0xff] %v650_v57  ;;  %v656_v60 = vld [vmem:[%s4503_s15 + $0x360] sm:$0xff] }
  0x37   : > { %653 = vst [vmem:[%s4508_s16 + $0x1d0] sm:$0xff] %v652_v58  ;;  %655 = vst [vmem:[%s4508_s16 + $0x1d8] sm:$0xff] %v654_v59  ;;  %v658_v61 = vld [vmem:[%s4503_s15 + $0x368] sm:$0xff]  ;;  %v660_v62 = vld [vmem:[%s4503_s15 + $0x370] sm:$0xff] }
  0x38   : > { %657 = vst [vmem:[%s4508_s16 + $0x1e0] sm:$0xff] %v656_v60  ;;  %659 = vst [vmem:[%s4508_s16 + $0x1e8] sm:$0xff] %v658_v61  ;;  %v662_v63 = vld [vmem:[%s4503_s15 + $0x378] sm:$0xff]  ;;  %v664_v0 = vld [vmem:[%s4503_s15 + $0x400] sm:$0xff] }
  0x39   : > { %661 = vst [vmem:[%s4508_s16 + $0x1f0] sm:$0xff] %v660_v62  ;;  %v666_v1 = vld [vmem:[%s4503_s15 + $0x408] sm:$0xff]  ;;  %663 = vst [vmem:[%s4508_s16 + $0x1f8] sm:$0xff] %v662_v63  ;;  %v668_v2 = vld [vmem:[%s4503_s15 + $0x410] sm:$0xff] }
  0x3a   : > { %665 = vst [vmem:[%s4508_s16 + $0x200] sm:$0xff] %v664_v0  ;;  %667 = vst [vmem:[%s4508_s16 + $0x208] sm:$0xff] %v666_v1  ;;  %v670_v3 = vld [vmem:[%s4503_s15 + $0x418] sm:$0xff]  ;;  %v672_v4 = vld [vmem:[%s4503_s15 + $0x420] sm:$0xff] }
  0x3b   : > { %669 = vst [vmem:[%s4508_s16 + $0x210] sm:$0xff] %v668_v2  ;;  %671 = vst [vmem:[%s4508_s16 + $0x218] sm:$0xff] %v670_v3  ;;  %v674_v5 = vld [vmem:[%s4503_s15 + $0x428] sm:$0xff]  ;;  %v676_v6 = vld [vmem:[%s4503_s15 + $0x430] sm:$0xff] }
  0x3c   : > { %673 = vst [vmem:[%s4508_s16 + $0x220] sm:$0xff] %v672_v4  ;;  %v678_v7 = vld [vmem:[%s4503_s15 + $0x438] sm:$0xff]  ;;  %675 = vst [vmem:[%s4508_s16 + $0x228] sm:$0xff] %v674_v5  ;;  %v680_v8 = vld [vmem:[%s4503_s15 + $0x440] sm:$0xff] }
  0x3d   : > { %677 = vst [vmem:[%s4508_s16 + $0x230] sm:$0xff] %v676_v6  ;;  %679 = vst [vmem:[%s4508_s16 + $0x238] sm:$0xff] %v678_v7  ;;  %v682_v9 = vld [vmem:[%s4503_s15 + $0x448] sm:$0xff]  ;;  %v684_v10 = vld [vmem:[%s4503_s15 + $0x450] sm:$0xff] }
  0x3e   : > { %681 = vst [vmem:[%s4508_s16 + $0x240] sm:$0xff] %v680_v8  ;;  %683 = vst [vmem:[%s4508_s16 + $0x248] sm:$0xff] %v682_v9  ;;  %v686_v11 = vld [vmem:[%s4503_s15 + $0x458] sm:$0xff]  ;;  %v688_v12 = vld [vmem:[%s4503_s15 + $0x460] sm:$0xff] }
  0x3f   : > { %685 = vst [vmem:[%s4508_s16 + $0x250] sm:$0xff] %v684_v10  ;;  %v690_v13 = vld [vmem:[%s4503_s15 + $0x468] sm:$0xff]  ;;  %687 = vst [vmem:[%s4508_s16 + $0x258] sm:$0xff] %v686_v11  ;;  %v692_v14 = vld [vmem:[%s4503_s15 + $0x470] sm:$0xff] }
  0x40   : > { %689 = vst [vmem:[%s4508_s16 + $0x260] sm:$0xff] %v688_v12  ;;  %691 = vst [vmem:[%s4508_s16 + $0x268] sm:$0xff] %v690_v13  ;;  %v694_v15 = vld [vmem:[%s4503_s15 + $0x478] sm:$0xff]  ;;  %v696_v16 = vld [vmem:[%s4503_s15 + $0x500] sm:$0xff] }
  0x41   : > { %693 = vst [vmem:[%s4508_s16 + $0x270] sm:$0xff] %v692_v14  ;;  %695 = vst [vmem:[%s4508_s16 + $0x278] sm:$0xff] %v694_v15  ;;  %v698_v17 = vld [vmem:[%s4503_s15 + $0x508] sm:$0xff]  ;;  %v700_v18 = vld [vmem:[%s4503_s15 + $0x510] sm:$0xff] }
  0x42   : > { %697 = vst [vmem:[%s4508_s16 + $0x280] sm:$0xff] %v696_v16  ;;  %v702_v19 = vld [vmem:[%s4503_s15 + $0x518] sm:$0xff]  ;;  %699 = vst [vmem:[%s4508_s16 + $0x288] sm:$0xff] %v698_v17  ;;  %v704_v20 = vld [vmem:[%s4503_s15 + $0x520] sm:$0xff] }
  0x43   : > { %701 = vst [vmem:[%s4508_s16 + $0x290] sm:$0xff] %v700_v18  ;;  %703 = vst [vmem:[%s4508_s16 + $0x298] sm:$0xff] %v702_v19  ;;  %v706_v21 = vld [vmem:[%s4503_s15 + $0x528] sm:$0xff]  ;;  %v708_v22 = vld [vmem:[%s4503_s15 + $0x530] sm:$0xff] }
  0x44   : > { %705 = vst [vmem:[%s4508_s16 + $0x2a0] sm:$0xff] %v704_v20  ;;  %707 = vst [vmem:[%s4508_s16 + $0x2a8] sm:$0xff] %v706_v21  ;;  %v710_v23 = vld [vmem:[%s4503_s15 + $0x538] sm:$0xff]  ;;  %v712_v24 = vld [vmem:[%s4503_s15 + $0x540] sm:$0xff] }
  0x45   : > { %709 = vst [vmem:[%s4508_s16 + $0x2b0] sm:$0xff] %v708_v22  ;;  %v714_v25 = vld [vmem:[%s4503_s15 + $0x548] sm:$0xff]  ;;  %711 = vst [vmem:[%s4508_s16 + $0x2b8] sm:$0xff] %v710_v23  ;;  %v716_v26 = vld [vmem:[%s4503_s15 + $0x550] sm:$0xff] }
  0x46   : > { %713 = vst [vmem:[%s4508_s16 + $0x2c0] sm:$0xff] %v712_v24  ;;  %715 = vst [vmem:[%s4508_s16 + $0x2c8] sm:$0xff] %v714_v25  ;;  %v718_v27 = vld [vmem:[%s4503_s15 + $0x558] sm:$0xff]  ;;  %v720_v28 = vld [vmem:[%s4503_s15 + $0x560] sm:$0xff] }
  0x47   : > { %717 = vst [vmem:[%s4508_s16 + $0x2d0] sm:$0xff] %v716_v26  ;;  %719 = vst [vmem:[%s4508_s16 + $0x2d8] sm:$0xff] %v718_v27  ;;  %v722_v29 = vld [vmem:[%s4503_s15 + $0x568] sm:$0xff]  ;;  %v724_v30 = vld [vmem:[%s4503_s15 + $0x570] sm:$0xff] }
  0x48   : > { %721 = vst [vmem:[%s4508_s16 + $0x2e0] sm:$0xff] %v720_v28  ;;  %v726_v31 = vld [vmem:[%s4503_s15 + $0x578] sm:$0xff]  ;;  %723 = vst [vmem:[%s4508_s16 + $0x2e8] sm:$0xff] %v722_v29  ;;  %v728_v32 = vld [vmem:[%s4503_s15 + $0x600] sm:$0xff] }
  0x49   : > { %725 = vst [vmem:[%s4508_s16 + $0x2f0] sm:$0xff] %v724_v30  ;;  %727 = vst [vmem:[%s4508_s16 + $0x2f8] sm:$0xff] %v726_v31  ;;  %v730_v33 = vld [vmem:[%s4503_s15 + $0x608] sm:$0xff]  ;;  %v732_v34 = vld [vmem:[%s4503_s15 + $0x610] sm:$0xff] }
  0x4a   : > { %729 = vst [vmem:[%s4508_s16 + $0x300] sm:$0xff] %v728_v32  ;;  %731 = vst [vmem:[%s4508_s16 + $0x308] sm:$0xff] %v730_v33  ;;  %v734_v35 = vld [vmem:[%s4503_s15 + $0x618] sm:$0xff]  ;;  %v736_v36 = vld [vmem:[%s4503_s15 + $0x620] sm:$0xff] }
  0x4b   : > { %733 = vst [vmem:[%s4508_s16 + $0x310] sm:$0xff] %v732_v34  ;;  %v738_v37 = vld [vmem:[%s4503_s15 + $0x628] sm:$0xff]  ;;  %735 = vst [vmem:[%s4508_s16 + $0x318] sm:$0xff] %v734_v35  ;;  %v740_v38 = vld [vmem:[%s4503_s15 + $0x630] sm:$0xff] }
  0x4c   : > { %737 = vst [vmem:[%s4508_s16 + $0x320] sm:$0xff] %v736_v36  ;;  %739 = vst [vmem:[%s4508_s16 + $0x328] sm:$0xff] %v738_v37  ;;  %v742_v39 = vld [vmem:[%s4503_s15 + $0x638] sm:$0xff]  ;;  %v744_v40 = vld [vmem:[%s4503_s15 + $0x640] sm:$0xff] }
  0x4d   : > { %741 = vst [vmem:[%s4508_s16 + $0x330] sm:$0xff] %v740_v38  ;;  %743 = vst [vmem:[%s4508_s16 + $0x338] sm:$0xff] %v742_v39  ;;  %v746_v41 = vld [vmem:[%s4503_s15 + $0x648] sm:$0xff]  ;;  %v748_v42 = vld [vmem:[%s4503_s15 + $0x650] sm:$0xff] }
  0x4e   : > { %745 = vst [vmem:[%s4508_s16 + $0x340] sm:$0xff] %v744_v40  ;;  %v750_v43 = vld [vmem:[%s4503_s15 + $0x658] sm:$0xff]  ;;  %747 = vst [vmem:[%s4508_s16 + $0x348] sm:$0xff] %v746_v41  ;;  %v752_v44 = vld [vmem:[%s4503_s15 + $0x660] sm:$0xff] }
  0x4f   : > { %749 = vst [vmem:[%s4508_s16 + $0x350] sm:$0xff] %v748_v42  ;;  %751 = vst [vmem:[%s4508_s16 + $0x358] sm:$0xff] %v750_v43  ;;  %v754_v45 = vld [vmem:[%s4503_s15 + $0x668] sm:$0xff]  ;;  %v756_v46 = vld [vmem:[%s4503_s15 + $0x670] sm:$0xff] }
  0x50   : > { %753 = vst [vmem:[%s4508_s16 + $0x360] sm:$0xff] %v752_v44  ;;  %755 = vst [vmem:[%s4508_s16 + $0x368] sm:$0xff] %v754_v45  ;;  %v758_v47 = vld [vmem:[%s4503_s15 + $0x678] sm:$0xff]  ;;  %v760_v48 = vld [vmem:[%s4503_s15 + $0x700] sm:$0xff] }
  0x51   : > { %757 = vst [vmem:[%s4508_s16 + $0x370] sm:$0xff] %v756_v46  ;;  %v762_v49 = vld [vmem:[%s4503_s15 + $0x708] sm:$0xff]  ;;  %759 = vst [vmem:[%s4508_s16 + $0x378] sm:$0xff] %v758_v47  ;;  %v764_v50 = vld [vmem:[%s4503_s15 + $0x710] sm:$0xff] }
  0x52   : > { %761 = vst [vmem:[%s4508_s16 + $0x380] sm:$0xff] %v760_v48  ;;  %763 = vst [vmem:[%s4508_s16 + $0x388] sm:$0xff] %v762_v49  ;;  %v766_v51 = vld [vmem:[%s4503_s15 + $0x718] sm:$0xff]  ;;  %v768_v52 = vld [vmem:[%s4503_s15 + $0x720] sm:$0xff] }
  0x53   : > { %765 = vst [vmem:[%s4508_s16 + $0x390] sm:$0xff] %v764_v50  ;;  %767 = vst [vmem:[%s4508_s16 + $0x398] sm:$0xff] %v766_v51  ;;  %v770_v53 = vld [vmem:[%s4503_s15 + $0x728] sm:$0xff]  ;;  %v772_v54 = vld [vmem:[%s4503_s15 + $0x730] sm:$0xff] }
  0x54   : > { %769 = vst [vmem:[%s4508_s16 + $0x3a0] sm:$0xff] %v768_v52  ;;  %v774_v55 = vld [vmem:[%s4503_s15 + $0x738] sm:$0xff]  ;;  %771 = vst [vmem:[%s4508_s16 + $0x3a8] sm:$0xff] %v770_v53  ;;  %v776_v56 = vld [vmem:[%s4503_s15 + $0x740] sm:$0xff] }
  0x55   : > { %773 = vst [vmem:[%s4508_s16 + $0x3b0] sm:$0xff] %v772_v54  ;;  %775 = vst [vmem:[%s4508_s16 + $0x3b8] sm:$0xff] %v774_v55  ;;  %v778_v57 = vld [vmem:[%s4503_s15 + $0x748] sm:$0xff]  ;;  %v780_v58 = vld [vmem:[%s4503_s15 + $0x750] sm:$0xff] }
  0x56   : > { %777 = vst [vmem:[%s4508_s16 + $0x3c0] sm:$0xff] %v776_v56  ;;  %779 = vst [vmem:[%s4508_s16 + $0x3c8] sm:$0xff] %v778_v57  ;;  %v782_v59 = vld [vmem:[%s4503_s15 + $0x758] sm:$0xff]  ;;  %v784_v60 = vld [vmem:[%s4503_s15 + $0x760] sm:$0xff] }
  0x57   : > { %781 = vst [vmem:[%s4508_s16 + $0x3d0] sm:$0xff] %v780_v58  ;;  %v786_v61 = vld [vmem:[%s4503_s15 + $0x768] sm:$0xff]  ;;  %783 = vst [vmem:[%s4508_s16 + $0x3d8] sm:$0xff] %v782_v59  ;;  %v788_v62 = vld [vmem:[%s4503_s15 + $0x770] sm:$0xff] }
  0x58   : > { %785 = vst [vmem:[%s4508_s16 + $0x3e0] sm:$0xff] %v784_v60  ;;  %787 = vst [vmem:[%s4508_s16 + $0x3e8] sm:$0xff] %v786_v61  ;;  %v790_v63 = vld [vmem:[%s4503_s15 + $0x778] sm:$0xff]  ;;  %v792_v0 = vld [vmem:[%s4503_s15 + $0x800] sm:$0xff] }
  0x59   : > { %789 = vst [vmem:[%s4508_s16 + $0x3f0] sm:$0xff] %v788_v62  ;;  %791 = vst [vmem:[%s4508_s16 + $0x3f8] sm:$0xff] %v790_v63  ;;  %v794_v1 = vld [vmem:[%s4503_s15 + $0x808] sm:$0xff]  ;;  %v796_v2 = vld [vmem:[%s4503_s15 + $0x810] sm:$0xff] }
  0x5a   : > { %793 = vst [vmem:[%s4508_s16 + $0x400] sm:$0xff] %v792_v0  ;;  %v798_v3 = vld [vmem:[%s4503_s15 + $0x818] sm:$0xff]  ;;  %795 = vst [vmem:[%s4508_s16 + $0x408] sm:$0xff] %v794_v1  ;;  %v800_v4 = vld [vmem:[%s4503_s15 + $0x820] sm:$0xff] }
  0x5b   : > { %797 = vst [vmem:[%s4508_s16 + $0x410] sm:$0xff] %v796_v2  ;;  %799 = vst [vmem:[%s4508_s16 + $0x418] sm:$0xff] %v798_v3  ;;  %v802_v5 = vld [vmem:[%s4503_s15 + $0x828] sm:$0xff]  ;;  %v804_v6 = vld [vmem:[%s4503_s15 + $0x830] sm:$0xff] }
  0x5c   : > { %801 = vst [vmem:[%s4508_s16 + $0x420] sm:$0xff] %v800_v4  ;;  %803 = vst [vmem:[%s4508_s16 + $0x428] sm:$0xff] %v802_v5  ;;  %v806_v7 = vld [vmem:[%s4503_s15 + $0x838] sm:$0xff]  ;;  %v808_v8 = vld [vmem:[%s4503_s15 + $0x840] sm:$0xff] }
  0x5d   : > { %805 = vst [vmem:[%s4508_s16 + $0x430] sm:$0xff] %v804_v6  ;;  %v810_v9 = vld [vmem:[%s4503_s15 + $0x848] sm:$0xff]  ;;  %807 = vst [vmem:[%s4508_s16 + $0x438] sm:$0xff] %v806_v7  ;;  %v812_v10 = vld [vmem:[%s4503_s15 + $0x850] sm:$0xff] }
  0x5e   : > { %809 = vst [vmem:[%s4508_s16 + $0x440] sm:$0xff] %v808_v8  ;;  %811 = vst [vmem:[%s4508_s16 + $0x448] sm:$0xff] %v810_v9  ;;  %v814_v11 = vld [vmem:[%s4503_s15 + $0x858] sm:$0xff]  ;;  %v816_v12 = vld [vmem:[%s4503_s15 + $0x860] sm:$0xff] }
  0x5f   : > { %813 = vst [vmem:[%s4508_s16 + $0x450] sm:$0xff] %v812_v10  ;;  %815 = vst [vmem:[%s4508_s16 + $0x458] sm:$0xff] %v814_v11  ;;  %v818_v13 = vld [vmem:[%s4503_s15 + $0x868] sm:$0xff]  ;;  %v820_v14 = vld [vmem:[%s4503_s15 + $0x870] sm:$0xff] }
  0x60   : > { %817 = vst [vmem:[%s4508_s16 + $0x460] sm:$0xff] %v816_v12  ;;  %v822_v15 = vld [vmem:[%s4503_s15 + $0x878] sm:$0xff]  ;;  %819 = vst [vmem:[%s4508_s16 + $0x468] sm:$0xff] %v818_v13 }
  0x61   : > { %821 = vst [vmem:[%s4508_s16 + $0x470] sm:$0xff] %v820_v14  ;;  %823 = vst [vmem:[%s4508_s16 + $0x478] sm:$0xff] %v822_v15 }
  0x62 PF: > { %p3560_p7 = scmp.ge.s32.totalorder %s4411_s24, 1  ;;  %p828_p8 = scmp.lt.s32.totalorder %s4411_s24, 5 }
  0x64   : > { %p829_p9 = pnand %p3560_p7, %p828_p8 }
  0x65   : > { %vm969_vm0 = vcmask (!%p829_p9), 1043456   ;;  %v4800_v16 = vld [vmem:[%s5615_s3] sm:$0xf] (!%p829_p9)  ;;  %s835_s28 = sand.u32 (!%p829_p9), 1, %s4387_s18   ;;  %s3561_s29 = sshll.u32 (!%p829_p9), %s4395_s20, 4  ;;  %vm920_vm1 = vcmask (!%p829_p9), 31744  }
  0x66   : > { %832 = sbr.rel (%p829_p9) target bundleno = 494 (0x1ee), region = 74  ;;  %4064 = vmatprep.subr.msk.mxu1 (!%p829_p9), %vm969_vm0, %v4800_v16  ;;  %v912_v17 = vld [vmem:[%s5614_s2] sm:$0xf] (!%p829_p9)  ;;  %p876_p10 = scmp.lt.s32.totalorder (!%p829_p9), %s4399_s21, 1 }
  0x67   : > { %s4300_s30 = smul.u32 (!%p829_p9), 1152, %s835_s28  ;;  %4065 = vmatpush3.msk.msra.mxu1 (!%p829_p9), %vm969_vm0, %v4800_v16  ;;  %4038 = vmatprep.subr.msk.mxu0 (!%p829_p9), %vm969_vm0, %v912_v17  ;;  %p878_p11 = scmp.lt.s32.totalorder (!%p829_p9), %s3561_s29, 31 }
  0x68   : > { %4039 = vmatpush3.msk.msra.mxu0 (!%p829_p9), %vm969_vm0, %v912_v17  ;;  %4116 = vmatprep.subr.msk.mxu1 (!%p829_p9), %vm969_vm0, %v4800_v16 }
  0x69   : > { %s4816_s18 = scalar_lea.vmem (!%p829_p9), [#allocation2], %s4300_s30  ;;  %4090 = vmatprep.subr.msk.mxu0 (!%p829_p9), %vm969_vm0, %v4800_v16 }
  0x6a   : > { %v1119_v18 = vld [vmem:[%s4816_s18] sm:$0xff] (!%p829_p9)  ;;  %v1120_v19 = vld [vmem:[%s4816_s18 + $0x8] sm:$0xff] (!%p829_p9)  ;;  %v1121_v20 = vld [vmem:[%s4816_s18 + $0x10] sm:$0xff] (!%p829_p9) }
  0x6b   : > { %4066 = vmatprep.mubr.msk.f32.mxu1 (!%p829_p9), %vm920_vm1, %v1119_v18  ;;  %v1122_v21 = vld [vmem:[%s4816_s18 + $0x18] sm:$0xff] (!%p829_p9)  ;;  %v1123_v22 = vld [vmem:[%s4816_s18 + $0x20] sm:$0xff] (!%p829_p9)  ;;  %v1124_v26 = vld [vmem:[%s4816_s18 + $0x28] sm:$0xff] (!%p829_p9) }
  0x6c   : > { %4067 = vmatmul.mubr.msk.f32.vlgmr.msra.gmra.mrb[0].mxu1 (!%p829_p9), %vm920_vm1, %v1120_v19  ;;  %v1125_v27 = vld [vmem:[%s4816_s18 + $0x30] sm:$0xff] (!%p829_p9)  ;;  %v1126_v30 = vld [vmem:[%s4816_s18 + $0x38] sm:$0xff] (!%p829_p9)  ;;  %v1127_v31 = vld [vmem:[%s4816_s18 + $0x40] sm:$0xff] (!%p829_p9) }
  0x6d   : > { %s5631_s21 = smov (!%p876_p10, %s4399_s21), 1  ;;  %s5633_s29 = smov (!%p878_p11, %s3561_s29), 31  ;;  %4069 = vmatprep.mubr.msk.f32.mxu1 %vm920_vm1, %v1121_v20  ;;  %4117 = vmatpush3.msk.msra.mxu1 %vm969_vm0, %v4800_v16  ;;  %v1128_v34 = vld [vmem:[%s4816_s18 + $0x48] sm:$0xff]  ;;  %v1129_v35 = vld [vmem:[%s4816_s18 + $0x50] sm:$0xff]  ;;  %v1130_v38 = vld [vmem:[%s4816_s18 + $0x58] sm:$0xff] }
  0x6e   : > { %s3562_s20 = sshll.u32 %s5631_s21, 5  ;;  %4168 = vmatprep.subr.msk.mxu1 %vm969_vm0, %v4800_v16  ;;  %v1131_v39 = vld [vmem:[%s4816_s18 + $0x60] sm:$0xff]  ;;  %v1132_v42 = vld [vmem:[%s4816_s18 + $0x68] sm:$0xff]  ;;  %v1133_v43 = vld [vmem:[%s4816_s18 + $0x70] sm:$0xff] }
  0x6f   : > { %s4826_s9 = sadd.s32 %s3562_s20, %s5633_s29  ;;  %v1134_v46 = vld [vmem:[%s4816_s18 + $0x78] sm:$0xff]  ;;  %v3635_v47 = vld [vmem:[%s4816_s18 + $0x100] sm:$0xff]  ;;  %v3636_v50 = vld [vmem:[%s4816_s18 + $0x108] sm:$0xff] }
  0x70   : > { %s3563_s10 = sshll.u32 %s4826_s9, 3  ;;  %4070 = vmatmul.mubr.msk.f32.gmra.mrb[2].mxu1 %vm920_vm1, %v1122_v21  ;;  %v3637_v51 = vld [vmem:[%s4816_s18 + $0x110] sm:$0xff]  ;;  %v3602_v53 = vld [vmem:[%s4816_s18 + $0x80] sm:$0xff]  ;;  %v3638_v54 = vld [vmem:[%s4816_s18 + $0x118] sm:$0xff] }
  0x71   : > { %s4841_s21 = scalar_lea.vmem %s5612_s0, %s3563_s10  ;;  %4072 = vmatprep.mubr.msk.f32.mxu1 %vm920_vm1, %v1123_v22  ;;  %v3639_v55 = vld [vmem:[%s4816_s18 + $0x120] sm:$0xff]  ;;  %v3603_v56 = vld [vmem:[%s4816_s18 + $0x88] sm:$0xff]  ;;  %v3604_v57 = vld [vmem:[%s4816_s18 + $0x90] sm:$0xff]  ;;  %s5535_s17 = scalar_lea.vmem %s5617_s5, %s3563_s10 }
  0x72   : > { %v896_v23 = vld [vmem:[%s4841_s21] sm:$0xff]  ;;  %v897_v24 = vld [vmem:[%s4841_s21 + $0x8] sm:$0xff]  ;;  %v898_v25 = vld [vmem:[%s4841_s21 + $0x10] sm:$0xff] }
  0x73   : > { %4040 = vmatprep.mubr.msk.f32.mxu0 %vm920_vm1, %v896_v23  ;;  %v899_v28 = vld [vmem:[%s4841_s21 + $0x18] sm:$0xff]  ;;  %v900_v29 = vld [vmem:[%s4841_s21 + $0x20] sm:$0xff]  ;;  %v901_v32 = vld [vmem:[%s4841_s21 + $0x28] sm:$0xff] }
  0x74   : > { %4041 = vmatmul.mubr.msk.f32.vlgmr.msra.gmra.mrb[0].mxu0 %vm920_vm1, %v897_v24  ;;  %4073 = vmatmul.mubr.msk.f32.gmra.mrb[4].mxu1 %vm920_vm1, %v1124_v26  ;;  %v902_v33 = vld [vmem:[%s4841_s21 + $0x30] sm:$0xff]  ;;  %v903_v36 = vld [vmem:[%s4841_s21 + $0x38] sm:$0xff]  ;;  %v904_v37 = vld [vmem:[%s4841_s21 + $0x40] sm:$0xff] }
  0x75   : > { %4091 = vmatpush3.msk.msra.mxu0 %vm969_vm0, %v4800_v16  ;;  %4043 = vmatprep.mubr.msk.f32.mxu0 %vm920_vm1, %v898_v25  ;;  %v905_v40 = vld [vmem:[%s4841_s21 + $0x48] sm:$0xff]  ;;  %v906_v41 = vld [vmem:[%s4841_s21 + $0x50] sm:$0xff]  ;;  %v907_v44 = vld [vmem:[%s4841_s21 + $0x58] sm:$0xff] }
  0x76   : > { %4142 = vmatprep.subr.msk.mxu0 %vm969_vm0, %v4800_v16  ;;  %4075 = vmatprep.mubr.msk.f32.mxu1 %vm920_vm1, %v1125_v27  ;;  %v908_v45 = vld [vmem:[%s4841_s21 + $0x60] sm:$0xff]  ;;  %v909_v48 = vld [vmem:[%s4841_s21 + $0x68] sm:$0xff]  ;;  %v910_v49 = vld [vmem:[%s4841_s21 + $0x70] sm:$0xff] }
  0x77   : > { %v911_v52 = vld [vmem:[%s4841_s21 + $0x78] sm:$0xff]  ;;  %v3640_v58 = vld [vmem:[%s4816_s18 + $0x128] sm:$0xff]  ;;  %v3641_v59 = vld [vmem:[%s4816_s18 + $0x130] sm:$0xff] }
  0x78   : > { %4044 = vmatmul.mubr.msk.f32.gmra.mrb[2].mxu0 %vm920_vm1, %v899_v28  ;;  %4076 = vmatmul.mubr.msk.f32.gmra.mrb[6].mxu1 %vm920_vm1, %v1126_v30  ;;  %v3605_v60 = vld [vmem:[%s4816_s18 + $0x98] sm:$0xff]  ;;  %v3606_v61 = vld [vmem:[%s4816_s18 + $0xa0] sm:$0xff]  ;;  %v3607_v0 = vld [vmem:[%s4816_s18 + $0xa8] sm:$0xff] }
  0x79   : > { %4046 = vmatprep.mubr.msk.f32.mxu0 %vm920_vm1, %v900_v29  ;;  %4078 = vmatprep.mubr.msk.f32.mxu1 %vm920_vm1, %v1127_v31  ;;  %v3642_v62 = vld [vmem:[%s4816_s18 + $0x138] sm:$0xff]  ;;  %v3643_v63 = vld [vmem:[%s4816_s18 + $0x140] sm:$0xff]  ;;  %v3608_v1 = vld [vmem:[%s4816_s18 + $0xb0] sm:$0xff] }
  0x7a   : > { %v3644_v2 = vld [vmem:[%s4816_s18 + $0x148] sm:$0xff]  ;;  %v3645_v3 = vld [vmem:[%s4816_s18 + $0x150] sm:$0xff]  ;;  %v3609_v4 = vld [vmem:[%s4816_s18 + $0xb8] sm:$0xff] }
  0x7b   : > { %v3610_v5 = vld [vmem:[%s4816_s18 + $0xc0] sm:$0xff]  ;;  %v3646_v6 = vld [vmem:[%s4816_s18 + $0x158] sm:$0xff]  ;;  %v3611_v8 = vld [vmem:[%s4816_s18 + $0xc8] sm:$0xff] }
  0x7c   : > { %4047 = vmatmul.mubr.msk.f32.gmra.mrb[4].mxu0 %vm920_vm1, %v901_v32  ;;  %4079 = vmatmul.mubr.msk.f32.gmra.mrb[8].mxu1 %vm920_vm1, %v1128_v34  ;;  %v3647_v7 = vld [vmem:[%s4816_s18 + $0x160] sm:$0xff]  ;;  %v3612_v9 = vld [vmem:[%s4816_s18 + $0xd0] sm:$0xff]  ;;  %v3648_v10 = vld [vmem:[%s4816_s18 + $0x168] sm:$0xff] }
  0x7d   : > { %4049 = vmatprep.mubr.msk.f32.mxu0 %vm920_vm1, %v902_v33  ;;  %4081 = vmatprep.mubr.msk.f32.mxu1 %vm920_vm1, %v1129_v35  ;;  %v3649_v11 = vld [vmem:[%s4816_s18 + $0x170] sm:$0xff]  ;;  %v3613_v12 = vld [vmem:[%s4816_s18 + $0xd8] sm:$0xff]  ;;  %v3614_v13 = vld [vmem:[%s4816_s18 + $0xe0] sm:$0xff] }
  0x7e   : > { %v3650_v14 = vld [vmem:[%s4816_s18 + $0x178] sm:$0xff]  ;;  %v3701_v15 = vld [vmem:[%s4816_s18 + $0x200] sm:$0xff]  ;;  %v3615_v17 = vld [vmem:[%s4816_s18 + $0xe8] sm:$0xff] }
  0x7f   : > { %v3616_v18 = vld [vmem:[%s4816_s18 + $0xf0] sm:$0xff]  ;;  %v3702_v19 = vld [vmem:[%s4816_s18 + $0x208] sm:$0xff]  ;;  %v3617_v21 = vld [vmem:[%s4816_s18 + $0xf8] sm:$0xff] }
  0x80   : > { %4050 = vmatmul.mubr.msk.f32.gmra.mrb[6].mxu0 %vm920_vm1, %v903_v36  ;;  %4082 = vmatmul.mubr.msk.f32.gmra.mrb[10].mxu1 %vm920_vm1, %v1130_v38  ;;  %v3703_v20 = vld [vmem:[%s4816_s18 + $0x210] sm:$0xff]  ;;  %v3668_v22 = vld [vmem:[%s4816_s18 + $0x180] sm:$0xff]  ;;  %v3704_v23 = vld [vmem:[%s4816_s18 + $0x218] sm:$0xff] }
  0x81   : > { %4052 = vmatprep.mubr.msk.f32.mxu0 %vm920_vm1, %v904_v37  ;;  %4084 = vmatprep.mubr.msk.f32.mxu1 %vm920_vm1, %v1131_v39  ;;  %v3705_v24 = vld [vmem:[%s4816_s18 + $0x220] sm:$0xff]  ;;  %v3669_v25 = vld [vmem:[%s4816_s18 + $0x188] sm:$0xff]  ;;  %v3670_v26 = vld [vmem:[%s4816_s18 + $0x190] sm:$0xff] }
  0x82   : > { %v3706_v27 = vld [vmem:[%s4816_s18 + $0x228] sm:$0xff]  ;;  %v3707_v28 = vld [vmem:[%s4816_s18 + $0x230] sm:$0xff]  ;;  %v3671_v29 = vld [vmem:[%s4816_s18 + $0x198] sm:$0xff] }
  0x83   : > { %v3672_v30 = vld [vmem:[%s4816_s18 + $0x1a0] sm:$0xff]  ;;  %v3708_v31 = vld [vmem:[%s4816_s18 + $0x238] sm:$0xff]  ;;  %v3673_v33 = vld [vmem:[%s4816_s18 + $0x1a8] sm:$0xff] }
  0x84   : > { %4053 = vmatmul.mubr.msk.f32.gmra.mrb[8].mxu0 %vm920_vm1, %v905_v40  ;;  %4085 = vmatmul.mubr.msk.f32.gmra.mrb[12].mxu1 %vm920_vm1, %v1132_v42  ;;  %v3709_v32 = vld [vmem:[%s4816_s18 + $0x240] sm:$0xff]  ;;  %v3674_v34 = vld [vmem:[%s4816_s18 + $0x1b0] sm:$0xff]  ;;  %v3710_v35 = vld [vmem:[%s4816_s18 + $0x248] sm:$0xff] }
  0x85   : > { %4055 = vmatprep.mubr.msk.f32.mxu0 %vm920_vm1, %v906_v41  ;;  %4087 = vmatprep.mubr.msk.f32.mxu1 %vm920_vm1, %v1133_v43  ;;  %v3711_v36 = vld [vmem:[%s4816_s18 + $0x250] sm:$0xff]  ;;  %v3675_v37 = vld [vmem:[%s4816_s18 + $0x1b8] sm:$0xff]  ;;  %v3676_v38 = vld [vmem:[%s4816_s18 + $0x1c0] sm:$0xff] }
  0x86   : > { %v3712_v39 = vld [vmem:[%s4816_s18 + $0x258] sm:$0xff]  ;;  %v3713_v40 = vld [vmem:[%s4816_s18 + $0x260] sm:$0xff]  ;;  %v3677_v41 = vld [vmem:[%s4816_s18 + $0x1c8] sm:$0xff] }
  0x87   : > { %v3678_v42 = vld [vmem:[%s4816_s18 + $0x1d0] sm:$0xff]  ;;  %v3714_v43 = vld [vmem:[%s4816_s18 + $0x268] sm:$0xff] }
  0x88   : > { %4056 = vmatmul.mubr.msk.f32.gmra.mrb[10].mxu0 %vm920_vm1, %v907_v44  ;;  %4088 = vmatmul.mubr.msk.f32.gmra.mrb[14].mxu1 %vm920_vm1, %v1134_v46  ;;  %v3715_v44 = vld [vmem:[%s4816_s18 + $0x270] sm:$0xff]  ;;  %v3680_v46 = vld [vmem:[%s4816_s18 + $0x1e0] sm:$0xff] }
  0x89   : > { %4058 = vmatprep.mubr.msk.f32.mxu0 %vm920_vm1, %v908_v45  ;;  %4118 = vmatprep.mubr.msk.f32.mxu1 %vm920_vm1, %v3635_v47  ;;  %v3679_v45 = vld [vmem:[%s4816_s18 + $0x1d8] sm:$0xff] }
  0x8a   : > { %v3716_v47 = vld [vmem:[%s4816_s18 + $0x278] sm:$0xff] }
  0x8c   : > { %4059 = vmatmul.mubr.msk.f32.gmra.mrb[12].mxu0 %vm920_vm1, %v909_v48  ;;  %4119 = vmatmul.mubr.msk.f32.vlgmr.msra.gmra.mrb[16].mxu1 %vm920_vm1, %v3636_v50  ;;  %v3767_v48 = vld [vmem:[%s4816_s18 + $0x300] sm:$0xff]  ;;  %v3682_v50 = vld [vmem:[%s4816_s18 + $0x1f0] sm:$0xff] }
  0x8d   : > { %4061 = vmatprep.mubr.msk.f32.mxu0 %vm920_vm1, %v910_v49  ;;  %4121 = vmatprep.mubr.msk.f32.mxu1 %vm920_vm1, %v3637_v51  ;;  %v3681_v49 = vld [vmem:[%s4816_s18 + $0x1e8] sm:$0xff] }
  0x8e   : > { %4169 = vmatpush3.msk.msra.mxu1 %vm969_vm0, %v4800_v16  ;;  %v3768_v51 = vld [vmem:[%s4816_s18 + $0x308] sm:$0xff] }
  0x8f   : > { %4220 = vmatprep.subr.msk.mxu1 %vm969_vm0, %v4800_v16 }
  0x90   : > { %4062 = vmatmul.mubr.msk.f32.gmra.mrb[14].mxu0 %vm920_vm1, %v911_v52  ;;  %4122 = vmatmul.mubr.msk.f32.gmra.mrb[18].mxu1 %vm920_vm1, %v3638_v54  ;;  %v3769_v52 = vld [vmem:[%s4816_s18 + $0x310] sm:$0xff]  ;;  %v3734_v54 = vld [vmem:[%s4816_s18 + $0x280] sm:$0xff] }
  0x91   : > { %4092 = vmatprep.mubr.msk.f32.mxu0 %vm920_vm1, %v3602_v53  ;;  %4124 = vmatprep.mubr.msk.f32.mxu1 %vm920_vm1, %v3639_v55  ;;  %v3683_v53 = vld [vmem:[%s4816_s18 + $0x1f8] sm:$0xff] }
  0x92   : > { %v3770_v55 = vld [vmem:[%s4816_s18 + $0x318] sm:$0xff] }
  0x94   : > { %4093 = vmatmul.mubr.msk.f32.vlgmr.msra.gmra.mrb[16].mxu0 %vm920_vm1, %v3603_v56  ;;  %4125 = vmatmul.mubr.msk.f32.gmra.mrb[20].mxu1 %vm920_vm1, %v3640_v58  ;;  %v3771_v56 = vld [vmem:[%s4816_s18 + $0x320] sm:$0xff]  ;;  %v3736_v58 = vld [vmem:[%s4816_s18 + $0x290] sm:$0xff] }
  0x95   : > { %4143 = vmatpush3.msk.msra.mxu0 %vm969_vm0, %v4800_v16  ;;  %4095 = vmatprep.mubr.msk.f32.mxu0 %vm920_vm1, %v3604_v57  ;;  %v3735_v57 = vld [vmem:[%s4816_s18 + $0x288] sm:$0xff] }
  0x96   : > { %4194 = vmatprep.subr.msk.mxu0 %vm969_vm0, %v4800_v16  ;;  %4127 = vmatprep.mubr.msk.f32.mxu1 %vm920_vm1, %v3641_v59  ;;  %v3772_v59 = vld [vmem:[%s4816_s18 + $0x328] sm:$0xff] }
  0x98   : > { %4096 = vmatmul.mubr.msk.f32.gmra.mrb[18].mxu0 %vm920_vm1, %v3605_v60  ;;  %4128 = vmatmul.mubr.msk.f32.gmra.mrb[22].mxu1 %vm920_vm1, %v3642_v62  ;;  %v3773_v60 = vld [vmem:[%s4816_s18 + $0x330] sm:$0xff]  ;;  %v3738_v62 = vld [vmem:[%s4816_s18 + $0x2a0] sm:$0xff] }
  0x99   : > { %4098 = vmatprep.mubr.msk.f32.mxu0 %vm920_vm1, %v3606_v61  ;;  %4130 = vmatprep.mubr.msk.f32.mxu1 %vm920_vm1, %v3643_v63  ;;  %v3737_v61 = vld [vmem:[%s4816_s18 + $0x298] sm:$0xff] }
  0x9a   : > { %v3774_v63 = vld [vmem:[%s4816_s18 + $0x338] sm:$0xff] }
  0x9c   : > { %4099 = vmatmul.mubr.msk.f32.gmra.mrb[20].mxu0 %vm920_vm1, %v3607_v0  ;;  %4131 = vmatmul.mubr.msk.f32.gmra.mrb[24].mxu1 %vm920_vm1, %v3644_v2  ;;  %v3775_v0 = vld [vmem:[%s4816_s18 + $0x340] sm:$0xff]  ;;  %v3776_v2 = vld [vmem:[%s4816_s18 + $0x348] sm:$0xff] }
  0x9d   : > { %4101 = vmatprep.mubr.msk.f32.mxu0 %vm920_vm1, %v3608_v1  ;;  %4133 = vmatprep.mubr.msk.f32.mxu1 %vm920_vm1, %v3645_v3  ;;  %v3740_v1 = vld [vmem:[%s4816_s18 + $0x2b0] sm:$0xff] }
  0x9e   : > { %v3777_v3 = vld [vmem:[%s4816_s18 + $0x350] sm:$0xff] }
  0xa0   : > { %4102 = vmatmul.mubr.msk.f32.gmra.mrb[22].mxu0 %vm920_vm1, %v3609_v4  ;;  %4134 = vmatmul.mubr.msk.f32.gmra.mrb[26].mxu1 %vm920_vm1, %v3646_v6  ;;  %v3741_v4 = vld [vmem:[%s4816_s18 + $0x2b8] sm:$0xff] }
  0xa1   : > { %4104 = vmatprep.mubr.msk.f32.mxu0 %vm920_vm1, %v3610_v5  ;;  %4136 = vmatprep.mubr.msk.f32.mxu1 %vm920_vm1, %v3647_v7  ;;  %v3742_v5 = vld [vmem:[%s4816_s18 + $0x2c0] sm:$0xff]  ;;  %v3778_v6 = vld [vmem:[%s4816_s18 + $0x358] sm:$0xff] }
  0xa2   : > { %v3779_v7 = vld [vmem:[%s4816_s18 + $0x360] sm:$0xff] }
  0xa4   : > { %4105 = vmatmul.mubr.msk.f32.gmra.mrb[24].mxu0 %vm920_vm1, %v3611_v8  ;;  %4137 = vmatmul.mubr.msk.f32.gmra.mrb[28].mxu1 %vm920_vm1, %v3648_v10  ;;  %v3743_v8 = vld [vmem:[%s4816_s18 + $0x2c8] sm:$0xff] }
  0xa5   : > { %4107 = vmatprep.mubr.msk.f32.mxu0 %vm920_vm1, %v3612_v9  ;;  %4139 = vmatprep.mubr.msk.f32.mxu1 %vm920_vm1, %v3649_v11  ;;  %v3744_v9 = vld [vmem:[%s4816_s18 + $0x2d0] sm:$0xff]  ;;  %v3780_v10 = vld [vmem:[%s4816_s18 + $0x368] sm:$0xff] }
  0xa6   : > { %v3781_v11 = vld [vmem:[%s4816_s18 + $0x370] sm:$0xff] }
  0xa8   : > { %4108 = vmatmul.mubr.msk.f32.gmra.mrb[26].mxu0 %vm920_vm1, %v3613_v12  ;;  %4140 = vmatmul.mubr.msk.f32.gmra.mrb[30].mxu1 %vm920_vm1, %v3650_v14  ;;  %v3745_v12 = vld [vmem:[%s4816_s18 + $0x2d8] sm:$0xff] }
  0xa9   : > { %4110 = vmatprep.mubr.msk.f32.mxu0 %vm920_vm1, %v3614_v13  ;;  %4170 = vmatprep.mubr.msk.f32.mxu1 %vm920_vm1, %v3701_v15  ;;  %v3746_v13 = vld [vmem:[%s4816_s18 + $0x2e0] sm:$0xff]  ;;  %v3782_v14 = vld [vmem:[%s4816_s18 + $0x378] sm:$0xff] }
  0xaa   : > { %v3833_v15 = vld [vmem:[%s4816_s18 + $0x400] sm:$0xff] }
  0xac   : > { %4111 = vmatmul.mubr.msk.f32.gmra.mrb[28].mxu0 %vm920_vm1, %v3615_v17  ;;  %4171 = vmatmul.mubr.msk.f32.vlgmr.msra.gmra.mrb[32].mxu1 %vm920_vm1, %v3702_v19  ;;  %v3747_v17 = vld [vmem:[%s4816_s18 + $0x2e8] sm:$0xff] }
  0xad   : > { %4113 = vmatprep.mubr.msk.f32.mxu0 %vm920_vm1, %v3616_v18  ;;  %4173 = vmatprep.mubr.msk.f32.mxu1 %vm920_vm1, %v3703_v20  ;;  %v3748_v18 = vld [vmem:[%s4816_s18 + $0x2f0] sm:$0xff]  ;;  %v3834_v19 = vld [vmem:[%s4816_s18 + $0x408] sm:$0xff] }
  0xae   : > { %4221 = vmatpush3.msk.msra.mxu1 %vm969_vm0, %v4800_v16  ;;  %v3835_v20 = vld [vmem:[%s4816_s18 + $0x410] sm:$0xff] }
  0xaf   : > { %4272 = vmatprep.subr.msk.mxu1 %vm969_vm0, %v4800_v16 }
  0xb0   : > { %4114 = vmatmul.mubr.msk.f32.gmra.mrb[30].mxu0 %vm920_vm1, %v3617_v21  ;;  %4174 = vmatmul.mubr.msk.f32.gmra.mrb[34].mxu1 %vm920_vm1, %v3704_v23  ;;  %v3749_v21 = vld [vmem:[%s4816_s18 + $0x2f8] sm:$0xff] }
  0xb1   : > { %4144 = vmatprep.mubr.msk.f32.mxu0 %vm920_vm1, %v3668_v22  ;;  %4176 = vmatprep.mubr.msk.f32.mxu1 %vm920_vm1, %v3705_v24  ;;  %v3800_v22 = vld [vmem:[%s4816_s18 + $0x380] sm:$0xff]  ;;  %v3836_v23 = vld [vmem:[%s4816_s18 + $0x418] sm:$0xff] }
  0xb2   : > { %v3837_v24 = vld [vmem:[%s4816_s18 + $0x420] sm:$0xff] }
  0xb4   : > { %4145 = vmatmul.mubr.msk.f32.vlgmr.msra.gmra.mrb[32].mxu0 %vm920_vm1, %v3669_v25  ;;  %4177 = vmatmul.mubr.msk.f32.gmra.mrb[36].mxu1 %vm920_vm1, %v3706_v27  ;;  %v3801_v25 = vld [vmem:[%s4816_s18 + $0x388] sm:$0xff] }
  0xb5   : > { %4195 = vmatpush3.msk.msra.mxu0 %vm969_vm0, %v4800_v16  ;;  %4147 = vmatprep.mubr.msk.f32.mxu0 %vm920_vm1, %v3670_v26  ;;  %v3802_v26 = vld [vmem:[%s4816_s18 + $0x390] sm:$0xff]  ;;  %v3838_v27 = vld [vmem:[%s4816_s18 + $0x428] sm:$0xff] }
  0xb6   : > { %4246 = vmatprep.subr.msk.mxu0 %vm969_vm0, %v4800_v16  ;;  %4179 = vmatprep.mubr.msk.f32.mxu1 %vm920_vm1, %v3707_v28  ;;  %v3839_v28 = vld [vmem:[%s4816_s18 + $0x430] sm:$0xff] }
  0xb8   : > { %4148 = vmatmul.mubr.msk.f32.gmra.mrb[34].mxu0 %vm920_vm1, %v3671_v29  ;;  %4180 = vmatmul.mubr.msk.f32.gmra.mrb[38].mxu1 %vm920_vm1, %v3708_v31  ;;  %v3803_v29 = vld [vmem:[%s4816_s18 + $0x398] sm:$0xff] }
  0xb9   : > { %4150 = vmatprep.mubr.msk.f32.mxu0 %vm920_vm1, %v3672_v30  ;;  %4182 = vmatprep.mubr.msk.f32.mxu1 %vm920_vm1, %v3709_v32  ;;  %v3804_v30 = vld [vmem:[%s4816_s18 + $0x3a0] sm:$0xff]  ;;  %v3840_v31 = vld [vmem:[%s4816_s18 + $0x438] sm:$0xff] }
  0xba   : > { %v3841_v32 = vld [vmem:[%s4816_s18 + $0x440] sm:$0xff] }
  0xbc   : > { %4151 = vmatmul.mubr.msk.f32.gmra.mrb[36].mxu0 %vm920_vm1, %v3673_v33  ;;  %4183 = vmatmul.mubr.msk.f32.gmra.mrb[40].mxu1 %vm920_vm1, %v3710_v35  ;;  %v3805_v33 = vld [vmem:[%s4816_s18 + $0x3a8] sm:$0xff] }
  0xbd   : > { %4153 = vmatprep.mubr.msk.f32.mxu0 %vm920_vm1, %v3674_v34  ;;  %4185 = vmatprep.mubr.msk.f32.mxu1 %vm920_vm1, %v3711_v36  ;;  %v3806_v34 = vld [vmem:[%s4816_s18 + $0x3b0] sm:$0xff]  ;;  %v3842_v35 = vld [vmem:[%s4816_s18 + $0x448] sm:$0xff] }
  0xbe   : > { %v3843_v36 = vld [vmem:[%s4816_s18 + $0x450] sm:$0xff] }
  0xc0   : > { %4154 = vmatmul.mubr.msk.f32.gmra.mrb[38].mxu0 %vm920_vm1, %v3675_v37  ;;  %4186 = vmatmul.mubr.msk.f32.gmra.mrb[42].mxu1 %vm920_vm1, %v3712_v39  ;;  %v3807_v37 = vld [vmem:[%s4816_s18 + $0x3b8] sm:$0xff] }
  0xc1   : > { %4156 = vmatprep.mubr.msk.f32.mxu0 %vm920_vm1, %v3676_v38  ;;  %4188 = vmatprep.mubr.msk.f32.mxu1 %vm920_vm1, %v3713_v40  ;;  %v3808_v38 = vld [vmem:[%s4816_s18 + $0x3c0] sm:$0xff]  ;;  %v3844_v39 = vld [vmem:[%s4816_s18 + $0x458] sm:$0xff] }
  0xc2   : > { %v3845_v40 = vld [vmem:[%s4816_s18 + $0x460] sm:$0xff] }
  0xc4   : > { %4157 = vmatmul.mubr.msk.f32.gmra.mrb[40].mxu0 %vm920_vm1, %v3677_v41  ;;  %4189 = vmatmul.mubr.msk.f32.gmra.mrb[44].mxu1 %vm920_vm1, %v3714_v43  ;;  %v3809_v41 = vld [vmem:[%s4816_s18 + $0x3c8] sm:$0xff] }
  0xc5   : > { %4159 = vmatprep.mubr.msk.f32.mxu0 %vm920_vm1, %v3678_v42  ;;  %4191 = vmatprep.mubr.msk.f32.mxu1 %vm920_vm1, %v3715_v44  ;;  %v3810_v42 = vld [vmem:[%s4816_s18 + $0x3d0] sm:$0xff]  ;;  %v3846_v43 = vld [vmem:[%s4816_s18 + $0x468] sm:$0xff] }
  0xc6   : > { %v3847_v44 = vld [vmem:[%s4816_s18 + $0x470] sm:$0xff] }
  0xc8   : > { %4160 = vmatmul.mubr.msk.f32.gmra.mrb[42].mxu0 %vm920_vm1, %v3679_v45  ;;  %4192 = vmatmul.mubr.msk.f32.gmra.mrb[46].mxu1 %vm920_vm1, %v3716_v47  ;;  %v3811_v45 = vld [vmem:[%s4816_s18 + $0x3d8] sm:$0xff] }
  0xc9   : > { %4162 = vmatprep.mubr.msk.f32.mxu0 %vm920_vm1, %v3680_v46  ;;  %4222 = vmatprep.mubr.msk.f32.mxu1 %vm920_vm1, %v3767_v48  ;;  %v3812_v46 = vld [vmem:[%s4816_s18 + $0x3e0] sm:$0xff]  ;;  %v3848_v47 = vld [vmem:[%s4816_s18 + $0x478] sm:$0xff]  ;;  %v3813_v48 = vld [vmem:[%s4816_s18 + $0x3e8] sm:$0xff] }
  0xcc   : > { %4163 = vmatmul.mubr.msk.f32.gmra.mrb[44].mxu0 %vm920_vm1, %v3681_v49  ;;  %4223 = vmatmul.mubr.msk.f32.vlgmr.msra.gmra.mrb[48].mxu1 %vm920_vm1, %v3768_v51  ;;  %v3814_v49 = vld [vmem:[%s4816_s18 + $0x3f0] sm:$0xff] }
  0xcd   : > { %4165 = vmatprep.mubr.msk.f32.mxu0 %vm920_vm1, %v3682_v50  ;;  %4225 = vmatprep.mubr.msk.f32.mxu1 %vm920_vm1, %v3769_v52  ;;  %v3815_v50 = vld [vmem:[%s4816_s18 + $0x3f8] sm:$0xff] }
  0xce   : > { %4273 = vmatpush3.msk.msra.mxu1 %vm969_vm0, %v4800_v16 }
  0xd0   : > { %4166 = vmatmul.mubr.msk.f32.gmra.mrb[46].mxu0 %vm920_vm1, %v3683_v53  ;;  %4226 = vmatmul.mubr.msk.f32.gmra.mrb[50].mxu1 %vm920_vm1, %v3770_v55  ;;  %v5182_v53 = vld [vmem:[%s5616_s4] ss:$0 sm:$0xff] }
  0xd1   : > { %4196 = vmatprep.mubr.msk.f32.mxu0 %vm920_vm1, %v3734_v54  ;;  %4228 = vmatprep.mubr.msk.f32.mxu1 %vm920_vm1, %v3771_v56 }
  0xd4   : > { %4197 = vmatmul.mubr.msk.f32.vlgmr.msra.gmra.mrb[48].mxu0 %vm920_vm1, %v3735_v57  ;;  %4229 = vmatmul.mubr.msk.f32.gmra.mrb[52].mxu1 %vm920_vm1, %v3772_v59 }
  0xd5   : > { %4247 = vmatpush3.msk.msra.mxu0 %vm969_vm0, %v4800_v16  ;;  %4199 = vmatprep.mubr.msk.f32.mxu0 %vm920_vm1, %v3736_v58  ;;  %v3739_v16 = vld [vmem:[%s4816_s18 + $0x2a8] sm:$0xff] }
  0xd6   : > { %4231 = vmatprep.mubr.msk.f32.mxu1 %vm920_vm1, %v3773_v60 }
  0xd8   : > { %4200 = vmatmul.mubr.msk.f32.gmra.mrb[50].mxu0 %vm920_vm1, %v3737_v61  ;;  %4232 = vmatmul.mubr.msk.f32.gmra.mrb[54].mxu1 %vm920_vm1, %v3774_v63 }
  0xd9   : > { %4202 = vmatprep.mubr.msk.f32.mxu0 %vm920_vm1, %v3738_v62  ;;  %4234 = vmatprep.mubr.msk.f32.mxu1 %vm920_vm1, %v3775_v0 }
  0xdc   : > { %4203 = vmatmul.mubr.msk.f32.gmra.mrb[52].mxu0 %vm920_vm1, %v3739_v16  ;;  %4235 = vmatmul.mubr.msk.f32.gmra.mrb[56].mxu1 %vm920_vm1, %v3776_v2 }
  0xdd   : > { %4205 = vmatprep.mubr.msk.f32.mxu0 %vm920_vm1, %v3740_v1  ;;  %4237 = vmatprep.mubr.msk.f32.mxu1 %vm920_vm1, %v3777_v3 }
  0xe0   : > { %4206 = vmatmul.mubr.msk.f32.gmra.mrb[54].mxu0 %vm920_vm1, %v3741_v4  ;;  %4238 = vmatmul.mubr.msk.f32.gmra.mrb[58].mxu1 %vm920_vm1, %v3778_v6 }
  0xe1   : > { %4208 = vmatprep.mubr.msk.f32.mxu0 %vm920_vm1, %v3742_v5  ;;  %4240 = vmatprep.mubr.msk.f32.mxu1 %vm920_vm1, %v3779_v7 }
  0xe4   : > { %4209 = vmatmul.mubr.msk.f32.gmra.mrb[56].mxu0 %vm920_vm1, %v3743_v8  ;;  %4241 = vmatmul.mubr.msk.f32.gmra.mrb[60].mxu1 %vm920_vm1, %v3780_v10 }
  0xe5   : > { %4211 = vmatprep.mubr.msk.f32.mxu0 %vm920_vm1, %v3744_v9  ;;  %4243 = vmatprep.mubr.msk.f32.mxu1 %vm920_vm1, %v3781_v11 }
  0xe8   : > { %4212 = vmatmul.mubr.msk.f32.gmra.mrb[58].mxu0 %vm920_vm1, %v3745_v12  ;;  %4244 = vmatmul.mubr.msk.f32.gmra.mrb[62].mxu1 %vm920_vm1, %v3782_v14 }
  0xe9   : > { %4214 = vmatprep.mubr.msk.f32.mxu0 %vm920_vm1, %v3746_v13  ;;  %4274 = vmatprep.mubr.msk.f32.mxu1 %vm920_vm1, %v3833_v15 }
  0xec   : > { %4215 = vmatmul.mubr.msk.f32.gmra.mrb[60].mxu0 %vm920_vm1, %v3747_v17  ;;  %4275 = vmatmul.mubr.msk.f32.vlgmr.msra.gmra.mrb[64].mxu1 %vm920_vm1, %v3834_v19 }
  0xed   : > { %4217 = vmatprep.mubr.msk.f32.mxu0 %vm920_vm1, %v3748_v18  ;;  %4277 = vmatprep.mubr.msk.f32.mxu1 %vm920_vm1, %v3835_v20 }
  0xf0   : > { %4218 = vmatmul.mubr.msk.f32.gmra.mrb[62].mxu0 %vm920_vm1, %v3749_v21  ;;  %4278 = vmatmul.mubr.msk.f32.gmra.mrb[66].mxu1 %vm920_vm1, %v3836_v23 }
  0xf1   : > { %4248 = vmatprep.mubr.msk.f32.mxu0 %vm920_vm1, %v3800_v22  ;;  %4280 = vmatprep.mubr.msk.f32.mxu1 %vm920_vm1, %v3837_v24 }
  0xf4   : > { %4249 = vmatmul.mubr.msk.f32.vlgmr.msra.gmra.mrb[64].mxu0 %vm920_vm1, %v3801_v25  ;;  %4281 = vmatmul.mubr.msk.f32.gmra.mrb[68].mxu1 %vm920_vm1, %v3838_v27 }
  0xf5   : > { %4251 = vmatprep.mubr.msk.f32.mxu0 %vm920_vm1, %v3802_v26  ;;  %4283 = vmatprep.mubr.msk.f32.mxu1 %vm920_vm1, %v3839_v28 }
  0xf8   : > { %4252 = vmatmul.mubr.msk.f32.gmra.mrb[66].mxu0 %vm920_vm1, %v3803_v29  ;;  %4284 = vmatmul.mubr.msk.f32.gmra.mrb[70].mxu1 %vm920_vm1, %v3840_v31 }
  0xf9   : > { %4254 = vmatprep.mubr.msk.f32.mxu0 %vm920_vm1, %v3804_v30  ;;  %4286 = vmatprep.mubr.msk.f32.mxu1 %vm920_vm1, %v3841_v32 }
  0xfc   : > { %4255 = vmatmul.mubr.msk.f32.gmra.mrb[68].mxu0 %vm920_vm1, %v3805_v33  ;;  %4287 = vmatmul.mubr.msk.f32.gmra.mrb[72].mxu1 %vm920_vm1, %v3842_v35 }
  0xfd   : > { %4257 = vmatprep.mubr.msk.f32.mxu0 %vm920_vm1, %v3806_v34  ;;  %4289 = vmatprep.mubr.msk.f32.mxu1 %vm920_vm1, %v3843_v36 }
 0x100   : > { %4258 = vmatmul.mubr.msk.f32.gmra.mrb[70].mxu0 %vm920_vm1, %v3807_v37  ;;  %4290 = vmatmul.mubr.msk.f32.gmra.mrb[74].mxu1 %vm920_vm1, %v3844_v39 }
 0x101   : > { %4260 = vmatprep.mubr.msk.f32.mxu0 %vm920_vm1, %v3808_v38  ;;  %4292 = vmatprep.mubr.msk.f32.mxu1 %vm920_vm1, %v3845_v40 }
 0x104   : > { %4261 = vmatmul.mubr.msk.f32.gmra.mrb[72].mxu0 %vm920_vm1, %v3809_v41  ;;  %4293 = vmatmul.mubr.msk.f32.gmra.mrb[76].mxu1 %vm920_vm1, %v3846_v43 }
 0x105   : > { %4263 = vmatprep.mubr.msk.f32.mxu0 %vm920_vm1, %v3810_v42  ;;  %4295 = vmatprep.mubr.msk.f32.mxu1 %vm920_vm1, %v3847_v44 }
 0x108   : > { %4264 = vmatmul.mubr.msk.f32.gmra.mrb[74].mxu0 %vm920_vm1, %v3811_v45  ;;  %4296 = vmatmul.mubr.msk.f32.gmra.mrb[78].mxu1 %vm920_vm1, %v3848_v47 }
 0x109   : > { %4266 = vmatprep.mubr.msk.f32.mxu0 %vm920_vm1, %v3812_v46 }
 0x10c   : > { %4267 = vmatmul.mubr.msk.f32.gmra.mrb[76].mxu0 %vm920_vm1, %v3813_v48 }
 0x10d   : > { %4269 = vmatprep.mubr.msk.f32.mxu0 %vm920_vm1, %v3814_v49 }
 0x110   : > { %4270 = vmatmul.mubr.msk.f32.gmra.mrb[78].mxu0 %vm920_vm1, %v3815_v50 }
 0x13f   : > { %v4068_v51 = vpop.f32.mrb[0].mxu1 }
 0x140   : > { %v1252_v52 = vpop.f32.mrb[1].mxu1 }
 0x143   : > { %v4071_v54 = vpop.f32.mrb[2].mxu1 }
 0x144   : > { %v1262_v55 = vpop.f32.mrb[3].mxu1 }
 0x147   : > { %v4042_v56 = vpop.f32.mrb[0].mxu0  ;;  %v4074_v60 = vpop.f32.mrb[4].mxu1 }
 0x148   : > { %v5185_v57 = vadd.f32 %v4042_v56, %v5182_v53  ;;  %v1039_v58 = vpop.f32.mrb[1].mxu0  ;;  %v1272_v62 = vpop.f32.mrb[5].mxu1 }
 0x149   : > { %v5188_v59 = vadd.f32 %v5182_v53, %v1039_v58 }
 0x14a   : > { %v5191_v61 = vadd.f32 %v4068_v51, %v5185_v57 }
 0x14b   : > { %v5194_v63 = vadd.f32 %v1252_v52, %v5188_v59  ;;  %v4045_v0 = vpop.f32.mrb[2].mxu0  ;;  %v4077_v3 = vpop.f32.mrb[6].mxu1 }
 0x14c   : > { %v5197_v16 = vadd.f32 %v4045_v0, %v5182_v53  ;;  %v1049_v1 = vpop.f32.mrb[3].mxu0  ;;  %v1282_v5 = vpop.f32.mrb[7].mxu1 }
 0x14d   : > { %v5200_v2 = vadd.f32 %v5182_v53, %v1049_v1 }
 0x14e   : > { %v5203_v4 = vadd.f32 %v4071_v54, %v5197_v16 }
 0x14f   : > { %v5206_v6 = vadd.f32 %v1262_v55, %v5200_v2  ;;  %v4048_v7 = vpop.f32.mrb[4].mxu0  ;;  %v4080_v11 = vpop.f32.mrb[8].mxu1 }
 0x150   : > { %v5209_v8 = vadd.f32 %v4048_v7, %v5182_v53  ;;  %v1059_v9 = vpop.f32.mrb[5].mxu0  ;;  %v1292_v13 = vpop.f32.mrb[9].mxu1 }
 0x151   : > { %v5212_v10 = vadd.f32 %v5182_v53, %v1059_v9  ;;  %v1348_v9 = vmax.f32 %v5191_v61, 0.0 }
 0x152   : > { %v5215_v12 = vadd.f32 %v4074_v60, %v5209_v8 }
 0x153   : > { %v5218_v14 = vadd.f32 %v1272_v62, %v5212_v10  ;;  %v4051_v15 = vpop.f32.mrb[6].mxu0  ;;  %v4083_v20 = vpop.f32.mrb[10].mxu1 }
 0x154   : > { %v5221_v17 = vadd.f32 %v4051_v15, %v5182_v53  ;;  %v1069_v18 = vpop.f32.mrb[7].mxu0  ;;  %v1302_v22 = vpop.f32.mrb[11].mxu1 }
 0x155   : > { %v5224_v19 = vadd.f32 %v5182_v53, %v1069_v18  ;;  %v1347_v18 = vmax.f32 %v5194_v63, 0.0 }
 0x156   : > { %v5227_v21 = vadd.f32 %v4077_v3, %v5221_v17 }
 0x157   : > { %v5230_v23 = vadd.f32 %v1282_v5, %v5224_v19  ;;  %v4054_v24 = vpop.f32.mrb[8].mxu0  ;;  %v4086_v28 = vpop.f32.mrb[12].mxu1 }
 0x158   : > { %v5233_v25 = vadd.f32 %v4054_v24, %v5182_v53  ;;  %v1079_v26 = vpop.f32.mrb[9].mxu0  ;;  %v1312_v30 = vpop.f32.mrb[13].mxu1 }
 0x159   : > { %v5236_v27 = vadd.f32 %v5182_v53, %v1079_v26 }
 0x15a   : > { %v5239_v29 = vadd.f32 %v4080_v11, %v5233_v25 }
 0x15b   : > { %v5242_v31 = vadd.f32 %v1292_v13, %v5236_v27  ;;  %v4057_v32 = vpop.f32.mrb[10].mxu0  ;;  %v4089_v36 = vpop.f32.mrb[14].mxu1 }
 0x15c   : > { %v5245_v33 = vadd.f32 %v4057_v32, %v5182_v53  ;;  %v1089_v34 = vpop.f32.mrb[11].mxu0  ;;  %v1322_v38 = vpop.f32.mrb[15].mxu1 }
 0x15d   : > { %v5248_v35 = vadd.f32 %v5182_v53, %v1089_v34 }
 0x15e   : > { %v5251_v37 = vadd.f32 %v4083_v20, %v5245_v33 }
 0x15f   : > { %v5254_v39 = vadd.f32 %v1302_v22, %v5248_v35  ;;  %v4060_v40 = vpop.f32.mrb[12].mxu0  ;;  %v4120_v44 = vpop.f32.mrb[16].mxu1 }
 0x160   : > { %v5257_v41 = vadd.f32 %v4060_v40, %v5182_v53  ;;  %v1099_v42 = vpop.f32.mrb[13].mxu0  ;;  %v1832_v46 = vadd.f32 %v4120_v44, %v5185_v57  ;;  %v1752_v47 = vpop.f32.mrb[17].mxu1  ;;  %v1350_v40 = vmax.f32 %v5203_v4, 0.0 }
 0x161   : > { %v5260_v43 = vadd.f32 %v5182_v53, %v1099_v42  ;;  %v1831_v50 = vadd.f32 %v1752_v47, %v5188_v59 }
 0x162   : > { %v5263_v45 = vadd.f32 %v4086_v28, %v5257_v41  ;;  %v1848_v26 = vmax.f32 %v1832_v46, 0.0 }
 0x163   : > { %v5267_v48 = vadd.f32 %v1312_v30, %v5260_v43  ;;  %v4063_v49 = vpop.f32.mrb[14].mxu0  ;;  %v4123_v55 = vpop.f32.mrb[18].mxu1  ;;  %v1847_v34 = vmax.f32 %v1831_v50, 0.0 }
 0x164   : > { %v5271_v51 = vadd.f32 %v4063_v49, %v5182_v53  ;;  %v1109_v52 = vpop.f32.mrb[15].mxu0  ;;  %v1834_v56 = vadd.f32 %v4123_v55, %v5197_v16  ;;  %v1762_v58 = vpop.f32.mrb[19].mxu1  ;;  %v1349_v49 = vmax.f32 %v5206_v6, 0.0 }
 0x165   : > { %v5274_v54 = vadd.f32 %v5182_v53, %v1109_v52  ;;  %v1833_v0 = vadd.f32 %v1762_v58, %v5200_v2 }
 0x166   : > { %v5278_v60 = vadd.f32 %v4089_v36, %v5271_v51  ;;  %v1850_v50 = vmax.f32 %v1834_v56, 0.0 }
 0x167   : > { %v4094_v62 = vpop.f32.mrb[16].mxu0  ;;  %v5282_v1 = vadd.f32 %v1322_v38, %v5274_v54  ;;  %v4126_v53 = vpop.f32.mrb[20].mxu1  ;;  %v1849_v4 = vmax.f32 %v1833_v0, 0.0 }
 0x168   : > { %v1574_v3 = vadd.f32 %v4094_v62, %v5185_v57  ;;  %v1494_v5 = vpop.f32.mrb[17].mxu0  ;;  %v1836_v13 = vadd.f32 %v4126_v53, %v5209_v8  ;;  %v1772_v15 = vpop.f32.mrb[21].mxu1 }
 0x169   : > { %v1573_v7 = vadd.f32 %v1494_v5, %v5188_v59  ;;  %v1835_v24 = vadd.f32 %v1772_v15, %v5212_v10 }
 0x16a   : > { %v1590_v11 = vmax.f32 %v1574_v3, 0.0  ;;  %v1852_v0 = vmax.f32 %v1836_v13, 0.0 }
 0x16b   : > { %v1589_v20 = vmax.f32 %v1573_v7, 0.0  ;;  %v4097_v22 = vpop.f32.mrb[18].mxu0  ;;  %v4129_v61 = vpop.f32.mrb[22].mxu1 }
 0x16c   : > { %v1606_v28 = vmax.f32 %v1348_v9, %v1590_v11  ;;  %v1576_v30 = vadd.f32 %v4097_v22, %v5197_v16  ;;  %v1504_v32 = vpop.f32.mrb[19].mxu0  ;;  %v1838_v44 = vadd.f32 %v4129_v61, %v5221_v17  ;;  %v1782_v63 = vpop.f32.mrb[23].mxu1  ;;  %v1352_v11 = vmax.f32 %v5215_v12, 0.0 }
 0x16d   : > { %v1605_v36 = vmax.f32 %v1347_v18, %v1589_v20  ;;  %v1575_v38 = vadd.f32 %v1504_v32, %v5200_v2  ;;  %v1837_v55 = vadd.f32 %v1782_v63, %v5224_v19  ;;  %v1351_v22 = vmax.f32 %v5218_v14, 0.0 }
 0x16e   : > { %v1592_v42 = vmax.f32 %v1576_v30, 0.0  ;;  %v5294_v47 = vmax.f32 %v1606_v28, %v1848_v26  ;;  %v1851_v12 = vmax.f32 %v1835_v24, 0.0  ;;  %v1854_v24 = vmax.f32 %v1838_v44, 0.0 }
 0x16f   : > { %v1591_v46 = vmax.f32 %v1575_v38, 0.0  ;;  %v4100_v52 = vpop.f32.mrb[20].mxu0  ;;  %v5298_v58 = vmax.f32 %v1605_v36, %v1847_v34  ;;  %v4132_v9 = vpop.f32.mrb[24].mxu1 }
 0x170   : > { %v1608_v62 = vmax.f32 %v1350_v40, %v1592_v42  ;;  %v1578_v3 = vadd.f32 %v4100_v52, %v5209_v8  ;;  %v1514_v5 = vpop.f32.mrb[21].mxu0  ;;  %v1840_v6 = vadd.f32 %v4132_v9, %v5233_v25  ;;  %v1792_v18 = vpop.f32.mrb[25].mxu1  ;;  %v1354_v42 = vmax.f32 %v5227_v21, 0.0 }
 0x171   : > { %v1607_v7 = vmax.f32 %v1349_v49, %v1591_v46  ;;  %v1577_v53 = vadd.f32 %v1514_v5, %v5212_v10  ;;  %v1839_v28 = vadd.f32 %v1792_v18, %v5236_v27  ;;  %v1353_v52 = vmax.f32 %v5230_v23, 0.0 }
 0x172   : > { %v1594_v15 = vmax.f32 %v1578_v3, 0.0  ;;  %v5304_v20 = vmax.f32 %v1608_v62, %v1850_v50  ;;  %v1853_v21 = vmax.f32 %v1837_v55, 0.0  ;;  %v1856_v55 = vmax.f32 %v1840_v6, 0.0 }
 0x173   : > { %v1593_v56 = vmax.f32 %v1577_v53, 0.0  ;;  %v4103_v26 = vpop.f32.mrb[22].mxu0  ;;  %v5308_v30 = vmax.f32 %v1607_v7, %v1849_v4  ;;  %v4135_v40 = vpop.f32.mrb[26].mxu1 }
 0x174   : > { %v1610_v32 = vmax.f32 %v1352_v11, %v1594_v15  ;;  %v1580_v34 = vadd.f32 %v4103_v26, %v5221_v17  ;;  %v1524_v36 = vpop.f32.mrb[23].mxu0  ;;  %v1842_v14 = vadd.f32 %v4135_v40, %v5245_v33  ;;  %v1802_v49 = vpop.f32.mrb[27].mxu1  ;;  %v1356_v15 = vmax.f32 %v5239_v29, 0.0 }
 0x175   : > { %v1609_v38 = vmax.f32 %v1351_v22, %v1593_v56  ;;  %v1579_v61 = vadd.f32 %v1524_v36, %v5224_v19  ;;  %v1841_v62 = vadd.f32 %v1802_v49, %v5248_v35  ;;  %v1355_v26 = vmax.f32 %v5242_v31, 0.0 }
 0x176   : > { %v1596_v63 = vmax.f32 %v1580_v34, 0.0  ;;  %v5314_v46 = vmax.f32 %v1610_v32, %v1852_v0  ;;  %v1855_v29 = vmax.f32 %v1839_v28, 0.0  ;;  %v1858_v28 = vmax.f32 %v1842_v14, 0.0 }
 0x177   : > { %v1595_v13 = vmax.f32 %v1579_v61, 0.0  ;;  %v4106_v50 = vpop.f32.mrb[24].mxu0  ;;  %v5318_v3 = vmax.f32 %v1609_v38, %v1851_v12  ;;  %v4138_v11 = vpop.f32.mrb[28].mxu1 }
 0x178   : > { %v1612_v5 = vmax.f32 %v1354_v42, %v1596_v63  ;;  %v1582_v4 = vadd.f32 %v4106_v50, %v5233_v25  ;;  %v1534_v7 = vpop.f32.mrb[25].mxu0  ;;  %v1844_v23 = vadd.f32 %v4138_v11, %v5257_v41  ;;  %v1812_v22 = vpop.f32.mrb[29].mxu1  ;;  %v1358_v63 = vmax.f32 %v5251_v37, 0.0 }
 0x179   : > { %v1611_v53 = vmax.f32 %v1353_v52, %v1595_v13  ;;  %v1581_v9 = vadd.f32 %v1534_v7, %v5236_v27  ;;  %v1843_v32 = vadd.f32 %v1812_v22, %v5260_v43  ;;  %v1357_v50 = vmax.f32 %v5254_v39, 0.0 }
 0x17a   : > { %v1598_v18 = vmax.f32 %v1582_v4, 0.0  ;;  %v5324_v56 = vmax.f32 %v1612_v5, %v1854_v24  ;;  %v1857_v37 = vmax.f32 %v1841_v62, 0.0  ;;  %v1860_v62 = vmax.f32 %v1844_v23, 0.0 }
 0x17b   : > { %v1597_v44 = vmax.f32 %v1581_v9, 0.0  ;;  %v4109_v0 = vpop.f32.mrb[26].mxu0  ;;  %v5328_v34 = vmax.f32 %v1611_v53, %v1853_v21  ;;  %v4141_v42 = vpop.f32.mrb[30].mxu1 }
 0x17c   : > { %v1614_v36 = vmax.f32 %v1356_v15, %v1598_v18  ;;  %v1584_v12 = vadd.f32 %v4109_v0, %v5245_v33  ;;  %v1544_v38 = vpop.f32.mrb[27].mxu0  ;;  %v1846_v31 = vadd.f32 %v4141_v42, %v5271_v51  ;;  %v1822_v52 = vpop.f32.mrb[31].mxu1  ;;  %v1360_v18 = vmax.f32 %v5263_v45, 0.0 }
 0x17d   : > { %v1613_v61 = vmax.f32 %v1355_v26, %v1597_v44  ;;  %v1583_v40 = vadd.f32 %v1544_v38, %v5248_v35  ;;  %v1845_v5 = vadd.f32 %v1822_v52, %v5274_v54  ;;  %v1359_v0 = vmax.f32 %v5267_v48, 0.0 }
 0x17e   : > { %v1600_v49 = vmax.f32 %v1584_v12, 0.0  ;;  %v5334_v13 = vmax.f32 %v1614_v36, %v1856_v55  ;;  %v1859_v45 = vmax.f32 %v1843_v32, 0.0  ;;  %v1862_v32 = vmax.f32 %v1846_v31, 0.0 }
 0x17f   : > { %v1599_v6 = vmax.f32 %v1583_v40, 0.0  ;;  %v4112_v24 = vpop.f32.mrb[28].mxu0  ;;  %v5338_v4 = vmax.f32 %v1613_v61, %v1855_v29  ;;  %v4172_v15 = vpop.f32.mrb[32].mxu1 }
 0x180   : > { %v1616_v7 = vmax.f32 %v1358_v63, %v1600_v49  ;;  %v1586_v21 = vadd.f32 %v4112_v24, %v5257_v41  ;;  %v1554_v53 = vpop.f32.mrb[29].mxu0  ;;  %v2348_v39 = vadd.f32 %v4172_v15, %v5185_v57  ;;  %v2268_v26 = vpop.f32.mrb[33].mxu1  ;;  %v1362_v49 = vmax.f32 %v5278_v60, 0.0 }
 0x181   : > { %v1615_v9 = vmax.f32 %v1357_v50, %v1599_v6  ;;  %v1585_v11 = vadd.f32 %v1554_v53, %v5260_v43  ;;  %v2347_v36 = vadd.f32 %v2268_v26, %v5188_v59  ;;  %v1361_v24 = vmax.f32 %v5282_v1, 0.0 }
 0x182   : > { %v1602_v22 = vmax.f32 %v1586_v21, 0.0  ;;  %v5344_v44 = vmax.f32 %v1616_v7, %v1858_v28  ;;  %v1861_v60 = vmax.f32 %v1845_v5, 0.0 }
 0x183   : > { %v1601_v14 = vmax.f32 %v1585_v11, 0.0  ;;  %v4115_v55 = vpop.f32.mrb[30].mxu0  ;;  %v5348_v12 = vmax.f32 %v1615_v9, %v1857_v37  ;;  %v4175_v63 = vpop.f32.mrb[34].mxu1 }
 0x184   : > { %v1618_v38 = vmax.f32 %v1360_v18, %v1602_v22  ;;  %v1588_v29 = vadd.f32 %v4115_v55, %v5271_v51  ;;  %v1564_v61 = vpop.f32.mrb[31].mxu0  ;;  %v2350_v48 = vadd.f32 %v4175_v63, %v5197_v16  ;;  %v2278_v50 = vpop.f32.mrb[35].mxu1 }
 0x185   : > { %v1617_v40 = vmax.f32 %v1359_v0, %v1601_v14  ;;  %v1587_v42 = vadd.f32 %v1564_v61, %v5274_v54  ;;  %v2349_v7 = vadd.f32 %v2278_v50, %v5200_v2 }
 0x186   : > { %v1604_v52 = vmax.f32 %v1588_v29, 0.0  ;;  %v5354_v6 = vmax.f32 %v1618_v38, %v1860_v62  ;;  %v2364_v38 = vmax.f32 %v2348_v39, 0.0 }
 0x187   : > { %v1603_v23 = vmax.f32 %v1587_v42, 0.0  ;;  %v4146_v28 = vpop.f32.mrb[32].mxu0  ;;  %v5358_v21 = vmax.f32 %v1617_v40, %v1859_v45  ;;  %v4178_v18 = vpop.f32.mrb[36].mxu1  ;;  %v2363_v45 = vmax.f32 %v2347_v36, 0.0 }
 0x188   : > { %v1620_v53 = vmax.f32 %v1362_v49, %v1604_v52  ;;  %v2090_v37 = vadd.f32 %v4146_v28, %v5185_v57  ;;  %v2010_v9 = vpop.f32.mrb[33].mxu0  ;;  %v2352_v26 = vadd.f32 %v4178_v18, %v5209_v8  ;;  %v2288_v1 = vpop.f32.mrb[37].mxu1 }
 0x189   : > { %v1619_v11 = vmax.f32 %v1361_v24, %v1603_v23  ;;  %v2089_v15 = vadd.f32 %v2010_v9, %v5188_v59  ;;  %v2351_v62 = vadd.f32 %v2288_v1, %v5212_v10 }
 0x18a   : > { %v2106_v22 = vmax.f32 %v2090_v37, 0.0  ;;  %v5363_v0 = vmax.f32 %v1620_v53, %v1862_v32  ;;  %v2366_v32 = vmax.f32 %v2350_v48, 0.0  ;;  %v2365_v37 = vmax.f32 %v2349_v7, 0.0 }
 0x18b   : > { %v2105_v14 = vmax.f32 %v2089_v15, 0.0  ;;  %v4149_v55 = vpop.f32.mrb[34].mxu0  ;;  %v5366_v31 = vmax.f32 %v1619_v11, %v1861_v60  ;;  %v4181_v63 = vpop.f32.mrb[38].mxu1 }
 0x18c   : > { %v2122_v29 = vmax.f32 %v5294_v47, %v2106_v22  ;;  %v2092_v5 = vadd.f32 %v4149_v55, %v5197_v16  ;;  %v2020_v61 = vpop.f32.mrb[35].mxu0  ;;  %v2354_v52 = vadd.f32 %v4181_v63, %v5221_v17  ;;  %v2298_v50 = vpop.f32.mrb[39].mxu1 }
 0x18d   : > { %v2121_v40 = vmax.f32 %v5298_v58, %v2105_v14  ;;  %v2091_v42 = vadd.f32 %v2020_v61, %v5200_v2  ;;  %v2353_v39 = vadd.f32 %v2298_v50, %v5224_v19 }
 0x18e   : > { %v2108_v49 = vmax.f32 %v2092_v5, 0.0  ;;  %v5373_v24 = vmax.f32 %v2122_v29, %v2364_v38  ;;  %v2368_v38 = vmax.f32 %v2352_v26, 0.0  ;;  %v2367_v5 = vmax.f32 %v2351_v62, 0.0 }
 0x18f   : > { %v2107_v23 = vmax.f32 %v2091_v42, 0.0  ;;  %v4152_v28 = vpop.f32.mrb[36].mxu0  ;;  %v5376_v47 = vmax.f32 %v2121_v40, %v2363_v45  ;;  %v4184_v11 = vpop.f32.mrb[40].mxu1 }
 0x190   : > { %v2124_v36 = vmax.f32 %v5304_v20, %v2108_v49  ;;  %v2094_v58 = vadd.f32 %v4152_v28, %v5209_v8  ;;  %v2030_v53 = vpop.f32.mrb[37].mxu0  ;;  %v2356_v18 = vadd.f32 %v4184_v11, %v5233_v25  ;;  %v2308_v22 = vpop.f32.mrb[41].mxu1 }
 0x191   : > { %v2123_v9 = vmax.f32 %v5308_v30, %v2107_v23  ;;  %v2093_v60 = vadd.f32 %v2030_v53, %v5212_v10  ;;  %v2355_v48 = vadd.f32 %v2308_v22, %v5236_v27 }
 0x192   : > { %v2110_v15 = vmax.f32 %v2094_v58, 0.0  ;;  %v5383_v1 = vmax.f32 %v2124_v36, %v2366_v32  ;;  %v2370_v32 = vmax.f32 %v2354_v52, 0.0  ;;  %v2369_v58 = vmax.f32 %v2353_v39, 0.0 }
 0x193   : > { %v2109_v14 = vmax.f32 %v2093_v60, 0.0  ;;  %v4155_v55 = vpop.f32.mrb[38].mxu0  ;;  %v5386_v20 = vmax.f32 %v2123_v9, %v2365_v37  ;;  %v4187_v40 = vpop.f32.mrb[42].mxu1 }
 0x194   : > { %v2126_v7 = vmax.f32 %v5314_v46, %v2110_v15  ;;  %v2096_v30 = vadd.f32 %v4155_v55, %v5221_v17  ;;  %v2040_v29 = vpop.f32.mrb[39].mxu0  ;;  %v2358_v63 = vadd.f32 %v4187_v40, %v5245_v33  ;;  %v2318_v49 = vpop.f32.mrb[43].mxu1 }
 0x195   : > { %v2125_v61 = vmax.f32 %v5318_v3, %v2109_v14  ;;  %v2095_v45 = vadd.f32 %v2040_v29, %v5224_v19  ;;  %v2357_v26 = vadd.f32 %v2318_v49, %v5248_v35 }
 0x196   : > { %v2112_v42 = vmax.f32 %v2096_v30, 0.0  ;;  %v5393_v50 = vmax.f32 %v2126_v7, %v2368_v38  ;;  %v2372_v38 = vmax.f32 %v2356_v18, 0.0  ;;  %v2371_v30 = vmax.f32 %v2355_v48, 0.0 }
 0x197   : > { %v2111_v23 = vmax.f32 %v2095_v45, 0.0  ;;  %v4158_v28 = vpop.f32.mrb[40].mxu0  ;;  %v5396_v46 = vmax.f32 %v2125_v61, %v2367_v5  ;;  %v4190_v9 = vpop.f32.mrb[44].mxu1 }
 0x198   : > { %v2128_v62 = vmax.f32 %v5324_v56, %v2112_v42  ;;  %v2098_v3 = vadd.f32 %v4158_v28, %v5233_v25  ;;  %v2050_v36 = vpop.f32.mrb[41].mxu0  ;;  %v2360_v11 = vadd.f32 %v4190_v9, %v5257_v41  ;;  %v2328_v15 = vpop.f32.mrb[45].mxu1 }
 0x199   : > { %v2127_v53 = vmax.f32 %v5328_v34, %v2111_v23  ;;  %v2097_v37 = vadd.f32 %v2050_v36, %v5236_v27  ;;  %v2359_v52 = vadd.f32 %v2328_v15, %v5260_v43 }
 0x19a   : > { %v2114_v60 = vmax.f32 %v2098_v3, 0.0  ;;  %v5403_v22 = vmax.f32 %v2128_v62, %v2370_v32  ;;  %v2374_v32 = vmax.f32 %v2358_v63, 0.0  ;;  %v2373_v3 = vmax.f32 %v2357_v26, 0.0 }
 0x19b   : > { %v2113_v14 = vmax.f32 %v2097_v37, 0.0  ;;  %v4161_v55 = vpop.f32.mrb[42].mxu0  ;;  %v5406_v56 = vmax.f32 %v2127_v53, %v2369_v58  ;;  %v4193_v61 = vpop.f32.mrb[46].mxu1 }
 0x19c   : > { %v2130_v39 = vmax.f32 %v5334_v13, %v2114_v60  ;;  %v2100_v34 = vadd.f32 %v4161_v55, %v5245_v33  ;;  %v2060_v7 = vpop.f32.mrb[43].mxu0  ;;  %v2362_v40 = vadd.f32 %v4193_v61, %v5271_v51  ;;  %v2338_v42 = vpop.f32.mrb[47].mxu1 }
 0x19d   : > { %v2129_v29 = vmax.f32 %v5338_v4, %v2113_v14  ;;  %v2099_v5 = vadd.f32 %v2060_v7, %v5248_v35  ;;  %v2361_v18 = vadd.f32 %v2338_v42, %v5274_v54 }
 0x19e   : > { %v2116_v45 = vmax.f32 %v2100_v34, 0.0  ;;  %v5413_v49 = vmax.f32 %v2130_v39, %v2372_v38  ;;  %v2376_v38 = vmax.f32 %v2360_v11, 0.0  ;;  %v2375_v34 = vmax.f32 %v2359_v52, 0.0 }
 0x19f   : > { %v2115_v23 = vmax.f32 %v2099_v5, 0.0  ;;  %v4164_v28 = vpop.f32.mrb[44].mxu0  ;;  %v5416_v13 = vmax.f32 %v2129_v29, %v2371_v30  ;;  %v4224_v53 = vpop.f32.mrb[48].mxu1 }
 0x1a0   : > { %v2132_v48 = vmax.f32 %v5344_v44, %v2116_v45  ;;  %v2102_v4 = vadd.f32 %v4164_v28, %v5257_v41  ;;  %v2070_v62 = vpop.f32.mrb[45].mxu0  ;;  %v2864_v9 = vadd.f32 %v4224_v53, %v5185_v57  ;;  %v2784_v60 = vpop.f32.mrb[49].mxu1 }
 0x1a1   : > { %v2131_v36 = vmax.f32 %v5348_v12, %v2115_v23  ;;  %v2101_v58 = vadd.f32 %v2070_v62, %v5260_v43  ;;  %v2863_v63 = vadd.f32 %v2784_v60, %v5188_v59 }
 0x1a2   : > { %v2118_v37 = vmax.f32 %v2102_v4, 0.0  ;;  %v5423_v15 = vmax.f32 %v2132_v48, %v2374_v32  ;;  %v2378_v32 = vmax.f32 %v2362_v40, 0.0  ;;  %v2377_v4 = vmax.f32 %v2361_v18, 0.0 }
 0x1a3   : > { %v2117_v14 = vmax.f32 %v2101_v58, 0.0  ;;  %v4167_v55 = vpop.f32.mrb[46].mxu0  ;;  %v5426_v44 = vmax.f32 %v2131_v36, %v2373_v3  ;;  %v4227_v29 = vpop.f32.mrb[50].mxu1 }
 0x1a4   : > { %v2134_v26 = vmax.f32 %v5354_v6, %v2118_v37  ;;  %v2104_v12 = vadd.f32 %v4167_v55, %v5271_v51  ;;  %v2080_v39 = vpop.f32.mrb[47].mxu0  ;;  %v2866_v61 = vadd.f32 %v4227_v29, %v5197_v16  ;;  %v2794_v45 = vpop.f32.mrb[51].mxu1 }
 0x1a5   : > { %v2133_v7 = vmax.f32 %v5358_v21, %v2117_v14  ;;  %v2103_v30 = vadd.f32 %v2080_v39, %v5274_v54  ;;  %v2865_v11 = vadd.f32 %v2794_v45, %v5200_v2 }
 0x1a6   : > { %v2120_v5 = vmax.f32 %v2104_v12, 0.0  ;;  %v5433_v42 = vmax.f32 %v2134_v26, %v2376_v38  ;;  %v2880_v38 = vmax.f32 %v2864_v9, 0.0  ;;  %v2879_v12 = vmax.f32 %v2863_v63, 0.0 }
 0x1a7   : > { %v2119_v23 = vmax.f32 %v2103_v30, 0.0  ;;  %v4198_v28 = vpop.f32.mrb[48].mxu0  ;;  %v5436_v6 = vmax.f32 %v2133_v7, %v2375_v34  ;;  %v4230_v36 = vpop.f32.mrb[52].mxu1 }
 0x1a8   : > { %v2136_v52 = vmax.f32 %v5363_v0, %v2120_v5  ;;  %v2606_v21 = vadd.f32 %v4198_v28, %v5185_v57  ;;  %v2526_v48 = vpop.f32.mrb[49].mxu0  ;;  %v2868_v53 = vadd.f32 %v4230_v36, %v5209_v8  ;;  %v2804_v37 = vpop.f32.mrb[53].mxu1 }
 0x1a9   : > { %v2135_v62 = vmax.f32 %v5366_v31, %v2119_v23  ;;  %v2605_v3 = vadd.f32 %v2526_v48, %v5188_v59  ;;  %v2867_v40 = vadd.f32 %v2804_v37, %v5212_v10 }
 0x1aa   : > { %v2622_v58 = vmax.f32 %v2606_v21, 0.0  ;;  %v5443_v60 = vmax.f32 %v2136_v52, %v2378_v32  ;;  %v2882_v32 = vmax.f32 %v2866_v61, 0.0  ;;  %v2881_v21 = vmax.f32 %v2865_v11, 0.0 }
 0x1ab   : > { %v2621_v14 = vmax.f32 %v2605_v3, 0.0  ;;  %v4201_v55 = vpop.f32.mrb[50].mxu0  ;;  %v5446_v0 = vmax.f32 %v2135_v62, %v2377_v4  ;;  %v4233_v7 = vpop.f32.mrb[54].mxu1 }
 0x1ac   : > { %v2638_v18 = vmax.f32 %v5373_v24, %v2622_v58  ;;  %v2608_v31 = vadd.f32 %v4201_v55, %v5197_v16  ;;  %v2536_v26 = vpop.f32.mrb[51].mxu0  ;;  %v2870_v29 = vadd.f32 %v4233_v7, %v5221_v17  ;;  %v2814_v5 = vpop.f32.mrb[55].mxu1 }
 0x1ad   : > { %v2637_v39 = vmax.f32 %v5376_v47, %v2621_v14  ;;  %v2607_v34 = vadd.f32 %v2536_v26, %v5200_v2  ;;  %v2869_v9 = vadd.f32 %v2814_v5, %v5224_v19 }
 0x1ae   : > { %v2624_v30 = vmax.f32 %v2608_v31, 0.0  ;;  %v5453_v45 = vmax.f32 %v2638_v18, %v2880_v38  ;;  %v2884_v38 = vmax.f32 %v2868_v53, 0.0  ;;  %v2883_v31 = vmax.f32 %v2867_v40, 0.0 }
 0x1af   : > { %v2623_v23 = vmax.f32 %v2607_v34, 0.0  ;;  %v4204_v28 = vpop.f32.mrb[52].mxu0  ;;  %v5456_v24 = vmax.f32 %v2637_v39, %v2879_v12  ;;  %v4236_v62 = vpop.f32.mrb[56].mxu1 }
 0x1b0   : > { %v2640_v63 = vmax.f32 %v5383_v1, %v2624_v30  ;;  %v2610_v47 = vadd.f32 %v4204_v28, %v5209_v8  ;;  %v2546_v52 = vpop.f32.mrb[53].mxu0  ;;  %v2872_v36 = vadd.f32 %v4236_v62, %v5233_v25  ;;  %v2824_v58 = vpop.f32.mrb[57].mxu1 }
 0x1b1   : > { %v2639_v48 = vmax.f32 %v5386_v20, %v2623_v23  ;;  %v2609_v4 = vadd.f32 %v2546_v52, %v5212_v10  ;;  %v2871_v61 = vadd.f32 %v2824_v58, %v5236_v27 }
 0x1b2   : > { %v2626_v3 = vmax.f32 %v2610_v47, 0.0  ;;  %v5463_v37 = vmax.f32 %v2640_v63, %v2882_v32  ;;  %v2886_v32 = vmax.f32 %v2870_v29, 0.0  ;;  %v2885_v47 = vmax.f32 %v2869_v9, 0.0 }
 0x1b3   : > { %v2625_v14 = vmax.f32 %v2609_v4, 0.0  ;;  %v4207_v55 = vpop.f32.mrb[54].mxu0  ;;  %v5466_v1 = vmax.f32 %v2639_v48, %v2881_v21  ;;  %v4239_v39 = vpop.f32.mrb[58].mxu1 }
 0x1b4   : > { %v2642_v11 = vmax.f32 %v5393_v50, %v2626_v3  ;;  %v2612_v20 = vadd.f32 %v4207_v55, %v5221_v17  ;;  %v2556_v18 = vpop.f32.mrb[55].mxu0  ;;  %v2874_v7 = vadd.f32 %v4239_v39, %v5245_v33  ;;  %v2834_v30 = vpop.f32.mrb[59].mxu1 }
 0x1b5   : > { %v2641_v26 = vmax.f32 %v5396_v46, %v2625_v14  ;;  %v2611_v12 = vadd.f32 %v2556_v18, %v5224_v19  ;;  %v2873_v53 = vadd.f32 %v2834_v30, %v5248_v35 }
 0x1b6   : > { %v2628_v34 = vmax.f32 %v2612_v20, 0.0  ;;  %v5473_v5 = vmax.f32 %v2642_v11, %v2884_v38  ;;  %v2888_v38 = vmax.f32 %v2872_v36, 0.0  ;;  %v2887_v20 = vmax.f32 %v2871_v61, 0.0 }
 0x1b7   : > { %v2627_v23 = vmax.f32 %v2611_v12, 0.0  ;;  %v4210_v28 = vpop.f32.mrb[56].mxu0  ;;  %v5476_v50 = vmax.f32 %v2641_v26, %v2883_v31  ;;  %v4242_v48 = vpop.f32.mrb[60].mxu1 }
 0x1b8   : > { %v2644_v40 = vmax.f32 %v5403_v22, %v2628_v34  ;;  %v2614_v46 = vadd.f32 %v4210_v28, %v5233_v25  ;;  %v2566_v63 = vpop.f32.mrb[57].mxu0  ;;  %v2876_v62 = vadd.f32 %v4242_v48, %v5257_v41  ;;  %v2844_v3 = vpop.f32.mrb[61].mxu1 }
 0x1b9   : > { %v2643_v52 = vmax.f32 %v5406_v56, %v2627_v23  ;;  %v2613_v21 = vadd.f32 %v2566_v63, %v5236_v27  ;;  %v2875_v29 = vadd.f32 %v2844_v3, %v5260_v43 }
 0x1ba   : > { %v2630_v4 = vmax.f32 %v2614_v46, 0.0  ;;  %v5483_v58 = vmax.f32 %v2644_v40, %v2886_v32  ;;  %v2890_v32 = vmax.f32 %v2874_v7, 0.0  ;;  %v2889_v46 = vmax.f32 %v2873_v53, 0.0 }
 0x1bb   : > { %v2629_v14 = vmax.f32 %v2613_v21, 0.0  ;;  %v4213_v55 = vpop.f32.mrb[58].mxu0  ;;  %v5486_v22 = vmax.f32 %v2643_v52, %v2885_v47  ;;  %v4245_v26 = vpop.f32.mrb[62].mxu1 }
 0x1bc   : > { %v2646_v9 = vmax.f32 %v5413_v49, %v2630_v4  ;;  %v2616_v56 = vadd.f32 %v4213_v55, %v5245_v33  ;;  %v2576_v11 = vpop.f32.mrb[59].mxu0  ;;  %v2878_v39 = vadd.f32 %v4245_v26, %v5271_v51  ;;  %v2854_v34 = vpop.f32.mrb[63].mxu1 }
 0x1bd   : > { %v2645_v18 = vmax.f32 %v5416_v13, %v2629_v14  ;;  %v2615_v31 = vadd.f32 %v2576_v11, %v5248_v35  ;;  %v2877_v36 = vadd.f32 %v2854_v34, %v5274_v54 }
 0x1be   : > { %v2632_v12 = vmax.f32 %v2616_v56, 0.0  ;;  %v5493_v30 = vmax.f32 %v2646_v9, %v2888_v38  ;;  %v2892_v38 = vmax.f32 %v2876_v62, 0.0  ;;  %v2891_v56 = vmax.f32 %v2875_v29, 0.0 }
 0x1bf   : > { %v2631_v23 = vmax.f32 %v2615_v31, 0.0  ;;  %v4216_v28 = vpop.f32.mrb[60].mxu0  ;;  %v5496_v49 = vmax.f32 %v2645_v18, %v2887_v20  ;;  %v4276_v52 = vpop.f32.mrb[64].mxu1 }
 0x1c0   : > { %v2648_v61 = vmax.f32 %v5423_v15, %v2632_v12  ;;  %v2618_v13 = vadd.f32 %v4216_v28, %v5257_v41  ;;  %v2586_v40 = vpop.f32.mrb[61].mxu0  ;;  %v3380_v48 = vadd.f32 %v4276_v52, %v5185_v57  ;;  %v3300_v4 = vpop.f32.mrb[65].mxu1 }
 0x1c1   : > { %v2647_v63 = vmax.f32 %v5426_v44, %v2631_v23  ;;  %v2617_v47 = vadd.f32 %v2586_v40, %v5260_v43  ;;  %v3379_v7 = vadd.f32 %v3300_v4, %v5188_v59 }
 0x1c2   : > { %v2634_v21 = vmax.f32 %v2618_v13, 0.0  ;;  %v5503_v3 = vmax.f32 %v2648_v61, %v2890_v32  ;;  %v2894_v32 = vmax.f32 %v2878_v39, 0.0  ;;  %v2893_v13 = vmax.f32 %v2877_v36, 0.0 }
 0x1c3   : > { %v2633_v14 = vmax.f32 %v2617_v47, 0.0  ;;  %v4219_v55 = vpop.f32.mrb[62].mxu0  ;;  %v5506_v15 = vmax.f32 %v2647_v63, %v2889_v46  ;;  %v4279_v18 = vpop.f32.mrb[66].mxu1 }
 0x1c4   : > { %v2650_v53 = vmax.f32 %v5433_v42, %v2634_v21  ;;  %v2620_v44 = vadd.f32 %v4219_v55, %v5271_v51  ;;  %v2596_v9 = vpop.f32.mrb[63].mxu0  ;;  %v3382_v26 = vadd.f32 %v4279_v18, %v5197_v16  ;;  %v3310_v12 = vpop.f32.mrb[67].mxu1 }
 0x1c5   : > { %v2649_v11 = vmax.f32 %v5436_v6, %v2633_v14  ;;  %v2619_v20 = vadd.f32 %v2596_v9, %v5274_v54  ;;  %v3381_v62 = vadd.f32 %v3310_v12, %v5200_v2 }
 0x1c6   : > { %v2636_v31 = vmax.f32 %v2620_v44, 0.0  ;;  %v5513_v34 = vmax.f32 %v2650_v53, %v2892_v38  ;;  %v3398_v12 = vmax.f32 %v3382_v26, 0.0 }
 0x1c7   : > { %v2635_v23 = vmax.f32 %v2619_v20, 0.0  ;;  %v4250_v28 = vpop.f32.mrb[64].mxu0  ;;  %v5516_v42 = vmax.f32 %v2649_v11, %v2891_v56  ;;  %v4282_v63 = vpop.f32.mrb[68].mxu1 }
 0x1c8   : > { %v2652_v29 = vmax.f32 %v5443_v60, %v2636_v31  ;;  %v3122_v6 = vadd.f32 %v4250_v28, %v5185_v57  ;;  %v3042_v61 = vpop.f32.mrb[65].mxu0  ;;  %v3384_v52 = vadd.f32 %v4282_v63, %v5209_v8  ;;  %v3320_v21 = vpop.f32.mrb[69].mxu1  ;;  %v3396_v57 = vmax.f32 %v3380_v48, 0.0 }
 0x1c9   : > { %v2651_v40 = vmax.f32 %v5446_v0, %v2635_v23  ;;  %v3121_v46 = vadd.f32 %v3042_v61, %v5188_v59  ;;  %v3383_v60 = vadd.f32 %v3320_v21, %v5212_v10  ;;  %v3395_v59 = vmax.f32 %v3379_v7, 0.0 }
 0x1ca   : > { %v3138_v47 = vmax.f32 %v3122_v6, 0.0  ;;  %v5523_v4 = vmax.f32 %v2652_v29, %v2894_v32 }
 0x1cb   : > { %v3137_v14 = vmax.f32 %v3121_v46, 0.0  ;;  %v4253_v39 = vpop.f32.mrb[66].mxu0  ;;  %v5526_v55 = vmax.f32 %v2651_v40, %v2893_v13  ;;  %v4285_v9 = vpop.f32.mrb[70].mxu1 }
 0x1cc   : > { %v3154_v36 = vmax.f32 %v5453_v45, %v3138_v47  ;;  %v3124_v0 = vadd.f32 %v4253_v39, %v5197_v16  ;;  %v3052_v38 = vpop.f32.mrb[67].mxu0  ;;  %v3386_v45 = vadd.f32 %v4285_v9, %v5221_v17  ;;  %v3330_v16 = vpop.f32.mrb[71].mxu1 }
 0x1cd   : > { %v3153_v53 = vmax.f32 %v5456_v24, %v3137_v14  ;;  %v3123_v44 = vadd.f32 %v3052_v38, %v5200_v2  ;;  %v3385_v31 = vadd.f32 %v3330_v16, %v5224_v19  ;;  %v3397_v2 = vmax.f32 %v3381_v62, 0.0 }
 0x1ce   : > { %v3412_v48 = vmax.f32 %v3154_v36, %v3396_v57  ;;  %v3140_v56 = vmax.f32 %v3124_v0, 0.0 }
 0x1cf   : > { %v3411_v11 = vmax.f32 %v3153_v53, %v3395_v59  ;;  %v3139_v20 = vmax.f32 %v3123_v44, 0.0  ;;  %v4256_v18 = vpop.f32.mrb[68].mxu0  ;;  %v4288_v29 = vpop.f32.mrb[72].mxu1 }
 0x1d0   : > { %3428 = vst [vmem:[%s5535_s17 + $0x8] sm:$0xff] %v3412_v48  ;;  %v3156_v7 = vmax.f32 %v5463_v37, %v3140_v56  ;;  %v3126_v24 = vadd.f32 %v4256_v18, %v5209_v8  ;;  %v3062_v23 = vpop.f32.mrb[69].mxu0  ;;  %v3388_v13 = vadd.f32 %v4288_v29, %v5233_v25  ;;  %v3340_v40 = vpop.f32.mrb[73].mxu1  ;;  %v3400_v8 = vmax.f32 %v3384_v52, 0.0 }
 0x1d1   : > { %3427 = vst [vmem:[%s5535_s17] sm:$0xff] %v3411_v11  ;;  %v3155_v28 = vmax.f32 %v5466_v1, %v3139_v20  ;;  %v3125_v32 = vadd.f32 %v3062_v23, %v5212_v10  ;;  %v3387_v63 = vadd.f32 %v3340_v40, %v5236_v27  ;;  %v3399_v10 = vmax.f32 %v3383_v60, 0.0 }
 0x1d2   : > { %v3414_v6 = vmax.f32 %v3156_v7, %v3398_v12  ;;  %v3142_v61 = vmax.f32 %v3126_v24, 0.0 }
 0x1d3   : > { %v3413_v26 = vmax.f32 %v3155_v28, %v3397_v2  ;;  %v3141_v46 = vmax.f32 %v3125_v32, 0.0  ;;  %v4259_v37 = vpop.f32.mrb[70].mxu0  ;;  %v4291_v39 = vpop.f32.mrb[74].mxu1 }
 0x1d4   : > { %3430 = vst [vmem:[%s5535_s17 + $0x18] sm:$0xff] %v3414_v6  ;;  %v3158_v62 = vmax.f32 %v5473_v5, %v3142_v61  ;;  %v3128_v1 = vadd.f32 %v4259_v37, %v5221_v17  ;;  %v3072_v47 = vpop.f32.mrb[71].mxu0  ;;  %v3390_v0 = vadd.f32 %v4291_v39, %v5245_v33  ;;  %v3350_v38 = vpop.f32.mrb[75].mxu1  ;;  %v3402_v17 = vmax.f32 %v3386_v45, 0.0 }
 0x1d5   : > { %3429 = vst [vmem:[%s5535_s17 + $0x10] sm:$0xff] %v3413_v26  ;;  %v3157_v21 = vmax.f32 %v5476_v50, %v3141_v46  ;;  %v3127_v14 = vadd.f32 %v3072_v47, %v5224_v19  ;;  %v3389_v53 = vadd.f32 %v3350_v38, %v5248_v35  ;;  %v3401_v19 = vmax.f32 %v3385_v31, 0.0 }
 0x1d6   : > { %v3416_v57 = vmax.f32 %v3158_v62, %v3400_v8  ;;  %v3144_v36 = vmax.f32 %v3128_v1, 0.0  ;;  %v3406_v26 = vmax.f32 %v3390_v0, 0.0 }
 0x1d7   : > { %v3415_v52 = vmax.f32 %v3157_v21, %v3399_v10  ;;  %v3143_v59 = vmax.f32 %v3127_v14, 0.0  ;;  %v4262_v5 = vpop.f32.mrb[72].mxu0  ;;  %v4294_v56 = vpop.f32.mrb[76].mxu1  ;;  %v3405_v37 = vmax.f32 %v3389_v53, 0.0 }
 0x1d8   : > { %3432 = vst [vmem:[%s5535_s17 + $0x28] sm:$0xff] %v3416_v57  ;;  %v3160_v60 = vmax.f32 %v5483_v58, %v3144_v36  ;;  %v3130_v50 = vadd.f32 %v4262_v5, %v5233_v25  ;;  %v3082_v44 = vpop.f32.mrb[73].mxu0  ;;  %v3392_v20 = vadd.f32 %v4294_v56, %v5257_v41  ;;  %v3360_v18 = vpop.f32.mrb[77].mxu1  ;;  %v3404_v25 = vmax.f32 %v3388_v13, 0.0 }
 0x1d9   : > { %3431 = vst [vmem:[%s5535_s17 + $0x20] sm:$0xff] %v3415_v52  ;;  %v3159_v9 = vmax.f32 %v5486_v22, %v3143_v59  ;;  %v3129_v48 = vadd.f32 %v3082_v44, %v5236_v27  ;;  %v3391_v7 = vadd.f32 %v3360_v18, %v5260_v43  ;;  %v3403_v27 = vmax.f32 %v3387_v63, 0.0 }
 0x1da   : > { %v3418_v16 = vmax.f32 %v3160_v60, %v3402_v17  ;;  %v3146_v11 = vmax.f32 %v3130_v50, 0.0  ;;  %v3408_v14 = vmax.f32 %v3392_v20, 0.0 }
 0x1db   : > { %v3417_v45 = vmax.f32 %v3159_v9, %v3401_v19  ;;  %v3145_v12 = vmax.f32 %v3129_v48, 0.0  ;;  %v4265_v58 = vpop.f32.mrb[74].mxu0  ;;  %v4297_v28 = vpop.f32.mrb[78].mxu1  ;;  %v3407_v57 = vmax.f32 %v3391_v7, 0.0 }
 0x1dc   : > { %3434 = vst [vmem:[%s5535_s17 + $0x38] sm:$0xff] %v3418_v16  ;;  %v3162_v31 = vmax.f32 %v5493_v30, %v3146_v11  ;;  %v3132_v22 = vadd.f32 %v4265_v58, %v5245_v33  ;;  %v3092_v24 = vpop.f32.mrb[75].mxu0  ;;  %v3394_v6 = vadd.f32 %v4297_v28, %v5271_v51  ;;  %v3370_v61 = vpop.f32.mrb[79].mxu1 }
 0x1dd   : > { %3433 = vst [vmem:[%s5535_s17 + $0x30] sm:$0xff] %v3417_v45  ;;  %v3161_v23 = vmax.f32 %v5496_v49, %v3145_v12  ;;  %v3131_v2 = vadd.f32 %v3092_v24, %v5248_v35  ;;  %v3393_v33 = vadd.f32 %v3370_v61, %v5274_v54 }
 0x1de   : > { %v3420_v32 = vmax.f32 %v3162_v31, %v3404_v25  ;;  %v3148_v29 = vmax.f32 %v3132_v22, 0.0  ;;  %v3410_v59 = vmax.f32 %v3394_v6, 0.0 }
 0x1df   : > { %v3419_v13 = vmax.f32 %v3161_v23, %v3403_v27  ;;  %v3147_v40 = vmax.f32 %v3131_v2, 0.0  ;;  %v4268_v30 = vpop.f32.mrb[76].mxu0 }
 0x1e0   : > { %3436 = vst [vmem:[%s5535_s17 + $0x48] sm:$0xff] %v3420_v32  ;;  %v3164_v46 = vmax.f32 %v5503_v3, %v3148_v29  ;;  %v3134_v49 = vadd.f32 %v4268_v30, %v5257_v41  ;;  %v3102_v35 = vpop.f32.mrb[77].mxu0 }
 0x1e1   : > { %3435 = vst [vmem:[%s5535_s17 + $0x40] sm:$0xff] %v3419_v13  ;;  %v3163_v63 = vmax.f32 %v5506_v15, %v3147_v40  ;;  %v3133_v8 = vadd.f32 %v3102_v35, %v5260_v43 }
 0x1e2   : > { %v3422_v62 = vmax.f32 %v3164_v46, %v3406_v26  ;;  %v3150_v1 = vmax.f32 %v3134_v49, 0.0 }
 0x1e3   : > { %v3421_v47 = vmax.f32 %v3163_v63, %v3405_v37  ;;  %v3149_v10 = vmax.f32 %v3133_v8, 0.0  ;;  %v4271_v21 = vpop.f32.mrb[78].mxu0 }
 0x1e4   : > { %3438 = vst [vmem:[%s5535_s17 + $0x58] sm:$0xff] %v3422_v62  ;;  %v3166_v3 = vmax.f32 %v5513_v34, %v3150_v1  ;;  %v3136_v41 = vadd.f32 %v4271_v21, %v5271_v51  ;;  %v3112_v39 = vpop.f32.mrb[79].mxu0  ;;  %v3409_v34 = vmax.f32 %v3393_v33, 0.0 }
 0x1e5   : > { %3437 = vst [vmem:[%s5535_s17 + $0x50] sm:$0xff] %v3421_v47  ;;  %v3165_v43 = vmax.f32 %v5516_v42, %v3149_v10  ;;  %v3135_v15 = vadd.f32 %v3112_v39, %v5274_v54 }
 0x1e6   : > { %v3424_v36 = vmax.f32 %v3166_v3, %v3408_v14  ;;  %v3152_v0 = vmax.f32 %v3136_v41, 0.0 }
 0x1e7   : > { %v3423_v38 = vmax.f32 %v3165_v43, %v3407_v57  ;;  %v3151_v52 = vmax.f32 %v3135_v15, 0.0 }
 0x1e8   : > { %3440 = vst [vmem:[%s5535_s17 + $0x68] sm:$0xff] %v3424_v36  ;;  %v3168_v5 = vmax.f32 %v5523_v4, %v3152_v0 }
 0x1e9   : > { %3439 = vst [vmem:[%s5535_s17 + $0x60] sm:$0xff] %v3423_v38  ;;  %v3167_v51 = vmax.f32 %v5526_v55, %v3151_v52 }
 0x1ea   : > { %v3426_v53 = vmax.f32 %v3168_v5, %v3410_v59 }
 0x1eb   : > { %v3425_v17 = vmax.f32 %v3167_v51, %v3409_v34 }
 0x1ec   : > { %3442 = vst [vmem:[%s5535_s17 + $0x78] sm:$0xff] %v3426_v53 }
 0x1ed   : > { %3441 = vst [vmem:[%s5535_s17 + $0x70] sm:$0xff] %v3425_v17 }
 0x1ee PF: > { %s15_s24 = sadd.s32 1, %s4411_s24   ;;  %s5618_s18 = smov %s4391_s19 }
 0x1ef   : > { %p12_p12 = scmp.ge.s32.totalorder %s15_s24, 6   ;;  %s5619_s19 = smov %s4494_s6 }
 0x1f0   : > { %s5620_s20 = smov %s4403_s22  ;;  %s5621_s21 = smov %s4407_s23 }
 0x1f1   : > { %s5622_s22 = smov %s5625_s25  ;;  %s5623_s23 = smov %s5629_s26 }
 0x1f2   :  { %14 = sbr.rel (!%p12_p12) target bundleno = 4 (0x4), region = 124 }

</bundles_post_ra>
